<compile_context>
chip_gen: v5e
topology: v5e:2x2
jax: 0.10.0
libtpu: 0.0.40
codegen_flags: <defaults>
</compile_context>

<pallas_src>
import math
import jax
import jax.numpy as jnp
from jax.experimental import pallas as pl
from jax.experimental.pallas import tpu as pltpu

LEVEL = 3        # number of dilation levels (1, 2, 3)
KSIZE = 3        # conv kernel size
MAXPAD = 3       # = largest dilation; halo width each side
NWIN = 2 * MAXPAD + 1   # 7 shifted windows cover all taps of all levels
LN_EPS = 1e-5    # nn.LayerNorm default eps


def fim_block_kernel(x_ref, w_ref, p_ref, emb_ref, repr_ref):
    """One grid step processes a block of `ts` news items.

    x_ref    : (ts, L, E)            bf16  unpadded token embeddings
    w_ref    : (NWIN*E, LEVEL*H)     bf16  level+tap fused dilated conv weights
    p_ref    : (8, H)                f32   packed params:
                                           rows 0..2 conv bias (levels 0..2),
                                           row 3 ln_gamma, row 4 ln_beta,
                                           row 5 query_levels, row 6 query_words
    emb_ref  : (ts*L, LEVEL*H)       bf16/f32  lane-dense news_embedding block
    repr_ref : (ts, H)               f32   news_repr block
    """
    ts, L, E = x_ref.shape
    H = repr_ref.shape[1]
    M = ts * L
    inv_sqrt_h = 1.0 / math.sqrt(H)

    gamma = p_ref[3:4, :]                        # (1, H) f32
    beta = p_ref[4:5, :]
    ql = p_ref[5:6, :]
    qw = p_ref[6:7, :]

    x = x_ref[...]                               # (ts, L, E) bf16

    # ---- halo pad in VMEM (replaces the pre-kernel HBM jnp.pad round trip) --
    zpad = jnp.zeros((ts, MAXPAD, E), x.dtype)
    xp = jnp.concatenate([zpad, x, zpad], axis=1)          # (ts, L+6, E)

    # ---- single im2col for all 3 dilation levels: 7 shifted windows ---------
    xc = jnp.concatenate([xp[:, j:j + L, :] for j in range(NWIN)], axis=-1)
    xc = xc.reshape(M, NWIN * E)                            # (M, 7E) bf16

    # ---- one fused MXU matmul for all 3 dilated convs -----------------------
    # (M, 224) @ (224, 96) -> f32, output columns level-major [lvl0 H | lvl1 H | lvl2 H]
    acc = jnp.dot(xc, w_ref[...], preferred_element_type=jnp.float32)

    # ---- per-level bias + LayerNorm (one-pass mean / E[x^2]) + ReLU ---------
    # TODO(synk): the 6 cross-lane reductions below could be moved to the MXU
    # via a (96, 96) block-averaging matmul if XLU ever becomes co-critical.
    levels = []
    for i in range(LEVEL):
        a = acc[:, i * H:(i + 1) * H] + p_ref[i:i + 1, :]   # (M, H) f32
        mean = jnp.mean(a, axis=-1, keepdims=True)
        ex2 = jnp.mean(a * a, axis=-1, keepdims=True)
        var = ex2 - mean * mean
        y = (a - mean) * jax.lax.rsqrt(var + LN_EPS)
        y = y * gamma + beta
        levels.append(jnp.maximum(y, 0.0))                  # ReLU

    # Lane-dense 2-D embedding store: (ts*L, LEVEL*H)
    emb_ref[...] = jnp.concatenate(levels, axis=-1).astype(emb_ref.dtype)

    # ---- ScaledDpAttention(query_levels, emb, emb) over the 3 levels --------
    s = [jnp.sum(y * ql, axis=-1, keepdims=True) * inv_sqrt_h for y in levels]
    m = jnp.maximum(jnp.maximum(s[0], s[1]), s[2])
    e = [jnp.exp(si - m) for si in s]
    inv_den = pl.reciprocal(e[0] + e[1] + e[2], approx=True)        # (M, 1)
    attn = (e[0] * levels[0] + e[1] * levels[1]
            + e[2] * levels[2]) * inv_den                           # (M, H)

    # ---- ScaledDpAttention(query_words, attn, attn) over the sequence -------
    attn3 = attn.reshape(ts, L, H)
    ws = jnp.sum(attn3 * qw, axis=-1, keepdims=True) * inv_sqrt_h   # (ts,L,1)
    wm = jnp.max(ws, axis=1, keepdims=True)                         # (ts,1,1)
    we = jnp.exp(ws - wm)
    w_inv = pl.reciprocal(jnp.sum(we, axis=1, keepdims=True), approx=True)
    # TODO(synk): optionally repack (ts, 32) -> (ts*H//128, 128) for unmasked
    # full-width stores; repr is ~2% of output bytes so left simple.
    repr_ref[...] = jnp.sum((we * w_inv) * attn3, axis=1).astype(repr_ref.dtype)


def fim_encoder_forward(news_batch, params, *, block_items=256,
                        emb_dtype=jnp.bfloat16):
    """news_batch: int32 [B, N, L]  ->  (news_embedding [B,N,L,LEVEL,H],
                                          news_repr     [B,N,H])

    `emb_dtype` controls the news_embedding output precision (bf16 default:
    halves the dominant HBM writeback; pass jnp.float32 for strict parity).
    """
    B, N, L = news_batch.shape
    emb_table = params["embedding"]
    E = emb_table.shape[1]
    H = params["ln_gamma"].shape[-1]
    S = B * N

    # Items per grid step: multiple of 8 for (8,128) tiling; when the whole
    # problem would fit in one block, halve it so the grid stays >= 2 steps
    # and v7x can shard the parallel item axis across both TensorCores.
    ts = max(8, (block_items // 8) * 8)
    if S <= ts:
        ts = max(8, -(-S // 16) * 8)
    n_blocks = -(-S // ts)
    S_pad = n_blocks * ts

    # Pad the (cheap) int32 token ids, not the embedded activations.
    tokens = news_batch.reshape(S, L).astype(jnp.int32)
    if S_pad != S:
        tokens = jnp.pad(tokens, ((0, S_pad - S), (0, 0)))

    # Gather directly in bf16: the (S, L, E) activation is written to HBM once,
    # at half width, and there is no separate f32->bf16 pass.
    # TODO(synk): nn.Dropout omitted (inference-mode identity); the gather
    # could be fused into the kernel via scalar-prefetched token ids + manual
    # DMA from the HBM-resident table to remove this intermediate entirely.
    x = jnp.take(emb_table.astype(jnp.bfloat16), tokens, axis=0)   # (S_pad,L,E)

    # Level+tap fused conv weight: (NWIN*E, LEVEL*H).  Window offset for tap k
    # of dilation d is MAXPAD + (k-1)*d; zeros where a level skips an offset.
    w_big = jnp.zeros((NWIN, E, LEVEL, H), jnp.float32)
    for i in range(LEVEL):
        d = i + 1
        for k in range(KSIZE):
            off = MAXPAD + (k - 1) * d
            w_big = w_big.at[off, :, i, :].add(params["conv_w"][i, k])
    w_big = w_big.reshape(NWIN * E, LEVEL * H).astype(jnp.bfloat16)

    # Single packed (8, H) f32 parameter slab (one BlockSpec / resident tile).
    p_slab = jnp.zeros((8, H), jnp.float32)
    p_slab = p_slab.at[0:3].set(params["conv_b"].reshape(LEVEL, H))
    p_slab = p_slab.at[3].set(params["ln_gamma"].reshape(H))
    p_slab = p_slab.at[4].set(params["ln_beta"].reshape(H))
    p_slab = p_slab.at[5].set(params["query_levels"].reshape(H))
    p_slab = p_slab.at[6].set(params["query_words"].reshape(H))

    emb_out, repr_out = pl.pallas_call(
        fim_block_kernel,
        out_shape=(jax.ShapeDtypeStruct((S_pad * L, LEVEL * H), emb_dtype),
                   jax.ShapeDtypeStruct((S_pad, H), jnp.float32)),
        grid=(n_blocks,),
        in_specs=[
            pl.BlockSpec((ts, L, E), lambda s: (s, 0, 0)),
            pl.BlockSpec((NWIN * E, LEVEL * H), lambda s: (0, 0)),
            pl.BlockSpec((8, H), lambda s: (0, 0)),
        ],
        out_specs=(
            pl.BlockSpec((ts * L, LEVEL * H), lambda s: (s, 0)),
            pl.BlockSpec((ts, H), lambda s: (s, 0)),
        ),
        compiler_params=pltpu.CompilerParams(
            dimension_semantics=("parallel",),        # item axis independent
            # Safe on every generation at ts<=512 (v7x: 64 MiB physical/TC).
            # Raise to 64-96 MiB on v5e/v6e only if ts is pushed beyond ~512.
            vmem_limit_bytes=48 * 1024 * 1024),
    )(x, w_big, p_slab)

    news_embedding = emb_out.reshape(S_pad, L, LEVEL, H)[:S].reshape(
        B, N, L, LEVEL, H)
    news_repr = repr_out[:S].reshape(B, N, H)
    return news_embedding, news_repr


def fim_reference(news_batch, params):
    """Pure-JAX f32 reference mirroring the PyTorch forward (verification)."""
    B, N, L = news_batch.shape
    emb_table = params["embedding"]
    H = params["ln_gamma"].shape[-1]
    S = B * N
    emb = jnp.take(emb_table, news_batch.reshape(S, L), axis=0)
    x_pad = jnp.pad(emb, ((0, 0), (MAXPAD, MAXPAD), (0, 0)))
    levels = []
    for i, d in enumerate((1, 2, 3)):
        acc = jnp.zeros((S, L, H), jnp.float32)
        for k in range(KSIZE):
            off = MAXPAD + (k - 1) * d
            acc = acc + jnp.einsum("sle,eh->slh",
                                   x_pad[:, off:off + L, :],
                                   params["conv_w"][i, k])
        acc = acc + params["conv_b"][i]
        mean = acc.mean(-1, keepdims=True)
        var = ((acc - mean) ** 2).mean(-1, keepdims=True)
        y = (acc - mean) / jnp.sqrt(var + LN_EPS)
        y = y * params["ln_gamma"] + params["ln_beta"]
        levels.append(jnp.maximum(y, 0.0))
    news_embedding = jnp.stack(levels, axis=2)                 # (S, L, 3, H)
    ql = params["query_levels"][0]
    qw = params["query_words"][0]
    ls = jnp.einsum("slvh,h->slv", news_embedding, ql) / math.sqrt(H)
    lw = jax.nn.softmax(ls, axis=-1)
    attn = jnp.einsum("slv,slvh->slh", lw, news_embedding)
    ws = jnp.einsum("slh,h->sl", attn, qw) / math.sqrt(H)
    ww = jax.nn.softmax(ws, axis=-1)
    repr_ = jnp.einsum("sl,slh->sh", ww, attn)
    return (news_embedding.reshape(B, N, L, LEVEL, H),
            repr_.reshape(B, N, H))


if __name__ == "__main__":
    # Small shapes consistent with the module's forward:
    #   news_batch [batch_size=2, news_per_batch=8, signal_length=16]
    #   embedding_dim=32, filter_num (hidden_dim)=32, vocab=50
    B, N, L = 2, 8, 16
    E, H = 32, 32
    VOCAB = 50

    key = jax.random.PRNGKey(0)
    k_emb, k_w, k_b, k_ql, k_qw, k_tok = jax.random.split(key, 6)

    params = {
        "embedding": jax.random.normal(k_emb, (VOCAB, E), jnp.float32),
        # xavier-normal-style init, stored as [level, tap, E, H]
        "conv_w": jax.random.normal(k_w, (LEVEL, KSIZE, E, H), jnp.float32)
                  * math.sqrt(2.0 / (E * KSIZE + H * KSIZE)),
        "conv_b": jax.random.normal(k_b, (LEVEL, 1, H), jnp.float32) * 0.01,
        "ln_gamma": jnp.ones((1, H), jnp.float32),
        "ln_beta": jnp.zeros((1, H), jnp.float32),
        "query_levels": jax.random.normal(k_ql, (1, H), jnp.float32),
        "query_words": jax.random.normal(k_qw, (1, H), jnp.float32),
    }
    news_batch = jax.random.randint(k_tok, (B, N, L), 0, VOCAB)

    fwd = jax.jit(lambda nb, p: fim_encoder_forward(nb, p))
    news_embedding, news_repr = fwd(news_batch, params)
    jax.block_until_ready((news_embedding, news_repr))

    ref_emb, ref_repr = fim_reference(news_batch, params)
    assert news_embedding.shape == (B, N, L, LEVEL, H)
    assert news_repr.shape == (B, N, H)
    # Tolerance accounts for bf16 MXU inputs and the bf16 embedding output
    # (accumulation / LayerNorm / softmax stay f32 in-kernel).
    assert jnp.allclose(news_embedding.astype(jnp.float32), ref_emb,
                        rtol=3e-2, atol=3e-2)
    assert jnp.allclose(news_repr, ref_repr, rtol=3e-2, atol=3e-2)

    print("KERNEL_OK")
</pallas_src>

<mosaic_0001>
module attributes {stable_mosaic.version = 11 : i64} {
  func.func @fim_block_kernel(%arg0: i32, %arg1: memref<8x16x32xbf16, #tpu.memory_space<vmem>>, %arg2: memref<224x96xbf16, #tpu.memory_space<vmem>>, %arg3: memref<8x32xf32, #tpu.memory_space<vmem>>, %arg4: memref<128x96xbf16, #tpu.memory_space<vmem>>, %arg5: memref<8x32xf32, #tpu.memory_space<vmem>>) attributes {dimension_semantics = [#tpu.dimension_semantics<parallel>], iteration_bounds = array<i64: 2>, scalar_prefetch = 0 : i64, scratch_operands = 0 : i64, tpu.core_type = #tpu.core_type<tc>, window_params = [{transform_indices = @transform_0, window_bounds = array<i64: 8, 16, 32>}, {pipeline_mode = #tpu.pipeline_mode<synchronous>, transform_indices = @transform_1, window_bounds = array<i64: 224, 96>}, {pipeline_mode = #tpu.pipeline_mode<synchronous>, transform_indices = @transform_2, window_bounds = array<i64: 8, 32>}, {transform_indices = @transform_3, window_bounds = array<i64: 128, 96>}, {transform_indices = @transform_4, window_bounds = array<i64: 8, 32>}]} {
    %c3 = arith.constant 3 : index
    %c0 = arith.constant 0 : index
    %0 = vector.load %arg3[%c3, %c0] : memref<8x32xf32, #tpu.memory_space<vmem>>, vector<1x32xf32>
    %c4 = arith.constant 4 : index
    %c0_0 = arith.constant 0 : index
    %1 = vector.load %arg3[%c4, %c0_0] : memref<8x32xf32, #tpu.memory_space<vmem>>, vector<1x32xf32>
    %c5 = arith.constant 5 : index
    %c0_1 = arith.constant 0 : index
    %2 = vector.load %arg3[%c5, %c0_1] : memref<8x32xf32, #tpu.memory_space<vmem>>, vector<1x32xf32>
    %c6 = arith.constant 6 : index
    %c0_2 = arith.constant 0 : index
    %3 = vector.load %arg3[%c6, %c0_2] : memref<8x32xf32, #tpu.memory_space<vmem>>, vector<1x32xf32>
    %c0_3 = arith.constant 0 : index
    %c0_4 = arith.constant 0 : index
    %c0_5 = arith.constant 0 : index
    %4 = vector.load %arg1[%c0_3, %c0_4, %c0_5] : memref<8x16x32xbf16, #tpu.memory_space<vmem>>, vector<8x16x32xbf16>
    %cst = arith.constant 0.000000e+00 : bf16
    %5 = vector.broadcast %cst : bf16 to vector<8x3x32xbf16>
    %6 = tpu.concatenate %5, %4, %5 in 1 : vector<8x3x32xbf16>, vector<8x16x32xbf16>, vector<8x3x32xbf16> -> vector<8x22x32xbf16>
    %7 = vector.extract_strided_slice %6 {offsets = [0, 0, 0], sizes = [8, 16, 32], strides = [1, 1, 1]} : vector<8x22x32xbf16> to vector<8x16x32xbf16>
    %8 = vector.extract_strided_slice %6 {offsets = [0, 1, 0], sizes = [8, 16, 32], strides = [1, 1, 1]} : vector<8x22x32xbf16> to vector<8x16x32xbf16>
    %9 = vector.extract_strided_slice %6 {offsets = [0, 2, 0], sizes = [8, 16, 32], strides = [1, 1, 1]} : vector<8x22x32xbf16> to vector<8x16x32xbf16>
    %10 = vector.extract_strided_slice %6 {offsets = [0, 3, 0], sizes = [8, 16, 32], strides = [1, 1, 1]} : vector<8x22x32xbf16> to vector<8x16x32xbf16>
    %11 = vector.extract_strided_slice %6 {offsets = [0, 4, 0], sizes = [8, 16, 32], strides = [1, 1, 1]} : vector<8x22x32xbf16> to vector<8x16x32xbf16>
    %12 = vector.extract_strided_slice %6 {offsets = [0, 5, 0], sizes = [8, 16, 32], strides = [1, 1, 1]} : vector<8x22x32xbf16> to vector<8x16x32xbf16>
    %13 = vector.extract_strided_slice %6 {offsets = [0, 6, 0], sizes = [8, 16, 32], strides = [1, 1, 1]} : vector<8x22x32xbf16> to vector<8x16x32xbf16>
    %14 = tpu.concatenate %7, %8, %9, %10, %11, %12, %13 in 2 : vector<8x16x32xbf16>, vector<8x16x32xbf16>, vector<8x16x32xbf16>, vector<8x16x32xbf16>, vector<8x16x32xbf16>, vector<8x16x32xbf16>, vector<8x16x32xbf16> -> vector<8x16x224xbf16>
    %15 = vector.shape_cast %14 : vector<8x16x224xbf16> to vector<128x224xbf16>
    %c0_6 = arith.constant 0 : index
    %c0_7 = arith.constant 0 : index
    %16 = vector.load %arg2[%c0_6, %c0_7] : memref<224x96xbf16, #tpu.memory_space<vmem>>, vector<224x96xbf16>
    %cst_8 = arith.constant dense<0.000000e+00> : vector<128x96xf32>
    %17 = tpu.matmul %15, %16, %cst_8 {dimension_numbers = #tpu.dot_dimension_numbers<[1], [0], [0], [1], [0, 0, 1, 1], [], []>} : vector<128x224xbf16>, vector<224x96xbf16>, vector<128x96xf32> -> vector<128x96xf32>
    %18 = vector.extract_strided_slice %17 {offsets = [0, 0], sizes = [128, 32], strides = [1, 1]} : vector<128x96xf32> to vector<128x32xf32>
    %c0_9 = arith.constant 0 : index
    %c0_10 = arith.constant 0 : index
    %19 = vector.load %arg3[%c0_9, %c0_10] : memref<8x32xf32, #tpu.memory_space<vmem>>, vector<1x32xf32>
    %20 = vector.broadcast %19 : vector<1x32xf32> to vector<128x32xf32>
    %21 = arith.addf %18, %20 : vector<128x32xf32>
    %cst_11 = arith.constant dense<0.000000e+00> : vector<128xf32>
    %22 = vector.multi_reduction <add>, %21, %cst_11 [1] : vector<128x32xf32> to vector<128xf32>
    %23 = vector.shape_cast %22 : vector<128xf32> to vector<128x1xf32>
    %cst_12 = arith.constant 3.200000e+01 : f32
    %24 = vector.broadcast %cst_12 : f32 to vector<128x1xf32>
    %25 = arith.divf %23, %24 : vector<128x1xf32>
    %26 = arith.mulf %21, %21 : vector<128x32xf32>
    %cst_13 = arith.constant dense<0.000000e+00> : vector<128xf32>
    %27 = vector.multi_reduction <add>, %26, %cst_13 [1] : vector<128x32xf32> to vector<128xf32>
    %28 = vector.shape_cast %27 : vector<128xf32> to vector<128x1xf32>
    %cst_14 = arith.constant 3.200000e+01 : f32
    %29 = vector.broadcast %cst_14 : f32 to vector<128x1xf32>
    %30 = arith.divf %28, %29 : vector<128x1xf32>
    %31 = arith.mulf %25, %25 : vector<128x1xf32>
    %32 = arith.subf %30, %31 : vector<128x1xf32>
    %33 = vector.broadcast %25 : vector<128x1xf32> to vector<128x32xf32>
    %34 = arith.subf %21, %33 : vector<128x32xf32>
    %cst_15 = arith.constant 9.99999974E-6 : f32
    %35 = vector.broadcast %cst_15 : f32 to vector<128x1xf32>
    %36 = arith.addf %32, %35 : vector<128x1xf32>
    %37 = math.rsqrt %36 : vector<128x1xf32>
    %38 = vector.broadcast %37 : vector<128x1xf32> to vector<128x32xf32>
    %39 = arith.mulf %34, %38 : vector<128x32xf32>
    %40 = vector.broadcast %0 : vector<1x32xf32> to vector<128x32xf32>
    %41 = arith.mulf %39, %40 : vector<128x32xf32>
    %42 = vector.broadcast %1 : vector<1x32xf32> to vector<128x32xf32>
    %43 = arith.addf %41, %42 : vector<128x32xf32>
    %cst_16 = arith.constant 0.000000e+00 : f32
    %44 = vector.broadcast %cst_16 : f32 to vector<128x32xf32>
    %45 = arith.maximumf %43, %44 : vector<128x32xf32>
    %46 = vector.extract_strided_slice %17 {offsets = [0, 32], sizes = [128, 32], strides = [1, 1]} : vector<128x96xf32> to vector<128x32xf32>
    %c1 = arith.constant 1 : index
    %c0_17 = arith.constant 0 : index
    %47 = vector.load %arg3[%c1, %c0_17] : memref<8x32xf32, #tpu.memory_space<vmem>>, vector<1x32xf32>
    %48 = vector.broadcast %47 : vector<1x32xf32> to vector<128x32xf32>
    %49 = arith.addf %46, %48 : vector<128x32xf32>
    %cst_18 = arith.constant dense<0.000000e+00> : vector<128xf32>
    %50 = vector.multi_reduction <add>, %49, %cst_18 [1] : vector<128x32xf32> to vector<128xf32>
    %51 = vector.shape_cast %50 : vector<128xf32> to vector<128x1xf32>
    %cst_19 = arith.constant 3.200000e+01 : f32
    %52 = vector.broadcast %cst_19 : f32 to vector<128x1xf32>
    %53 = arith.divf %51, %52 : vector<128x1xf32>
    %54 = arith.mulf %49, %49 : vector<128x32xf32>
    %cst_20 = arith.constant dense<0.000000e+00> : vector<128xf32>
    %55 = vector.multi_reduction <add>, %54, %cst_20 [1] : vector<128x32xf32> to vector<128xf32>
    %56 = vector.shape_cast %55 : vector<128xf32> to vector<128x1xf32>
    %cst_21 = arith.constant 3.200000e+01 : f32
    %57 = vector.broadcast %cst_21 : f32 to vector<128x1xf32>
    %58 = arith.divf %56, %57 : vector<128x1xf32>
    %59 = arith.mulf %53, %53 : vector<128x1xf32>
    %60 = arith.subf %58, %59 : vector<128x1xf32>
    %61 = vector.broadcast %53 : vector<128x1xf32> to vector<128x32xf32>
    %62 = arith.subf %49, %61 : vector<128x32xf32>
    %cst_22 = arith.constant 9.99999974E-6 : f32
    %63 = vector.broadcast %cst_22 : f32 to vector<128x1xf32>
    %64 = arith.addf %60, %63 : vector<128x1xf32>
    %65 = math.rsqrt %64 : vector<128x1xf32>
    %66 = vector.broadcast %65 : vector<128x1xf32> to vector<128x32xf32>
    %67 = arith.mulf %62, %66 : vector<128x32xf32>
    %68 = vector.broadcast %0 : vector<1x32xf32> to vector<128x32xf32>
    %69 = arith.mulf %67, %68 : vector<128x32xf32>
    %70 = vector.broadcast %1 : vector<1x32xf32> to vector<128x32xf32>
    %71 = arith.addf %69, %70 : vector<128x32xf32>
    %cst_23 = arith.constant 0.000000e+00 : f32
    %72 = vector.broadcast %cst_23 : f32 to vector<128x32xf32>
    %73 = arith.maximumf %71, %72 : vector<128x32xf32>
    %74 = vector.extract_strided_slice %17 {offsets = [0, 64], sizes = [128, 32], strides = [1, 1]} : vector<128x96xf32> to vector<128x32xf32>
    %c2 = arith.constant 2 : index
    %c0_24 = arith.constant 0 : index
    %75 = vector.load %arg3[%c2, %c0_24] : memref<8x32xf32, #tpu.memory_space<vmem>>, vector<1x32xf32>
    %76 = vector.broadcast %75 : vector<1x32xf32> to vector<128x32xf32>
    %77 = arith.addf %74, %76 : vector<128x32xf32>
    %cst_25 = arith.constant dense<0.000000e+00> : vector<128xf32>
    %78 = vector.multi_reduction <add>, %77, %cst_25 [1] : vector<128x32xf32> to vector<128xf32>
    %79 = vector.shape_cast %78 : vector<128xf32> to vector<128x1xf32>
    %cst_26 = arith.constant 3.200000e+01 : f32
    %80 = vector.broadcast %cst_26 : f32 to vector<128x1xf32>
    %81 = arith.divf %79, %80 : vector<128x1xf32>
    %82 = arith.mulf %77, %77 : vector<128x32xf32>
    %cst_27 = arith.constant dense<0.000000e+00> : vector<128xf32>
    %83 = vector.multi_reduction <add>, %82, %cst_27 [1] : vector<128x32xf32> to vector<128xf32>
    %84 = vector.shape_cast %83 : vector<128xf32> to vector<128x1xf32>
    %cst_28 = arith.constant 3.200000e+01 : f32
    %85 = vector.broadcast %cst_28 : f32 to vector<128x1xf32>
    %86 = arith.divf %84, %85 : vector<128x1xf32>
    %87 = arith.mulf %81, %81 : vector<128x1xf32>
    %88 = arith.subf %86, %87 : vector<128x1xf32>
    %89 = vector.broadcast %81 : vector<128x1xf32> to vector<128x32xf32>
    %90 = arith.subf %77, %89 : vector<128x32xf32>
    %cst_29 = arith.constant 9.99999974E-6 : f32
    %91 = vector.broadcast %cst_29 : f32 to vector<128x1xf32>
    %92 = arith.addf %88, %91 : vector<128x1xf32>
    %93 = math.rsqrt %92 : vector<128x1xf32>
    %94 = vector.broadcast %93 : vector<128x1xf32> to vector<128x32xf32>
    %95 = arith.mulf %90, %94 : vector<128x32xf32>
    %96 = vector.broadcast %0 : vector<1x32xf32> to vector<128x32xf32>
    %97 = arith.mulf %95, %96 : vector<128x32xf32>
    %98 = vector.broadcast %1 : vector<1x32xf32> to vector<128x32xf32>
    %99 = arith.addf %97, %98 : vector<128x32xf32>
    %cst_30 = arith.constant 0.000000e+00 : f32
    %100 = vector.broadcast %cst_30 : f32 to vector<128x32xf32>
    %101 = arith.maximumf %99, %100 : vector<128x32xf32>
    %102 = tpu.concatenate %45, %73, %101 in 1 : vector<128x32xf32>, vector<128x32xf32>, vector<128x32xf32> -> vector<128x96xf32>
    %103 = arith.truncf %102 : vector<128x96xf32> to vector<128x96xbf16>
    %c0_31 = arith.constant 0 : index
    %c0_32 = arith.constant 0 : index
    %104 = vector.load %arg4[%c0_31, %c0_32] : memref<128x96xbf16, #tpu.memory_space<vmem>>, vector<128x96xbf16>
    tpu.vector_store %arg4[%c0_31, %c0_32], %103 {strides = array<i32>} : memref<128x96xbf16, #tpu.memory_space<vmem>>, vector<128x96xbf16>,
    %105 = vector.broadcast %2 : vector<1x32xf32> to vector<128x32xf32>
    %106 = arith.mulf %45, %105 : vector<128x32xf32>
    %cst_33 = arith.constant dense<0.000000e+00> : vector<128xf32>
    %107 = vector.multi_reduction <add>, %106, %cst_33 [1] : vector<128x32xf32> to vector<128xf32>
    %108 = vector.shape_cast %107 : vector<128xf32> to vector<128x1xf32>
    %cst_34 = arith.constant 0.176776692 : f32
    %109 = vector.broadcast %cst_34 : f32 to vector<128x1xf32>
    %110 = arith.mulf %108, %109 : vector<128x1xf32>
    %111 = vector.broadcast %2 : vector<1x32xf32> to vector<128x32xf32>
    %112 = arith.mulf %73, %111 : vector<128x32xf32>
    %cst_35 = arith.constant dense<0.000000e+00> : vector<128xf32>
    %113 = vector.multi_reduction <add>, %112, %cst_35 [1] : vector<128x32xf32> to vector<128xf32>
    %114 = vector.shape_cast %113 : vector<128xf32> to vector<128x1xf32>
    %cst_36 = arith.constant 0.176776692 : f32
    %115 = vector.broadcast %cst_36 : f32 to vector<128x1xf32>
    %116 = arith.mulf %114, %115 : vector<128x1xf32>
    %117 = vector.broadcast %2 : vector<1x32xf32> to vector<128x32xf32>
    %118 = arith.mulf %101, %117 : vector<128x32xf32>
    %cst_37 = arith.constant dense<0.000000e+00> : vector<128xf32>
    %119 = vector.multi_reduction <add>, %118, %cst_37 [1] : vector<128x32xf32> to vector<128xf32>
    %120 = vector.shape_cast %119 : vector<128xf32> to vector<128x1xf32>
    %cst_38 = arith.constant 0.176776692 : f32
    %121 = vector.broadcast %cst_38 : f32 to vector<128x1xf32>
    %122 = arith.mulf %120, %121 : vector<128x1xf32>
    %123 = arith.maximumf %110, %116 : vector<128x1xf32>
    %124 = arith.maximumf %123, %122 : vector<128x1xf32>
    %125 = arith.subf %110, %124 : vector<128x1xf32>
    %126 = math.exp %125 : vector<128x1xf32>
    %127 = arith.subf %116, %124 : vector<128x1xf32>
    %128 = math.exp %127 : vector<128x1xf32>
    %129 = arith.subf %122, %124 : vector<128x1xf32>
    %130 = math.exp %129 : vector<128x1xf32>
    %131 = arith.addf %126, %128 : vector<128x1xf32>
    %132 = arith.addf %131, %130 : vector<128x1xf32>
    %133 = tpu.reciprocal %132 {approx = true} : vector<128x1xf32> -> vector<128x1xf32>
    %134 = vector.broadcast %126 : vector<128x1xf32> to vector<128x32xf32>
    %135 = arith.mulf %134, %45 : vector<128x32xf32>
    %136 = vector.broadcast %128 : vector<128x1xf32> to vector<128x32xf32>
    %137 = arith.mulf %136, %73 : vector<128x32xf32>
    %138 = arith.addf %135, %137 : vector<128x32xf32>
    %139 = vector.broadcast %130 : vector<128x1xf32> to vector<128x32xf32>
    %140 = arith.mulf %139, %101 : vector<128x32xf32>
    %141 = arith.addf %138, %140 : vector<128x32xf32>
    %142 = vector.broadcast %133 : vector<128x1xf32> to vector<128x32xf32>
    %143 = arith.mulf %141, %142 : vector<128x32xf32>
    %144 = vector.shape_cast %143 : vector<128x32xf32> to vector<8x16x32xf32>
    %145 = vector.shape_cast %3 : vector<1x32xf32> to vector<1x1x32xf32>
    %146 = vector.broadcast %145 : vector<1x1x32xf32> to vector<8x16x32xf32>
    %147 = arith.mulf %144, %146 : vector<8x16x32xf32>
    %cst_39 = arith.constant dense<0.000000e+00> : vector<8x16xf32>
    %148 = vector.multi_reduction <add>, %147, %cst_39 [2] : vector<8x16x32xf32> to vector<8x16xf32>
    %149 = vector.shape_cast %148 : vector<8x16xf32> to vector<8x16x1xf32>
    %cst_40 = arith.constant 0.176776692 : f32
    %150 = vector.broadcast %cst_40 : f32 to vector<8x16x1xf32>
    %151 = arith.mulf %149, %150 : vector<8x16x1xf32>
    %cst_41 = arith.constant dense<0xFF800000> : vector<8x1xf32>
    %152 = vector.multi_reduction <maximumf>, %151, %cst_41 [1] : vector<8x16x1xf32> to vector<8x1xf32>
    %153 = vector.shape_cast %152 : vector<8x1xf32> to vector<8x1x1xf32>
    %154 = vector.broadcast %153 : vector<8x1x1xf32> to vector<8x16x1xf32>
    %155 = arith.subf %151, %154 : vector<8x16x1xf32>
    %156 = math.exp %155 : vector<8x16x1xf32>
    %cst_42 = arith.constant dense<0.000000e+00> : vector<8x1xf32>
    %157 = vector.multi_reduction <add>, %156, %cst_42 [1] : vector<8x16x1xf32> to vector<8x1xf32>
    %158 = vector.shape_cast %157 : vector<8x1xf32> to vector<8x1x1xf32>
    %159 = tpu.reciprocal %158 {approx = true} : vector<8x1x1xf32> -> vector<8x1x1xf32>
    %160 = vector.broadcast %159 : vector<8x1x1xf32> to vector<8x16x1xf32>
    %161 = arith.mulf %156, %160 : vector<8x16x1xf32>
    %162 = vector.broadcast %161 : vector<8x16x1xf32> to vector<8x16x32xf32>
    %163 = arith.mulf %162, %144 : vector<8x16x32xf32>
    %cst_43 = arith.constant dense<0.000000e+00> : vector<8x32xf32>
    %164 = vector.multi_reduction <add>, %163, %cst_43 [1] : vector<8x16x32xf32> to vector<8x32xf32>
    %c0_44 = arith.constant 0 : index
    %c0_45 = arith.constant 0 : index
    %165 = vector.load %arg5[%c0_44, %c0_45] : memref<8x32xf32, #tpu.memory_space<vmem>>, vector<8x32xf32>
    tpu.vector_store %arg5[%c0_44, %c0_45], %164 {strides = array<i32>} : memref<8x32xf32, #tpu.memory_space<vmem>>, vector<8x32xf32>,
    return
  }
  func.func @transform_0(%arg0: i32) -> (i32, i32, i32) {
    %c0_i32 = arith.constant 0 : i32
    %c0_i32_0 = arith.constant 0 : i32
    %c0_i32_1 = arith.constant 0 : i32
    return %arg0, %c0_i32, %c0_i32_0 : i32, i32, i32
  }
  func.func @transform_1(%arg0: i32) -> (i32, i32) {
    %c0_i32 = arith.constant 0 : i32
    %c0_i32_0 = arith.constant 0 : i32
    %c0_i32_1 = arith.constant 0 : i32
    return %c0_i32, %c0_i32_0 : i32, i32
  }
  func.func @transform_2(%arg0: i32) -> (i32, i32) {
    %c0_i32 = arith.constant 0 : i32
    %c0_i32_0 = arith.constant 0 : i32
    %c0_i32_1 = arith.constant 0 : i32
    return %c0_i32, %c0_i32_0 : i32, i32
  }
  func.func @transform_3(%arg0: i32) -> (i32, i32) {
    %c0_i32 = arith.constant 0 : i32
    %c0_i32_0 = arith.constant 0 : i32
    return %arg0, %c0_i32 : i32, i32
  }
  func.func @transform_4(%arg0: i32) -> (i32, i32) {
    %c0_i32 = arith.constant 0 : i32
    %c0_i32_0 = arith.constant 0 : i32
    return %arg0, %c0_i32 : i32, i32
  }
}

</mosaic_0001>

<bundles_post_ra>
// kernel: _lambda_.1
= control target key start
LH: loop header
LB: loop body
LE: loop exit
PB: predicated region body
PF: predicated region fallthrough
CT: control target
= control target key end

     0   :  { %10 = vsyncpa [#allocation3], 0  ;;  %s8916_s0 = inlined_call_operand.vmem [shape: bf16[16,16,32], index: 0, kind: input, shape index: {}]   ;;  %s8917_s1 = inlined_call_operand.vmem [shape: bf16[224,96], index: 1, kind: input, shape index: {}]   ;;  %s8918_s2 = inlined_call_operand.vmem [shape: f32[8,32], index: 2, kind: input, shape index: {}]   ;;  %s8919_s3 = inlined_call_operand.vmem [shape: bf16[256,96], index: 3, kind: output, shape index: {0}]   ;;  %s8920_s4 = inlined_call_operand.hbm [shape: f32[16,32], index: 4, kind: output, shape index: {1}]  }
   0x1   :  { %12 = vsyncpa [#allocation3 + $0x1], 0  ;;  %s4669_s15 = smov 0   ;;  %s4671_s16 = smov 0  }
   0x2   :  { %s4673_s17 = smov 0   ;;  %s4675_s18 = smov 0  }
   0x3 LB: > { %s4690_s19 = sadd.s32 4294967295, %s4638_s18   ;;  %s4102_s20 = sadd.s32 4294967294, %s4638_s18   ;;  %s4638_s18 = sphi %s4675_s18, %s9631_s18   ;;  %s4634_s17 = sphi %s4673_s17, %s9630_s17   ;;  %s4630_s16 = sphi %s4671_s16, %s9629_s16   ;;  %s4626_s15 = sphi %s4669_s15, %s9628_s15  }
   0x4   : > { %s4694_s21 = sadd.s32 1, %s4638_s18   ;;  %s119_s22 = sadd.s32 1, %s4634_s17 }
   0x5   : > { %s116_s23 = ssub.s32 %s4638_s18, %s4694_s21  ;;  %p129_p0 = scmp.ne.s32.totalorder %s4634_s17, %s4630_s16 }
   0x6   : > { %p117_p1 = scmp.eq.s32.totalorder %s116_s23, 0  ;;  %p130_p2 = scmp.eq.s32.totalorder %s4690_s19, 1 }
   0x7   : > { %p135_p3 = scmp.ne.s32.totalorder %s4630_s16, %s4626_s15  ;;  %p136_p4 = scmp.eq.s32.totalorder %s4102_s20, 1 }
   0x8   : > { %s4705_s24 = scalar_select %p117_p1, %s4634_s17, %s119_s22  }
   0x9   : > { %p4707_p5 = por %p130_p2, %p129_p0  ;;  %p4711_p6 = por %p136_p4, %p135_p3 }
   0xa   : > { %p4105_p7 = scmp.ge.s32.totalorder %s4638_s18, 1  ;;  %p170_p8 = scmp.lt.s32.totalorder %s4638_s18, 3 }
   0xc   : > { %p171_p9 = pnand %p4105_p7, %p170_p8 }
   0xe   : > { %174 = sbr.rel (%p171_p9) target bundleno = 2558 (0x9fe), region = 32 }
  0x13   : > { %s4718_s27 = sshll.u32 %s4690_s19, 3  ;;  %vm348_vm0 = vcmask 1041408   ;;  %vm349_vm1 = vsmask.f32 1280  ;;  %vm496_vm2 = vcmask 1046528   ;;  %s4640_s7 = smov 64  }
  0x14   : > { %p203_p10 = scmp.lt.s32.totalorder %s4718_s27, 15  ;;  %vm4739_vm3 = vmand %vm348_vm0, %vm349_vm1  ;;  %vm367_vm4 = vsmask.f32 7424  ;;  %s4641_s8 = smov 32   ;;  %vm537_vm5 = vsmask.f32 6400 }
  0x15   : > { %s4642_s9 = smov 96   ;;  %vm651_vm6 = vsmask.f32 5376  ;;  %vm724_vm7 = vcmask 1044480   ;;  %vm765_vm8 = vcmask 261120   ;;  %vm782_vm9 = vcmask 523264   ;;  %s4013_s12 = scalar_lea.hbm %s8920_s4, %s4718_s27 }
  0x16   : > { %s204_s28 = scalar_select %p203_p10, %s4718_s27, 15  ;;  %vm799_vm10 = vcmask 785408   ;;  %vm626_vm11 = vcmask 1045504  }
  0x17   : > { %s4017_s20 = sshll.u32 %s4013_s12, 4  ;;  %s4018_s20 = int_to_ptr.hbm [resolvable:$true] %s4017_s20 }
  0x18   : > { %s4212_s29 = sshll.u32 %s204_s28, 3  ;;  %s4590_s22 = sshra.s32 %s4018_s20, 4  ;;  %s4591_s22 = int_to_ptr.hbm [resolvable:$true] %s4590_s22 }
  0x19   : > { %s4725_s6 = scalar_lea.vmem %s8916_s0, %s4212_s29  ;;  %s4596_s28 = scalar_lea.hbm %s8920_s4, 16 }
  0x1a   : > { %v4215_v0 = vld [vmem:[%s4725_s6 + $0x10] sm:$0xff]  ;;  %v4214_v1 = vld [vmem:[%s4725_s6 + $0x8] sm:$0xff]  ;;  %v4213_v2 = vld [vmem:[%s4725_s6] sm:$0xff]  ;;  %p4597_p1 = scmp.lt.s32.totalorder %s4591_s22, %s8920_s4 }
  0x1b   : > { %v4216_v3 = vld [vmem:[%s4725_s6 + $0x18] sm:$0xff]  ;;  %v293_v4 = vshrl.u32 %v4215_v0, 16  ;;  %v296_v5 = vshll.u32 %v4215_v0, 16  ;;  %v285_v6 = vshrl.u32 %v4214_v1, 16  ;;  %v288_v7 = vshll.u32 %v4214_v1, 16  ;;  %v4732_v8 = vld [vmem:[%s4725_s6 + $0x20] sm:$0xff] }
  0x1c   : > { %v277_v9 = vshrl.u32 %v4213_v2, 16  ;;  %v280_v10 = vshll.u32 %v4213_v2, 16  ;;  %v301_v11 = vshrl.u32 %v4216_v3, 16  ;;  %v304_v12 = vshll.u32 %v4216_v3, 16  ;;  %v4735_v13 = vld [vmem:[%s4725_s6 + $0x38] sm:$0xff]  ;;  %v4219_v3 = vld [vmem:[%s4725_s6 + $0x30] sm:$0xff] }
  0x1d   : > { %v295_v14 = vrot.slane %v293_v4, 6  ;;  %v298_v15 = vrot.slane %v296_v5, 7  ;;  %v287_v16 = vrot.slane %v285_v6, 6  ;;  %v290_v17 = vrot.slane %v288_v7, 7 }
  0x1e   : > { %v279_v19 = vrot.slane %v277_v9, 6  ;;  %v282_v20 = vrot.slane %v280_v10, 7  ;;  %v303_v21 = vrot.slane %v301_v11, 6  ;;  %v306_v22 = vrot.slane %v304_v12, 7 }
  0x1f   : > { %v299_v23 = vor.u32 %v298_v15, %v295_v14  ;;  %v291_v24 = vor.u32 %v290_v17, %v287_v16  ;;  %v309_v25 = vshrl.u32 %v4732_v8, 16  ;;  %v312_v26 = vshll.u32 %v4732_v8, 16  ;;  %v4218_v8 = vld [vmem:[%s4725_s6 + $0x28] sm:$0xff] }
  0x20   : > { %v283_v27 = vor.u32 %v282_v20, %v279_v19  ;;  %v307_v28 = vor.u32 %v306_v22, %v303_v21  ;;  %v333_v29 = vshrl.u32 %v4735_v13, 16  ;;  %v336_v30 = vshll.u32 %v4735_v13, 16 }
  0x21   : > { %v4749_v31 = vsel %vm4739_vm3, 0, %v299_v23  ;;  %v4753_v32 = vsel %vm4739_vm3, %v299_v23, 0  ;;  %v4757_v33 = vsel %vm4739_vm3, 0, %v291_v24  ;;  %v4761_v34 = vsel %vm4739_vm3, %v291_v24, 0 }
  0x22   : > { %v503_v35 = vrot.slane %v4749_v31, 1  ;;  %v504_v36 = vrot.slane %v4753_v32, 1  ;;  %v500_v37 = vrot.slane %v4757_v33, 1  ;;  %v501_v38 = vrot.slane %v4761_v34, 1 }
  0x23   : > { %v4769_v39 = vsel %vm4739_vm3, 0, %v283_v27  ;;  %v4773_v40 = vsel %vm4739_vm3, %v283_v27, 0  ;;  %v4776_v41 = vshrl.u32 %v4749_v31, 16  ;;  %v4779_v42 = vshll.u32 %v4749_v31, 16 }
  0x24   : > { %v505_v43 = vsel %vm496_vm2, %v503_v35, %v504_v36  ;;  %v502_v44 = vsel %vm496_vm2, %v500_v37, %v501_v38  ;;  %v497_v45 = vrot.slane %v4769_v39, 1  ;;  %v498_v46 = vrot.slane %v4773_v40, 1 }
  0x25   : > { %525 = vrot.lane.b32.xlu1 %v505_v43, %s4640_s7  ;;  %523 = vrot.lane.b32.xlu0 %v502_v44, %s4640_s7  ;;  %v397_v47 = vrot.slane %v4779_v42, 1  ;;  %v4789_v48 = vshll.u32 %v4753_v32, 16  ;;  %v4792_v49 = vshrl.u32 %v4769_v39, 16  ;;  %v4795_v50 = vshll.u32 %v4769_v39, 16 }
  0x26   : > { %v499_v51 = vsel %vm496_vm2, %v497_v45, %v498_v46  ;;  %v4799_v52 = vshll.u32 %v4773_v40, 16  ;;  %v4803_v53 = vsel %vm4739_vm3, 0, %v307_v28  ;;  %v4807_v54 = vsel %vm4739_vm3, %v307_v28, 0 }
  0x27   : > { %521 = vrot.lane.b32.xlu2 %v499_v51, %s4640_s7  ;;  %v398_v55 = vor.u32 %v397_v47, %v4776_v41  ;;  %v402_v56 = vrot.slane %v4789_v48, 1  ;;  %v373_v57 = vrot.slane %v4795_v50, 1  ;;  %v506_v58 = vrot.slane %v4803_v53, 1 }
  0x28   : > { %v378_v59 = vrot.slane %v4799_v52, 1  ;;  %v507_v60 = vrot.slane %v4807_v54, 1  ;;  %v4817_v61 = vshrl.u32 %v4803_v53, 16  ;;  %v4820_v62 = vshll.u32 %v4803_v53, 16 }
  0x29   : > { %v403_v63 = vsel %vm367_vm4, %v398_v55, %v402_v56  ;;  %v374_v0 = vor.u32 %v373_v57, %v4792_v49  ;;  %v4825_v1 = vshll.u32 %v4807_v54, 16  ;;  %v4828_v2 = vshrl.u32 %v4757_v33, 16 }
  0x2a   : > { %v508_v4 = vsel %vm496_vm2, %v506_v58, %v507_v60  ;;  %v409_v5 = vrot.slane %v4820_v62, 1  ;;  %v4834_v6 = vshll.u32 %v4757_v33, 16  ;;  %v4837_v7 = vshll.u32 %v4761_v34, 16 }
  0x2b   : > { %v379_v9 = vsel %vm367_vm4, %v374_v0, %v378_v59  ;;  %v414_v10 = vrot.slane %v4825_v1, 1  ;;  %v311_v11 = vrot.slane %v309_v25, 6  ;;  %v314_v12 = vrot.slane %v312_v26, 7 }
  0x2c   : > { %v410_v13 = vor.u32 %v409_v5, %v4817_v61  ;;  %v385_v14 = vrot.slane %v4834_v6, 1  ;;  %v390_v15 = vrot.slane %v4837_v7, 1  ;;  %v335_v16 = vrot.slane %v333_v29, 6 }
  0x2d   : > { %468 = vrot.lane.b32.xlu1 %v403_v63, %s4641_s8  ;;  %464 = vrot.lane.b32.xlu0 %v379_v9, %s4641_s8  ;;  %v315_v17 = vor.u32 %v314_v12, %v311_v11  ;;  %v338_v19 = vrot.slane %v336_v30, 7  ;;  %v325_v20 = vshrl.u32 %v4219_v3, 16  ;;  %v328_v21 = vshll.u32 %v4219_v3, 16 }
  0x2e   : > { %v415_v22 = vsel %vm367_vm4, %v410_v13, %v414_v10  ;;  %v386_v23 = vor.u32 %v385_v14, %v4828_v2  ;;  %v317_v24 = vshrl.u32 %v4218_v8, 16  ;;  %v320_v25 = vshll.u32 %v4218_v8, 16 }
  0x2f   : > { %527 = vrot.lane.b32.xlu2 %v508_v4, %s4640_s7  ;;  %v4852_v26 = vsel %vm4739_vm3, 0, %v315_v17  ;;  %v4856_v27 = vsel %vm4739_vm3, %v315_v17, 0  ;;  %v339_v28 = vor.u32 %v338_v19, %v335_v16  ;;  %v327_v29 = vrot.slane %v325_v20, 6 }
  0x30   : > { %v391_v30 = vsel %vm367_vm4, %v386_v23, %v390_v15  ;;  %v4860_v35 = vshrl.u32 %v4852_v26, 16  ;;  %v4863_v36 = vshll.u32 %v4852_v26, 16  ;;  %v4866_v37 = vshll.u32 %v4856_v27, 16 }
  0x31   : > { %v4870_v38 = vsel %vm4739_vm3, 0, %v339_v28  ;;  %v4874_v43 = vsel %vm4739_vm3, %v339_v28, 0  ;;  %v330_v44 = vrot.slane %v328_v21, 7  ;;  %v319_v45 = vrot.slane %v317_v24, 6 }
  0x32   : > { %9105 = vst [vmem:[#allocation5_spill] sm:$0xff] %v4870_v38  ;;  %v421_v46 = vrot.slane %v4863_v36, 1  ;;  %v426_v47 = vrot.slane %v4866_v37, 1  ;;  %v4879_v51 = vshrl.u32 %v4870_v38, 16  ;;  %v4882_v55 = vshll.u32 %v4870_v38, 16 }
  0x33   : > { %v4885_v56 = vshll.u32 %v4874_v43, 16  ;;  %v331_v57 = vor.u32 %v330_v44, %v327_v29  ;;  %v322_v58 = vrot.slane %v320_v25, 7  ;;  %v509_v29 = vrot.slane %v4852_v26, 1 }
  0x34   : > { %v422_v59 = vor.u32 %v421_v46, %v4860_v35  ;;  %v457_v60 = vrot.slane %v4882_v55, 1  ;;  %v8924_v46 = vshrl.u32 %v4761_v34, 16 }
  0x35   : > { %470 = vrot.lane.b32.xlu1 %v415_v22, %s4641_s8  ;;  %466 = vrot.lane.b32.xlu0 %v391_v30, %s4641_s8  ;;  %v462_v63 = vrot.slane %v4885_v56, 1  ;;  %v4894_v0 = vsel %vm4739_vm3, 0, %v331_v57  ;;  %v4898_v3 = vsel %vm4739_vm3, %v331_v57, 0  ;;  %v323_v4 = vor.u32 %v322_v58, %v319_v45 }
  0x36   : > { %9106 = vst [vmem:[#allocation6_spill] sm:$0xff] %v4894_v0  ;;  %v427_v5 = vsel %vm367_vm4, %v422_v59, %v426_v47  ;;  %v458_v8 = vor.u32 %v457_v60, %v4879_v51  ;;  %v4903_v9 = vshrl.u32 %v4894_v0, 16  ;;  %v4906_v10 = vshll.u32 %v4894_v0, 16 }
  0x37   : > { %472 = vrot.lane.b32.xlu2 %v427_v5, %s4641_s8  ;;  %v4910_v11 = vshll.u32 %v4898_v3, 16  ;;  %v4914_v12 = vsel %vm4739_vm3, 0, %v323_v4  ;;  %v4918_v13 = vsel %vm4739_vm3, %v323_v4, 0  ;;  %v510_v30 = vrot.slane %v4856_v27, 1 }
  0x38   : > { %v445_v14 = vrot.slane %v4906_v10, 1  ;;  %v4922_v15 = vshrl.u32 %v4914_v12, 16  ;;  %v4925_v16 = vshll.u32 %v4914_v12, 16  ;;  %v4929_v19 = vshll.u32 %v4918_v13, 16 }
  0x39   : > { %v450_v17 = vrot.slane %v4910_v11, 1  ;;  %v463_v20 = vsel %vm367_vm4, %v458_v8, %v462_v63  ;;  %v512_v25 = vrot.slane %v4914_v12, 1  ;;  %v513_v28 = vrot.slane %v4918_v13, 1 }
  0x3a   : > { %v446_v21 = vor.u32 %v445_v14, %v4903_v9  ;;  %v433_v18 = vrot.slane %v4925_v16, 1  ;;  %v438_v22 = vrot.slane %v4929_v19, 1  ;;  %v8923_v45 = vshrl.u32 %v4773_v40, 16 }
  0x3b   : > { %v515_v47 = vrot.slane %v4894_v0, 1  ;;  %v516_v57 = vrot.slane %v4898_v3, 1  ;;  %v514_v58 = vsel %vm496_vm2, %v512_v25, %v513_v28  ;;  %v511_v59 = vsel %vm496_vm2, %v509_v29, %v510_v30 }
  0x3c   : > { %v451_v23 = vsel %vm367_vm4, %v446_v21, %v450_v17  ;;  %v434_v24 = vor.u32 %v433_v18, %v4922_v15  ;;  %v538_v60 = vrot.slane %v4792_v49, 1  ;;  %v539_v63 = vrot.slane %v4795_v50, 2 }
  0x3d   : > { %478 = vrot.lane.b32.xlu1 %v463_v20, %s4641_s8  ;;  %476 = vrot.lane.b32.xlu0 %v451_v23, %s4641_s8  ;;  %v543_v4 = vrot.slane %v8923_v45, 1  ;;  %v544_v5 = vrot.slane %v4799_v52, 2  ;;  %v547_v8 = vrot.slane %v4828_v2, 1  ;;  %v548_v14 = vrot.slane %v4834_v6, 2 }
  0x3e   : > { %v439_v44 = vsel %vm367_vm4, %v434_v24, %v438_v22  ;;  %v552_v17 = vrot.slane %v8924_v46, 1  ;;  %v553_v20 = vrot.slane %v4837_v7, 2  ;;  %v517_v21 = vsel %vm496_vm2, %v515_v47, %v516_v57 }
  0x3f   : > { %474 = vrot.lane.b32.xlu2 %v439_v44, %s4641_s8  ;;  %v518_v18 = vrot.slane %v4870_v38, 1  ;;  %v519_v22 = vrot.slane %v4874_v43, 1  ;;  %v540_v23 = vor.u32 %v539_v63, %v538_v60  ;;  %v545_v24 = vor.u32 %v544_v5, %v543_v4 }
  0x40   : > { %v8921_v25 = vshrl.u32 %v4807_v54, 16  ;;  %v8922_v28 = vshrl.u32 %v4753_v32, 16  ;;  %v549_v29 = vor.u32 %v548_v14, %v547_v8  ;;  %v554_v30 = vor.u32 %v553_v20, %v552_v17 }
  0x41   : > { %v520_v44 = vsel %vm496_vm2, %v518_v18, %v519_v22  ;;  %v565_v47 = vrot.slane %v4817_v61, 1  ;;  %v8925_v57 = vshrl.u32 %v4856_v27, 16  ;;  %v556_v60 = vrot.slane %v4776_v41, 1 }
  0x42   : > { %v557_v63 = vrot.slane %v4779_v42, 2  ;;  %v546_v4 = vsel %vm537_vm5, %v540_v23, %v545_v24  ;;  %v570_v5 = vrot.slane %v8921_v25, 1  ;;  %v561_v8 = vrot.slane %v8922_v28, 1 }
  0x43   : > { %v562_v14 = vrot.slane %v4789_v48, 2  ;;  %v555_v17 = vsel %vm537_vm5, %v549_v29, %v554_v30  ;;  %v595_v20 = vshrl.u32 %v4898_v3, 16  ;;  %v575_v18 = vrot.slane %v4863_v36, 2 }
  0x44   : > { %v579_v22 = vrot.slane %v8925_v57, 1  ;;  %v580_v23 = vrot.slane %v4866_v37, 2  ;;  %v558_v28 = vor.u32 %v557_v63, %v556_v60  ;;  %v586_v30 = vshrl.u32 %v4918_v13, 16 }
  0x45   : > { %531 = vrot.lane.b32.xlu1 %v514_v58, %s4640_s7  ;;  %529 = vrot.lane.b32.xlu0 %v511_v59, %s4640_s7  ;;  %v566_v58 = vrot.slane %v4820_v62, 2  ;;  %v571_v59 = vrot.slane %v4825_v1, 2  ;;  %v563_v29 = vor.u32 %v562_v14, %v561_v8  ;;  %v592_v45 = vrot.slane %v4903_v9, 1 }
  0x46   : > { %v593_v46 = vrot.slane %v4906_v10, 2  ;;  %v597_v57 = vrot.slane %v595_v20, 1  ;;  %v598_v38 = vrot.slane %v4910_v11, 2  ;;  %v581_v0 = vor.u32 %v580_v23, %v579_v22 }
  0x47   : > { %533 = vrot.lane.b32.xlu2 %v517_v21, %s4640_s7  ;;  %v574_v21 = vrot.slane %v4860_v35, 1  ;;  %v567_v24 = vor.u32 %v566_v58, %v565_v47  ;;  %v572_v25 = vor.u32 %v571_v59, %v570_v5  ;;  %v583_v47 = vrot.slane %v4922_v15, 1 }
  0x48   : > { %v584_v58 = vrot.slane %v4925_v16, 2  ;;  %v564_v60 = vsel %vm537_vm5, %v558_v28, %v563_v29  ;;  %v588_v63 = vrot.slane %v586_v30, 1  ;;  %v589_v5 = vrot.slane %v4929_v19, 2 }
  0x49   : > { %v573_v59 = vsel %vm537_vm5, %v567_v24, %v572_v25  ;;  %v594_v8 = vor.u32 %v593_v46, %v592_v45  ;;  %v599_v14 = vor.u32 %v598_v38, %v597_v57  ;;  %v607_v25 = vrot.slane %v4885_v56, 2 }
  0x4a   : > { %v585_v28 = vor.u32 %v584_v58, %v583_v47  ;;  %v590_v23 = vor.u32 %v589_v5, %v588_v63  ;;  %v659_v45 = vrot.slane %v4828_v2, 2  ;;  %v660_v57 = vrot.slane %v4834_v6, 3 }
  0x4b   : > { %v600_v38 = vsel %vm537_vm5, %v594_v8, %v599_v14  ;;  %v9107_v24 = vshrl.u32 %v4761_v34, 16  ;;  %v653_v58 = vrot.slane %v4795_v50, 3  ;;  %v656_v2 = vrot.slane %v4799_v52, 3 }
  0x4c   : > { %v591_v47 = vsel %vm537_vm5, %v585_v28, %v590_v23  ;;  %v666_v5 = vrot.slane %v4776_v41, 2  ;;  %v667_v6 = vrot.slane %v4779_v42, 3  ;;  %v9109_v8 = vshrl.u32 %v4753_v32, 16 }
  0x4d   : > { %610 = vrot.lane.b32.xlu1 %v546_v4, %s4642_s9  ;;  %535 = vrot.lane.b32.xlu0 %v520_v44, %s4640_s7  ;;  %v576_v4 = vor.u32 %v575_v18, %v574_v21  ;;  %v604_v44 = vshrl.u32 %v4874_v43, 16  ;;  %v602_v18 = vrot.slane %v4882_v55, 2  ;;  %v662_v29 = vrot.slane %v9107_v24, 2 }
  0x4e   : > { %v669_v14 = vrot.slane %v9109_v8, 2  ;;  %v661_v50 = vor.u32 %v660_v57, %v659_v45  ;;  %v680_v41 = vrot.slane %v4860_v35, 2  ;;  %v681_v42 = vrot.slane %v4863_v36, 3 }
  0x4f   : > { %612 = vrot.lane.b32.xlu2 %v555_v17, %s4642_s9  ;;  %v601_v17 = vrot.slane %v4879_v51, 1  ;;  %v582_v21 = vsel %vm537_vm5, %v576_v4, %v581_v0  ;;  %v606_v22 = vrot.slane %v604_v44, 1  ;;  %v663_v4 = vrot.slane %v4837_v7, 3 }
  0x50   : > { %v670_v7 = vrot.slane %v4789_v48, 3  ;;  %v673_v23 = vrot.slane %v4817_v61, 2  ;;  %v9111_v45 = vshrl.u32 %v4807_v54, 16  ;;  %v677_v35 = vrot.slane %v4825_v1, 3 }
  0x51   : > { %v603_v0 = vor.u32 %v602_v18, %v601_v17  ;;  %v608_v46 = vor.u32 %v607_v25, %v606_v22  ;;  %v664_v17 = vor.u32 %v663_v4, %v662_v29  ;;  %v9110_v18 = vshrl.u32 %v4856_v27, 16 }
  0x52   : > { %v684_v22 = vrot.slane %v4866_v37, 3  ;;  %v668_v25 = vor.u32 %v667_v6, %v666_v5  ;;  %v671_v28 = vor.u32 %v670_v7, %v669_v14  ;;  %v682_v57 = vor.u32 %v681_v42, %v680_v41  ;;  %v4228_v42 = vld [vmem:[%s8917_s1 + $0x38] sm:$0xff] }
  0x53   : > { %v683_v48 = vrot.slane %v9110_v18, 2  ;;  %v665_v36 = vsel %vm651_vm6, %v661_v50, %v664_v17  ;;  %v687_v37 = vrot.slane %v4922_v15, 2  ;;  %v688_v4 = vrot.slane %v4925_v16, 3  ;;  %4235 = vmatpush.bf16.msra.mxu2 %v4228_v42  ;;  %992 = vmatpush.bf16.msra.mxu0 %v4228_v42 }
  0x54   : > { %v672_v29 = vsel %vm651_vm6, %v668_v25, %v671_v28  ;;  %v690_v61 = vrot.slane %v586_v30, 2  ;;  %v702_v30 = vrot.slane %v4882_v55, 3  ;;  %v695_v5 = vrot.slane %v4906_v10, 3 }
  0x55   : > { %616 = vrot.lane.b32.xlu1 %v573_v59, %s4642_s9  ;;  %614 = vrot.lane.b32.xlu0 %v564_v60, %s4642_s9  ;;  %v652_v59 = vrot.slane %v4792_v49, 2  ;;  %v9108_v60 = vshrl.u32 %v4773_v40, 16  ;;  %v609_v49 = vsel %vm537_vm5, %v603_v0, %v608_v46  ;;  %v676_v0 = vrot.slane %v9111_v45, 2 }
  0x56   : > { %v685_v24 = vor.u32 %v684_v22, %v683_v48  ;;  %v689_v15 = vor.u32 %v688_v4, %v687_v37  ;;  %v697_v6 = vrot.slane %v595_v20, 2  ;;  %v732_v50 = vrot.slane %v4753_v32, 3  ;;  %v4227_v22 = vld [vmem:[%s8917_s1 + $0x30] sm:$0xff]  ;;  %v4225_v37 = vld [vmem:[%s8917_s1 + $0x20] sm:$0xff] }
  0x57   : > { %618 = vrot.lane.b32.xlu2 %v582_v21, %s4642_s9  ;;  %v655_v63 = vrot.slane %v9108_v60, 2  ;;  %v654_v21 = vor.u32 %v653_v58, %v652_v59  ;;  %v678_v59 = vor.u32 %v677_v35, %v676_v0  ;;  %v701_v58 = vrot.slane %v4879_v51, 2  ;;  %4236 = vmatpush.bf16.msra.mxu2 %v4227_v22  ;;  %v9112_v0 = vld [vmem:[#allocation6_spill] sm:$0xff] }
  0x58   : > { %v698_v51 = vrot.slane %v4910_v11, 3  ;;  %v728_v17 = vrot.slane %v4757_v33, 3  ;;  %v735_v41 = vrot.slane %v4807_v54, 3  ;;  %v740_v28 = vrot.slane %v4914_v12, 3  ;;  %993 = vmatpush.bf16.msra.mxu0 %v4227_v22 }
  0x59   : > { %v657_v52 = vor.u32 %v656_v2, %v655_v63  ;;  %v705_v63 = vrot.slane %v4885_v56, 3  ;;  %v694_v2 = vrot.slane %v4903_v9, 2  ;;  %v703_v55 = vor.u32 %v702_v30, %v701_v58  ;;  %v4221_v30 = vld [vmem:[%s8917_s1] sm:$0xff] }
  0x5a   : > { %v699_v7 = vor.u32 %v698_v51, %v697_v6  ;;  %v725_v56 = vrot.slane %v4769_v39, 3  ;;  %v726_v9 = vrot.slane %v4773_v40, 3  ;;  %v738_v45 = vrot.slane %v4856_v27, 3 }
  0x5b   : > { %v658_v46 = vsel %vm651_vm6, %v654_v21, %v657_v52  ;;  %v729_v21 = vrot.slane %v4761_v34, 3  ;;  %v734_v52 = vrot.slane %v4803_v53, 3  ;;  %v743_v35 = vrot.slane %v9112_v0, 3 }
  0x5c   : > { %v727_v20 = vsel %vm724_vm7, %v725_v56, %v726_v9  ;;  %v4231_v9 = vld [vmem:[%s8917_s1 + $0x50] sm:$0xff] }
  0x5d   : > { %622 = vrot.lane.b32.xlu1 %v600_v38, %s4642_s9  ;;  %620 = vrot.lane.b32.xlu0 %v591_v47, %s4642_s9  ;;  %v674_v38 = vrot.slane %v4820_v62, 3  ;;  %v691_v62 = vrot.slane %v4929_v19, 3  ;;  %v686_v47 = vsel %vm651_vm6, %v682_v57, %v685_v24  ;;  %v704_v19 = vrot.slane %v604_v44, 2  ;;  %v4226_v57 = vld [vmem:[%s8917_s1 + $0x28] sm:$0xff] }
  0x5e   : > { %v696_v44 = vor.u32 %v695_v5, %v694_v2  ;;  %v730_v48 = vsel %vm724_vm7, %v728_v17, %v729_v21  ;;  %v736_v25 = vsel %vm724_vm7, %v734_v52, %v735_v41  ;;  %4237 = vmatpush.bf16.msra.mxu2 %v4226_v57  ;;  %994 = vmatpush.bf16.msra.mxu0 %v4226_v57 }
  0x5f   : > { %624 = vrot.lane.b32.xlu2 %v609_v49, %s4642_s9  ;;  %v675_v1 = vor.u32 %v674_v38, %v673_v23  ;;  %v692_v60 = vor.u32 %v691_v62, %v690_v61  ;;  %v706_v14 = vor.u32 %v705_v63, %v704_v19  ;;  %v731_v49 = vrot.slane %v4749_v31, 3  ;;  %v9113_v61 = vld [vmem:[#allocation5_spill] sm:$0xff] }
  0x60   : > { %v700_v11 = vsel %vm651_vm6, %v696_v44, %v699_v7  ;;  %v741_v23 = vrot.slane %v4918_v13, 3  ;;  %v737_v38 = vrot.slane %v4852_v26, 3  ;;  %v746_v62 = vrot.slane %v9113_v61, 3  ;;  %v4232_v7 = vld [vmem:[%s8917_s1 + $0x58] sm:$0xff] }
  0x61   : > { %v679_v16 = vsel %vm651_vm6, %v675_v1, %v678_v59  ;;  %v693_v8 = vsel %vm651_vm6, %v689_v15, %v692_v60  ;;  %v707_v10 = vsel %vm651_vm6, %v703_v55, %v706_v14  ;;  %v733_v18 = vsel %vm724_vm7, %v731_v49, %v732_v50  ;;  %v4223_v15 = vld [vmem:[%s8917_s1 + $0x10] sm:$0xff]  ;;  %v4222_v60 = vld [vmem:[%s8917_s1 + $0x8] sm:$0xff]  ;;  %v4233_v55 = vld [vmem:[%s8917_s1 + $0x60] sm:$0xff] }
  0x62   : > { %v742_v24 = vsel %vm724_vm7, %v740_v28, %v741_v23  ;;  %v747_v1 = vrot.slane %v4874_v43, 3  ;;  %4238 = vmatpush.bf16.msra.mxu2 %v4225_v37  ;;  %995 = vmatpush.bf16.msra.mxu0 %v4225_v37  ;;  %v4230_v49 = vld [vmem:[%s8917_s1 + $0x48] sm:$0xff]  ;;  %v4229_v50 = vld [vmem:[%s8917_s1 + $0x40] sm:$0xff] }
  0x64   : > { %v748_v58 = vsel %vm724_vm7, %v746_v62, %v747_v1 }
  0x65   : > { %710 = vrot.lane.b32.xlu1 %v665_v36, %s4641_s8  ;;  %708 = vrot.lane.b32.xlu0 %v658_v46, %s4641_s8  ;;  %v744_v36 = vrot.slane %v4898_v3, 3 }
  0x67   : > { %712 = vrot.lane.b32.xlu2 %v672_v29, %s4641_s8  ;;  %v739_v29 = vsel %vm724_vm7, %v737_v38, %v738_v45  ;;  %v745_v4 = vsel %vm724_vm7, %v743_v35, %v744_v36 }
  0x6d   : > { %716 = vrot.lane.b32.xlu1 %v686_v47, %s4641_s8  ;;  %714 = vrot.lane.b32.xlu0 %v679_v16, %s4641_s8  ;;  %v4224_v47 = vld [vmem:[%s8917_s1 + $0x18] sm:$0xff] }
  0x6e   : > { %4239 = vmatpush.bf16.msra.mxu2 %v4224_v47  ;;  %996 = vmatpush.bf16.msra.mxu0 %v4224_v47  ;;  %v627_v47 = vrot.slane %v4769_v39, 2 }
  0x6f   : > { %718 = vrot.lane.b32.xlu2 %v693_v8, %s4641_s8  ;;  %v4234_v8 = vld [vmem:[%s8917_s1 + $0x68] sm:$0xff] }
  0x70   : > { %1043 = vmatpush.bf16.msra.mxu1 %v4234_v8  ;;  %4243 = vmatpush.bf16.msra.mxu3 %v4234_v8 }
  0x72   : > { %4240 = vmatpush.bf16.msra.mxu2 %v4223_v15  ;;  %997 = vmatpush.bf16.msra.mxu0 %v4223_v15 }
  0x74   : > { %1044 = vmatpush.bf16.msra.mxu1 %v4233_v55  ;;  %4244 = vmatpush.bf16.msra.mxu3 %v4233_v55 }
  0x75   : > { %722 = vrot.lane.b32.xlu1 %v707_v10, %s4641_s8  ;;  %720 = vrot.lane.b32.xlu0 %v700_v11, %s4641_s8 }
  0x76   : > { %4241 = vmatpush.bf16.msra.mxu2 %v4222_v60  ;;  %998 = vmatpush.bf16.msra.mxu0 %v4222_v60 }
  0x77   : > { %749 = vrot.lane.b32.xlu2 %v727_v20, %s4640_s7 }
  0x78   : > { %1045 = vmatpush.bf16.msra.mxu1 %v4232_v7  ;;  %4245 = vmatpush.bf16.msra.mxu3 %v4232_v7 }
  0x7a   : > { %4242 = vmatpush.bf16.msra.mxu2 %v4221_v30  ;;  %999 = vmatpush.bf16.msra.mxu0 %v4221_v30 }
  0x7c   : > { %1046 = vmatpush.bf16.msra.mxu1 %v4231_v9  ;;  %4246 = vmatpush.bf16.msra.mxu3 %v4231_v9 }
  0x7d   : > { %753 = vrot.lane.b32.xlu1 %v733_v18, %s4640_s7  ;;  %751 = vrot.lane.b32.xlu0 %v730_v48, %s4640_s7 }
  0x7f   : > { %755 = vrot.lane.b32.xlu2 %v736_v25, %s4640_s7 }
  0x80   : > { %1047 = vmatpush.bf16.msra.mxu1 %v4230_v49  ;;  %4247 = vmatpush.bf16.msra.mxu3 %v4230_v49  ;;  %v630_v49 = vrot.slane %v4757_v33, 2 }
  0x81   : > { %v5105_v46 = vpop.permute.xlu2 %521 }
  0x84   : > { %1048 = vmatpush.bf16.msra.mxu1 %v4229_v50  ;;  %4248 = vmatpush.bf16.msra.mxu3 %v4229_v50 }
  0x85   : > { %759 = vrot.lane.b32.xlu1 %v742_v24, %s4640_s7  ;;  %757 = vrot.lane.b32.xlu0 %v739_v29, %s4640_s7 }
  0x87   : > { %761 = vrot.lane.b32.xlu2 %v745_v4, %s4640_s7 }
  0x89   : > { %v5121_v59 = vpop.permute.xlu2 %527 }
  0x8d   : > { %763 = vrot.lane.b32.xlu0 %v748_v58, %s4640_s7  ;;  %v628_v58 = vrot.slane %v4773_v40, 2 }
  0x8f   : > { %v629_v15 = vsel %vm626_vm11, %v627_v47, %v628_v58 }
  0x91   : > { %v473_v16 = vpop.permute.xlu2 %472 }
  0x92   : > { %v775_v17 = vsel %vm765_vm8, %v4852_v26, %v473_v16 }
  0x97   : > { %v5137_v19 = vpop.permute.xlu1 %525  ;;  %v524_v63 = vpop.permute.xlu0 %523 }
  0x99   : > { %v475_v2 = vpop.permute.xlu2 %474 }
  0x9a   : > { %v777_v29 = vsel %vm765_vm8, %v4914_v12, %v475_v2 }
  0x9f   : > { %v5139_v5 = vpop.permute.xlu1 %468  ;;  %v465_v6 = vpop.permute.xlu0 %464 }
  0xa0   : > { %v767_v48 = vsel %vm765_vm8, %v4769_v39, %v465_v6  ;;  %v4292_v6 = vld [vmem:[%s8918_s2 + $0x1] ss:$0 sm:$0xff]  ;;  %v771_v39 = vsel %vm765_vm8, %v4749_v31, %v5139_v5 }
  0xa1   : > { %v5141_v51 = vpop.permute.xlu2 %533  ;;  %v784_v28 = vsel %vm782_vm9, %v767_v48, %v5105_v46  ;;  %1552 = vrot.lane.b32.xlu2 %v4292_v6, %s4641_s8 }
  0xa7   : > { %v5149_v14 = vpop.permute.xlu1 %470  ;;  %v467_v44 = vpop.permute.xlu0 %466 }
  0xa8   : > { %v769_v36 = vsel %vm765_vm8, %v4757_v33, %v467_v44  ;;  %v788_v44 = vsel %vm782_vm9, %v771_v39, %v5137_v19  ;;  %v773_v50 = vsel %vm765_vm8, %v4803_v53, %v5149_v14 }
  0xa9   : > { %v613_v56 = vpop.permute.xlu2 %612  ;;  %v786_v24 = vsel %vm782_vm9, %v769_v36, %v524_v63 }
  0xaa   : > { %v804_v62 = vsel %vm799_vm10, %v786_v24, %v613_v56 }
  0xaf   : > { %v5157_v10 = vpop.permute.xlu1 %478  ;;  %v477_v11 = vpop.permute.xlu0 %476 }
  0xb0   : > { %v779_v40 = vsel %vm765_vm8, %v9112_v0, %v477_v11  ;;  %v631_v11 = vrot.slane %v4761_v34, 2  ;;  %v781_v19 = vsel %vm765_vm8, %v9113_v61, %v5157_v10  ;;  %v790_v34 = vsel %vm782_vm9, %v773_v50, %v5121_v59 }
  0xb1   : > { %v619_v20 = vpop.permute.xlu2 %618  ;;  %v796_v7 = vsel %vm782_vm9, %v779_v40, %v5141_v51  ;;  %v633_v59 = vrot.slane %v4749_v31, 2 }
  0xb2   : > { %v632_v51 = vsel %vm626_vm11, %v630_v49, %v631_v11 }
  0xb7   : > { %v532_v21 = vpop.permute.xlu1 %531  ;;  %v530_v52 = vpop.permute.xlu0 %529 }
  0xb8   : > { %v792_v41 = vsel %vm782_vm9, %v775_v17, %v530_v52  ;;  %v794_v37 = vsel %vm782_vm9, %v777_v29, %v532_v21  ;;  %v642_v21 = vrot.slane %v4914_v12, 2  ;;  %v636_v29 = vrot.slane %v4803_v53, 2 }
  0xb9   : > { %v813_v42 = vsel %vm799_vm10, %v792_v41, %v619_v20  ;;  %v625_v18 = vpop.permute.xlu2 %624 }
  0xba   : > { %1020 = vmatmul.bf16.vlgmr.msra.gmra.mxu2 %v813_v42  ;;  %v643_v42 = vrot.slane %v4918_v13, 2  ;;  %v634_v13 = vrot.slane %v4753_v32, 2 }
  0xbc   : > { %v644_v12 = vsel %vm626_vm11, %v642_v21, %v643_v42 }
  0xbf   : > { %v611_v22 = vpop.permute.xlu1 %610  ;;  %v536_v25 = vpop.permute.xlu0 %535 }
  0xc0   : > { %v801_v23 = vsel %vm799_vm10, %v784_v28, %v611_v22  ;;  %v798_v17 = vsel %vm782_vm9, %v781_v19, %v536_v25 }
  0xc1   : > { %1000 = vmatmul.bf16.vlgmr.msra.gmra.mxu0 %v801_v23  ;;  %v5174_v38 = vpop.permute.xlu2 %712  ;;  %v822_v48 = vsel %vm799_vm10, %v798_v17, %v625_v18  ;;  %v635_v23 = vsel %vm626_vm11, %v633_v59, %v634_v13 }
  0xc2   : > { %v832_v36 = vsel %vm765_vm8, %v635_v23, %v5174_v38 }
  0xc7   : > { %v617_v45 = vpop.permute.xlu1 %616  ;;  %v615_v35 = vpop.permute.xlu0 %614 }
  0xc8   : > { %v807_v56 = vsel %vm799_vm10, %v788_v44, %v615_v35  ;;  %v810_v14 = vsel %vm799_vm10, %v790_v34, %v617_v45  ;;  %v645_v45 = vrot.slane %v9112_v0, 2  ;;  %v646_v35 = vrot.slane %v4898_v3, 2 }
  0xc9   : > { %v719_v57 = vpop.permute.xlu2 %718 }
  0xca   : > { %v841_v22 = vsel %vm765_vm8, %v644_v12, %v719_v57  ;;  %v647_v24 = vsel %vm626_vm11, %v645_v45, %v646_v35 }
  0xcf   : > { %v623_v4 = vpop.permute.xlu1 %622  ;;  %v621_v46 = vpop.permute.xlu0 %620 }
  0xd0   : > { %v816_v1 = vsel %vm799_vm10, %v794_v37, %v621_v46  ;;  %v819_v9 = vsel %vm799_vm10, %v796_v7, %v623_v4  ;;  %v637_v37 = vrot.slane %v4807_v54, 2  ;;  %v648_v46 = vrot.slane %v9113_v61, 2 }
  0xd1   : > { %1005 = vmatmul.bf16.gmra.mxu0 %v804_v62  ;;  %1025 = vmatmul.bf16.gmra.mxu2 %v816_v1  ;;  %v750_v60 = vpop.permute.xlu2 %749  ;;  %v649_v62 = vrot.slane %v4874_v43, 2 }
  0xd2   : > { %v638_v3 = vsel %vm626_vm11, %v636_v29, %v637_v37 }
  0xd3   : > { %v650_v53 = vsel %vm626_vm11, %v648_v46, %v649_v62 }
  0xd7   : > { %v711_v16 = vpop.permute.xlu1 %710  ;;  %v709_v30 = vpop.permute.xlu0 %708 }
  0xd8   : > { %v826_v63 = vsel %vm765_vm8, %v629_v15, %v709_v30  ;;  %v829_v52 = vsel %vm765_vm8, %v632_v51, %v711_v16  ;;  %v639_v15 = vrot.slane %v4852_v26, 2 }
  0xd9   : > { %v849_v2 = vsel %vm782_vm9, %v826_v63, %v750_v60  ;;  %v756_v18 = vpop.permute.xlu2 %755  ;;  %v640_v60 = vrot.slane %v4856_v27, 2  ;;  %v5265_v63 = vld [vmem:[%s8918_s2] ss:$0 sm:$0xff] }
  0xda   : > { %4200 = vmatmul.msk.bf16.vlgmr.msra.gmra.mxu1 %vm799_vm10, %v849_v2 }
  0xdb   : > { %v641_v61 = vsel %vm626_vm11, %v639_v15, %v640_v60 }
  0xdf   : > { %v5199_v8 = vpop.permute.xlu1 %716  ;;  %v715_v55 = vpop.permute.xlu0 %714 }
  0xe0   : > { %v835_v4 = vsel %vm765_vm8, %v638_v3, %v715_v55  ;;  %v838_v43 = vsel %vm765_vm8, %v641_v61, %v5199_v8 }
  0xe1   : > { %1010 = vmatmul.bf16.gmra.mxu0 %v807_v56  ;;  %1030 = vmatmul.bf16.gmra.mxu2 %v819_v9  ;;  %v762_v32 = vpop.permute.xlu2 %761  ;;  %v855_v1 = vsel %vm782_vm9, %v835_v4, %v756_v18 }
  0xe7   : > { %v723_v20 = vpop.permute.xlu1 %722  ;;  %v721_v5 = vpop.permute.xlu0 %720 }
  0xe8   : > { %v844_v31 = vsel %vm765_vm8, %v647_v24, %v721_v5  ;;  %v847_v47 = vsel %vm765_vm8, %v650_v53, %v723_v20 }
  0xe9   : > { %v861_v0 = vsel %vm782_vm9, %v844_v31, %v762_v32 }
  0xef   : > { %v754_v41 = vpop.permute.xlu1 %753  ;;  %v752_v33 = vpop.permute.xlu0 %751 }
  0xf0   : > { %v851_v10 = vsel %vm782_vm9, %v829_v52, %v752_v33  ;;  %v853_v57 = vsel %vm782_vm9, %v832_v36, %v754_v41 }
  0xf1   : > { %1015 = vmatmul.bf16.gmra.mxu0 %v810_v14  ;;  %1035 = vmatmul.bf16.gmra.mxu2 %v822_v48 }
  0xf2   : > { %4201 = vmatmul.msk.bf16.gmra.mxu1 %vm799_vm10, %v851_v10 }
  0xf7   : > { %v760_v25 = vpop.permute.xlu1 %759  ;;  %v758_v38 = vpop.permute.xlu0 %757 }
  0xf8   : > { %v859_v28 = vsel %vm782_vm9, %v841_v22, %v760_v25  ;;  %v857_v16 = vsel %vm782_vm9, %v838_v43, %v758_v38 }
  0xf9   : > { %4205 = vmatmul.msk.bf16.vlgmr.msra.gmra.mxu3 %vm799_vm10, %v859_v28 }
  0xfb   : > { %v5267_v2 = vpop.permute.xlu2 %1552 }
  0xff   : > { %v764_v54 = vpop.permute.xlu0 %763 }
 0x100   : > { %v863_v58 = vsel %vm782_vm9, %v847_v47, %v764_v54 }
 0x102   : > { %4202 = vmatmul.msk.bf16.gmra.mxu1 %vm799_vm10, %v853_v57 }
 0x109   : > { %4206 = vmatmul.msk.bf16.gmra.mxu3 %vm799_vm10, %v861_v0 }
 0x112   : > { %4203 = vmatmul.msk.bf16.gmra.mxu1 %vm799_vm10, %v855_v1 }
 0x119   : > { %4207 = vmatmul.msk.bf16.gmra.mxu3 %vm799_vm10, %v863_v58 }
 0x122   : > { %4204 = vmatmul.msk.bf16.gmra.mxu1 %vm799_vm10, %v857_v16 }
 0x13d   : > { %v5305_v51 = vpop.f32.mrf.mxu2 }
 0x13e   : > { %v1001_v30 = vpop.f32.mrf.mxu0 }
 0x145   : > { %v5316_v52 = vpop.f32.mrf.mxu2 }
 0x146   : > { %v1003_v8 = vpop.f32.mrf.mxu0 }
 0x14e   : > { %v1006_v49 = vpop.f32.mrf.mxu0 }
 0x154   : > { %v1026_v34 = vpop.f32.mrf.mxu2 }
 0x156   : > { %v1008_v13 = vpop.f32.mrf.mxu0 }
 0x157   : > { %v1050_v26 = vpop.f32.mrf.mxu1 }
 0x158   : > { %v5269_v27 = vadd.f32 %v1050_v26, %v1001_v30 }
 0x15a   : > { %v5273_v6 = vadd.f32 %v5267_v2, %v5269_v27  ;;  %v5277_v39 = vadd.f32 %v5265_v63, %v5269_v27 }
 0x15c   : > { %9114 = vst [vmem:[#allocation6_spill] sm:$0xff] %v5273_v6  ;;  %1587 = vrot.lane.b32.xlu0 %v5273_v6, %s4642_s9  ;;  %v1108_v40 = vsel %vm765_vm8, %v5277_v39, 0.0  ;;  %v1179_v7 = vmul.f32 %v5277_v39, %v5277_v39  ;;  %v1699_v56 = vmul.f32 %v5273_v6, %v5273_v6  ;;  %v1028_v31 = vpop.f32.mrf.mxu2 }
 0x15d   : > { %1109 = vadd.xlane.f32.xlu1 %v1108_v40 }
 0x15e   : > { %v1195_v5 = vsel %vm765_vm8, %v1179_v7, 0.0  ;;  %v1011_v46 = vpop.f32.mrf.mxu0 }
 0x15f   : > { %v1052_v55 = vpop.f32.mrf.mxu1 }
 0x160   : > { %v5283_v44 = vadd.f32 %v1052_v55, %v1003_v8 }
 0x162   : > { %v5291_v9 = vadd.f32 %v5265_v63, %v5283_v44  ;;  %v5309_v17 = vadd.f32 %v5267_v2, %v5283_v44 }
 0x164   : > { %1731 = vrot.lane.b32.xlu0 %v1699_v56, %s4642_s9  ;;  %v1111_v20 = vsel %vm765_vm8, %v5291_v9, 0.0  ;;  %9116 = vst [vmem:[#allocation7_spill] sm:$0xff] %v5309_v17  ;;  %v1700_v21 = vmul.f32 %v5309_v17, %v5309_v17  ;;  %v1180_v22 = vmul.f32 %v5291_v9, %v5291_v9  ;;  %v1031_v15 = vpop.f32.mrf.mxu2 }
 0x165   : > { %1112 = vadd.xlane.f32.xlu2 %v1111_v20  ;;  %1196 = vadd.xlane.f32.xlu1 %v1195_v5 }
 0x166   : > { %v1198_v28 = vsel %vm765_vm8, %v1180_v22, 0.0  ;;  %v1013_v56 = vpop.f32.mrf.mxu0 }
 0x16f   : > { %v1055_v11 = vpop.f32.mrf.mxu1 }
 0x170   : > { %v5297_v50 = vadd.f32 %v1055_v11, %v1006_v49 }
 0x172   : > { %v5301_v19 = vadd.f32 %v5267_v2, %v5297_v50  ;;  %v5331_v48 = vadd.f32 %v5265_v63, %v5297_v50 }
 0x174   : > { %9115 = vst [vmem:[#allocation5_spill] sm:$0xff] %v5301_v19  ;;  %1591 = vrot.lane.b32.xlu0 %v5301_v19, %s4642_s9  ;;  %v1701_v41 = vmul.f32 %v5301_v19, %v5301_v19  ;;  %v1114_v10 = vsel %vm765_vm8, %v5331_v48, 0.0  ;;  %v1181_v12 = vmul.f32 %v5331_v48, %v5331_v48 }
 0x176   : > { %v1201_v25 = vsel %vm765_vm8, %v1181_v12, 0.0 }
 0x177   : > { %v1057_v59 = vpop.f32.mrf.mxu1 }
 0x178   : > { %v5341_v18 = vadd.f32 %v1057_v59, %v1008_v13 }
 0x17a   : > { %v5349_v45 = vadd.f32 %v5267_v2, %v5341_v18  ;;  %v5353_v35 = vadd.f32 %v5265_v63, %v5341_v18 }
 0x17c   : > { %v1075_v33 = vpop.f32.mrf.mxu3  ;;  %9119 = vst [vmem:[#allocation10_spill] sm:$0xff] %v5349_v45  ;;  %v1702_v57 = vmul.f32 %v5349_v45, %v5349_v45  ;;  %v1182_v32 = vmul.f32 %v5353_v35, %v5353_v35  ;;  %v1117_v54 = vsel %vm765_vm8, %v5353_v35, 0.0 }
 0x17d   : > { %1733 = vrot.lane.b32.xlu2 %v1700_v21, %s4642_s9  ;;  %v5321_v42 = vadd.f32 %v1075_v33, %v1026_v34  ;;  %9120 = vst [vmem:[#allocation11_spill] sm:$0xff] %v5353_v35 }
 0x17e   : > { %1589 = vrot.lane.b32.xlu1 %v5309_v17, %s4642_s9  ;;  %v1204_v37 = vsel %vm765_vm8, %v1182_v32, 0.0  ;;  %v1033_v32 = vpop.f32.mrf.mxu2 }
 0x17f   : > { %v5325_v14 = vadd.f32 %v5267_v2, %v5321_v42  ;;  %v5345_v23 = vadd.f32 %v5265_v63, %v5321_v42  ;;  %v1060_v4 = vpop.f32.mrf.mxu1 }
 0x180   : > { %v5379_v62 = vadd.f32 %v1060_v4, %v1011_v46 }
 0x181   : > { %9117 = vst [vmem:[#allocation8_spill] sm:$0xff] %v5325_v14  ;;  %v1138_v36 = vsel %vm765_vm8, %v5345_v23, 0.0  ;;  %v1709_v3 = vmul.f32 %v5325_v14, %v5325_v14  ;;  %v1189_v60 = vmul.f32 %v5345_v23, %v5345_v23 }
 0x182   : > { %9118 = vst [vmem:[#allocation9_spill] sm:$0xff] %v5345_v23  ;;  %v5383_v1 = vadd.f32 %v5267_v2, %v5379_v62  ;;  %v5411_v8 = vadd.f32 %v5265_v63, %v5379_v62 }
 0x183   : > { %v1225_v16 = vsel %vm765_vm8, %v1189_v60, 0.0 }
 0x184   : > { %v1077_v24 = vpop.f32.mrf.mxu3  ;;  %9122 = vst [vmem:[#allocation13_spill] sm:$0xff] %v5383_v1  ;;  %v1120_v55 = vsel %vm765_vm8, %v5411_v8, 0.0  ;;  %v1703_v49 = vmul.f32 %v5383_v1, %v5383_v1  ;;  %v1183_v34 = vmul.f32 %v5411_v8, %v5411_v8 }
 0x185   : > { %v5362_v29 = vadd.f32 %v1077_v24, %v1028_v31  ;;  %9125 = vst [vmem:[#allocation16_spill] sm:$0xff] %v5411_v8 }
 0x186   : > { %1735 = vrot.lane.b32.xlu1 %v1701_v41, %s4642_s9  ;;  %v1207_v22 = vsel %vm765_vm8, %v1183_v34, 0.0 }
 0x187   : > { %v5369_v0 = vadd.f32 %v5267_v2, %v5362_v29  ;;  %v5389_v53 = vadd.f32 %v5265_v63, %v5362_v29  ;;  %v1062_v7 = vpop.f32.mrf.mxu1 }
 0x188   : > { %v5415_v20 = vadd.f32 %v1062_v7, %v1013_v56 }
 0x189   : > { %9121 = vst [vmem:[#allocation12_spill] sm:$0xff] %v5369_v0  ;;  %v1710_v38 = vmul.f32 %v5369_v0, %v5369_v0  ;;  %v1190_v47 = vmul.f32 %v5389_v53, %v5389_v53  ;;  %v1141_v40 = vsel %vm765_vm8, %v5389_v53, 0.0 }
 0x18a   : > { %9123 = vst [vmem:[#allocation14_spill] sm:$0xff] %v5389_v53  ;;  %v5419_v5 = vadd.f32 %v5267_v2, %v5415_v20  ;;  %v5438_v33 = vadd.f32 %v5265_v63, %v5415_v20 }
 0x18b   : > { %v1228_v43 = vsel %vm765_vm8, %v1190_v47, 0.0 }
 0x18c   : > { %v1080_v58 = vpop.f32.mrf.mxu3  ;;  %9126 = vst [vmem:[#allocation17_spill] sm:$0xff] %v5419_v5  ;;  %v1704_v21 = vmul.f32 %v5419_v5, %v5419_v5 }
 0x18d   : > { %v5397_v61 = vadd.f32 %v1080_v58, %v1031_v15  ;;  %9128 = vst [vmem:[#allocation19_spill] sm:$0xff] %v5438_v33  ;;  %v1123_v58 = vsel %vm765_vm8, %v5438_v33, 0.0 }
 0x18e   : > { %1607 = vrot.lane.b32.xlu1 %v5325_v14, %s4642_s9 }
 0x18f   : > { %v5403_v30 = vadd.f32 %v5265_v63, %v5397_v61  ;;  %v5427_v11 = vadd.f32 %v5267_v2, %v5397_v61  ;;  %v1065_v12 = vpop.f32.mrf.mxu1 }
 0x191   : > { %9124 = vst [vmem:[#allocation15_spill] sm:$0xff] %v5403_v30  ;;  %v1144_v26 = vsel %vm765_vm8, %v5403_v30, 0.0  ;;  %v1711_v41 = vmul.f32 %v5427_v11, %v5427_v11  ;;  %v1191_v13 = vmul.f32 %v5403_v30, %v5403_v30 }
 0x192   : > { %9127 = vst [vmem:[#allocation18_spill] sm:$0xff] %v5427_v11 }
 0x194   : > { %v1082_v31 = vpop.f32.mrf.mxu3 }
 0x195   : > { %v5461_v4 = vadd.f32 %v1082_v31, %v1033_v32 }
 0x197   : > { %v5482_v15 = vadd.f32 %v5265_v63, %v5461_v4 }
 0x199   : > { %9132 = vst [vmem:[#allocation23_spill] sm:$0xff] %v5482_v15 }
 0x19e   : > { %1115 = vadd.xlane.f32.xlu0 %v1114_v10  ;;  %v1184_v10 = vmul.f32 %v5438_v33, %v5438_v33 }
 0x1a0   : > { %v1210_v59 = vsel %vm765_vm8, %v1184_v10, 0.0 }
 0x1a6   : > { %1202 = vadd.xlane.f32.xlu0 %v1201_v25  ;;  %1199 = vadd.xlane.f32.xlu2 %v1198_v28  ;;  %v1016_v25 = vpop.f32.mrf.mxu0 }
 0x1a7   : > { %v5445_v28 = vadd.f32 %v1065_v12, %v1016_v25 }
 0x1b8   : > { %1139 = vadd.xlane.f32.xlu1 %v1138_v36  ;;  %v1231_v36 = vsel %vm765_vm8, %v1191_v13, 0.0 }
 0x1ba   : > { %1737 = vrot.lane.b32.xlu0 %v1702_v57, %s4642_s9  ;;  %v5453_v57 = vadd.f32 %v5265_v63, %v5445_v28 }
 0x1bc   : > { %9129 = vst [vmem:[#allocation20_spill] sm:$0xff] %v5453_v57  ;;  %v1126_v24 = vsel %vm765_vm8, %v5453_v57, 0.0  ;;  %v1185_v32 = vmul.f32 %v5453_v57, %v5453_v57 }
 0x1be   : > { %1593 = vrot.lane.b32.xlu2 %v5349_v45, %s4642_s9 }
 0x1c0   : > { %1205 = vadd.xlane.f32.xlu1 %v1204_v37  ;;  %v1085_v37 = vpop.f32.mrf.mxu3 }
 0x1c2   : > { %1609 = vrot.lane.b32.xlu0 %v5369_v0, %s4642_s9 }
 0x1c6   : > { %1751 = vrot.lane.b32.xlu2 %v1709_v3, %s4642_s9  ;;  %v1036_v3 = vpop.f32.mrf.mxu2 }
 0x1ca   : > { %1753 = vrot.lane.b32.xlu0 %v1710_v38, %s4642_s9  ;;  %v5457_v38 = vadd.f32 %v1085_v37, %v1036_v3 }
 0x1cc   : > { %v5465_v46 = vadd.f32 %v5267_v2, %v5457_v38  ;;  %v5486_v60 = vadd.f32 %v5265_v63, %v5457_v38 }
 0x1ce   : > { %9130 = vst [vmem:[#allocation21_spill] sm:$0xff] %v5465_v46  ;;  %v1713_v47 = vmul.f32 %v5465_v46, %v5465_v46 }
 0x1cf   : > { %9133 = vst [vmem:[#allocation24_spill] sm:$0xff] %v5486_v60 }
 0x1d0   : > { %v5512_v12 = vpop.xlane.xlu1 %1109 }
 0x1d8   : > { %v5522_v13 = vpop.xlane.xlu1 %1196 }
 0x1d9   : > { %1595 = vrot.lane.b32.xlu1 %v5383_v1, %s4642_s9 }
 0x1ef   : > { %1118 = vadd.xlane.f32.xlu2 %v1117_v54  ;;  %v5469_v54 = vadd.f32 %v5267_v2, %v5461_v4 }
 0x1f1   : > { %9131 = vst [vmem:[#allocation22_spill] sm:$0xff] %v5469_v54  ;;  %v1712_v34 = vmul.f32 %v5469_v54, %v5469_v54 }
 0x1f4   : > { %1229 = vadd.xlane.f32.xlu0 %v1228_v43  ;;  %v1147_v43 = vsel %vm765_vm8, %v5482_v15, 0.0 }
 0x1f7   : > { %1226 = vadd.xlane.f32.xlu2 %v1225_v16  ;;  %v1193_v16 = vmul.f32 %v5486_v60, %v5486_v60 }
 0x1f9   : > { %v1237_v7 = vsel %vm765_vm8, %v1193_v16, 0.0 }
 0x1fc   : > { %1145 = vadd.xlane.f32.xlu0 %v1144_v26  ;;  %v1087_v26 = vpop.f32.mrf.mxu3 }
 0x1ff   : > { %1142 = vadd.xlane.f32.xlu2 %v1141_v40  ;;  %v1038_v40 = vpop.f32.mrf.mxu2 }
 0x203   : > { %1121 = vadd.xlane.f32.xlu1 %v1120_v55  ;;  %v5492_v55 = vadd.f32 %v1087_v26, %v1038_v40  ;;  %v5545_v26 = vpop.xlane.xlu2 %1112 }
 0x205   : > { %v5497_v56 = vadd.f32 %v5265_v63, %v5492_v55 }
 0x207   : > { %9134 = vst [vmem:[#allocation25_spill] sm:$0xff] %v5497_v56 }
 0x210   : > { %1597 = vrot.lane.b32.xlu0 %v5419_v5, %s4642_s9 }
 0x217   : > { %1739 = vrot.lane.b32.xlu2 %v1703_v49, %s4642_s9  ;;  %v1153_v49 = vsel %vm765_vm8, %v5497_v56, 0.0 }
 0x218   : > { %1741 = vrot.lane.b32.xlu0 %v1704_v21, %s4642_s9  ;;  %v5503_v21 = vadd.f32 %v5267_v2, %v5445_v28 }
 0x21a   : > { %9135 = vst [vmem:[#allocation26_spill] sm:$0xff] %v5503_v21  ;;  %v1705_v10 = vmul.f32 %v5503_v21, %v5503_v21 }
 0x21c   : > { %1755 = vrot.lane.b32.xlu1 %v1711_v41, %s4642_s9  ;;  %v1067_v41 = vpop.f32.mrf.mxu1 }
 0x240   : > { %1208 = vadd.xlane.f32.xlu2 %v1207_v22  ;;  %v1070_v22 = vpop.f32.mrf.mxu1 }
 0x241   : > { %v5516_v25 = vadd.f32 %v1070_v22, %v5305_v51  ;;  %v1192_v51 = vmul.f32 %v5482_v15, %v5482_v15  ;;  %v1018_v22 = vpop.f32.mrf.mxu0 }
 0x242   : > { %1211 = vadd.xlane.f32.xlu0 %v1210_v59 }
 0x243   : > { %v5520_v59 = vadd.f32 %v5267_v2, %v5516_v25  ;;  %v1234_v3 = vsel %vm765_vm8, %v1192_v51, 0.0  ;;  %v5543_v16 = vadd.f32 %v5265_v63, %v5516_v25  ;;  %v5557_v51 = vpop.permute.xlu2 %1733 }
 0x244   : > { %v1782_v23 = vsel %vm765_vm8, %v5557_v51, 0.0 }
 0x245   : > { %9136 = vst [vmem:[#allocation27_spill] sm:$0xff] %v5520_v59  ;;  %v1187_v40 = vmul.f32 %v5543_v16, %v5543_v16  ;;  %v1132_v15 = vsel %vm765_vm8, %v5543_v16, 0.0 }
 0x246   : > { %1232 = vadd.xlane.f32.xlu1 %v1231_v36  ;;  %v1707_v36 = vmul.f32 %v5520_v59, %v5520_v59  ;;  %9137 = vst [vmem:[#allocation28_spill] sm:$0xff] %v5543_v16 }
 0x24a   : > { %1127 = vadd.xlane.f32.xlu0 %v1126_v24  ;;  %v1590_v24 = vpop.permute.xlu1 %1589 }
 0x252   : > { %v5529_v31 = vpop.permute.xlu1 %1735 }
 0x258   : > { %1611 = vrot.lane.b32.xlu2 %v5427_v11, %s4642_s9 }
 0x25a   : > { %v1608_v37 = vpop.permute.xlu1 %1607 }
 0x25e   : > { %1615 = vrot.lane.b32.xlu0 %v5465_v46, %s4642_s9  ;;  %v1665_v46 = vsel %vm765_vm8, %v1608_v37, 0.0 }
 0x25f   : > { %1613 = vrot.lane.b32.xlu1 %v5469_v54, %s4642_s9 }
 0x266   : > { %1759 = vrot.lane.b32.xlu0 %v1713_v47, %s4642_s9  ;;  %v1213_v47 = vsel %vm765_vm8, %v1185_v32, 0.0 }
 0x281   : > { %1124 = vadd.xlane.f32.xlu2 %v1123_v58  ;;  %v5537_v58 = vpop.xlane.xlu1 %1139 }
 0x289   : > { %1148 = vadd.xlane.f32.xlu1 %v1147_v43  ;;  %v1150_v43 = vsel %vm765_vm8, %v5486_v60, 0.0 }
 0x290   : > { %1238 = vadd.xlane.f32.xlu0 %v1237_v7  ;;  %v1072_v7 = vpop.f32.mrf.mxu1 }
 0x298   : > { %1154 = vadd.xlane.f32.xlu0 %v1153_v49  ;;  %v5549_v49 = vpop.xlane.xlu1 %1205 }
 0x299   : > { %1599 = vrot.lane.b32.xlu2 %v5503_v21, %s4642_s9 }
 0x2a1   : > { %1757 = vrot.lane.b32.xlu2 %v1712_v34, %s4642_s9  ;;  %v5552_v34 = vadd.f32 %v1072_v7, %v5316_v52  ;;  %v1638_v7 = vsel %vm765_vm8, %v1590_v24, 0.0 }
 0x2a2   : > { %1743 = vrot.lane.b32.xlu1 %v1705_v10, %s4642_s9  ;;  %v1219_v10 = vsel %vm765_vm8, %v1187_v40, 0.0 }
 0x2a3   : > { %v5561_v32 = vadd.f32 %v5265_v63, %v5552_v34 }
 0x2a5   : > { %9138 = vst [vmem:[#allocation29_spill] sm:$0xff] %v5561_v32  ;;  %v1135_v52 = vsel %vm765_vm8, %v5561_v32, 0.0 }
 0x2ac   : > { %1603 = vrot.lane.b32.xlu0 %v5520_v59, %s4642_s9 }
 0x2b4   : > { %1747 = vrot.lane.b32.xlu0 %v1707_v36, %s4642_s9  ;;  %v5555_v36 = vadd.f32 %v1067_v41, %v1018_v22 }
 0x2b6   : > { %v5592_v24 = vadd.f32 %v5265_v63, %v5555_v36 }
 0x2b8   : > { %9140 = vst [vmem:[#allocation31_spill] sm:$0xff] %v5592_v24  ;;  %v1129_v37 = vsel %vm765_vm8, %v5592_v24, 0.0 }
 0x2ca   : > { %1235 = vadd.xlane.f32.xlu2 %v1234_v3  ;;  %v1596_v3 = vpop.permute.xlu1 %1595 }
 0x2cb   : > { %v1647_v21 = vsel %vm765_vm8, %v1596_v3, 0.0  ;;  %v1588_v3 = vpop.permute.xlu0 %1587 }
 0x2cc   : > { %1214 = vadd.xlane.f32.xlu1 %v1213_v47  ;;  %v5565_v47 = vadd.f32 %v5267_v2, %v5555_v36 }
 0x2ce   : > { %9139 = vst [vmem:[#allocation30_spill] sm:$0xff] %v5565_v47  ;;  %v1706_v41 = vmul.f32 %v5565_v47, %v5565_v47 }
 0x2d2   : > { %1151 = vadd.xlane.f32.xlu2 %v1150_v43  ;;  %v5573_v43 = vpop.xlane.xlu2 %1199  ;;  %v5575_v40 = vpop.xlane.xlu1 %1121 }
 0x2d3   : > { %v5607_v63 = vpop.permute.xlu0 %1731 }
 0x2da   : > { %v5581_v22 = vpop.permute.xlu2 %1593 }
 0x2db   : > { %v1592_v6 = vpop.permute.xlu0 %1591 }
 0x2de   : > { %1220 = vadd.xlane.f32.xlu0 %v1219_v10  ;;  %v5579_v10 = vpop.permute.xlu1 %1755 }
 0x2e2   : > { %v1752_v59 = vpop.permute.xlu2 %1751 }
 0x2e5   : > { %1601 = vrot.lane.b32.xlu1 %v5565_v47, %s4642_s9 }
 0x2e6   : > { %1136 = vadd.xlane.f32.xlu0 %v1135_v52  ;;  %v5584_v52 = vpop.xlane.xlu1 %1232 }
 0x2ea   : > { %1745 = vrot.lane.b32.xlu2 %v1706_v41, %s4642_s9  ;;  %v5587_v5 = vpop.xlane.xlu2 %1118 }
 0x2ee   : > { %1639 = vadd.xlane.f32.xlu0 %v1638_v7  ;;  %v1614_v11 = vpop.permute.xlu1 %1613 }
 0x2ef   : > { %v1674_v41 = vsel %vm765_vm8, %v1614_v11, 0.0  ;;  %v5605_v11 = vadd.f32 %v5267_v2, %v5492_v55 }
 0x2f1   : > { %9141 = vst [vmem:[#allocation32_spill] sm:$0xff] %v5605_v11  ;;  %v1714_v0 = vmul.f32 %v5605_v11, %v5605_v11 }
 0x2f2   : > { %v5598_v7 = vpop.xlane.xlu2 %1226 }
 0x2f6   : > { %1666 = vadd.xlane.f32.xlu0 %v1665_v46  ;;  %v1186_v46 = vmul.f32 %v5592_v24, %v5592_v24 }
 0x2fa   : > { %v5601_v45 = vpop.xlane.xlu2 %1142 }
 0x2fc   : > { %v5622_v54 = vpop.xlane.xlu1 %1148 }
 0x2fe   : > { %1648 = vadd.xlane.f32.xlu0 %v1647_v21  ;;  %v1216_v21 = vsel %vm765_vm8, %v1186_v46, 0.0  ;;  %v5616_v46 = vpop.xlane.xlu0 %1115 }
 0x306   : > { %1675 = vadd.xlane.f32.xlu0 %v1674_v41  ;;  %v1740_v41 = vpop.permute.xlu2 %1739  ;;  %v5618_v19 = vpop.xlane.xlu0 %1202 }
 0x30e   : > { %v5624_v1 = vpop.permute.xlu0 %1737 }
 0x30f   : > { %1130 = vadd.xlane.f32.xlu1 %v1129_v37  ;;  %v5612_v37 = vpop.xlane.xlu2 %1208 }
 0x313   : > { %1217 = vadd.xlane.f32.xlu2 %v1216_v21 }
 0x314   : > { %v5626_v17 = vpop.permute.xlu1 %1743 }
 0x316   : > { %v1610_v24 = vpop.permute.xlu0 %1609 }
 0x317   : > { %v1612_v21 = vpop.permute.xlu2 %1611 }
 0x31e   : > { %v5635_v8 = vpop.permute.xlu0 %1753 }
 0x31f   : > { %v5620_v47 = vpop.xlane.xlu2 %1124 }
 0x327   : > { %v1600_v14 = vpop.permute.xlu2 %1599 }
 0x328   : > { %1761 = vrot.lane.b32.xlu1 %v1714_v0, %s4642_s9  ;;  %v1194_v0 = vmul.f32 %v5497_v56, %v5497_v56  ;;  %v5640_v56 = vpop.xlane.xlu0 %1229 }
 0x32a   : > { %v1240_v57 = vsel %vm765_vm8, %v1194_v0, 0.0 }
 0x32b   : > { %1617 = vrot.lane.b32.xlu2 %v5605_v11, %s4642_s9 }
 0x32f   : > { %v1758_v11 = vpop.permute.xlu2 %1757 }
 0x330   : > { %v5653_v16 = vpop.xlane.xlu0 %1145 }
 0x338   : > { %v1598_v51 = vpop.permute.xlu0 %1597 }
 0x33d   : > { %v5638_v53 = vpop.xlane.xlu2 %1235 }
 0x33f   : > { %v5630_v60 = vpop.xlane.xlu1 %1214 }
 0x345   : > { %v5644_v0 = vpop.xlane.xlu2 %1151 }
 0x346   : > { %9142 = vst [vmem:[#allocation33_spill] sm:$0xff] %v5644_v0 }
 0x352   : > { %1241 = vadd.xlane.f32.xlu1 %v1240_v57  ;;  %v5648_v57 = vadd.f32 %v5267_v2, %v5552_v34  ;;  %v1809_v2 = vsel %vm765_vm8, %v1752_v59, 0.0  ;;  %v1641_v59 = vsel %vm765_vm8, %v1592_v6, 0.0  ;;  %v1671_v6 = vsel %vm765_vm8, %v1612_v21, 0.0 }
 0x354   : > { %1133 = vadd.xlane.f32.xlu2 %v1132_v15  ;;  %9143 = vst [vmem:[#allocation34_spill] sm:$0xff] %v5648_v57  ;;  %v1791_v15 = vsel %vm765_vm8, %v1740_v41, 0.0  ;;  %v1742_v41 = vpop.permute.xlu0 %1741 }
 0x357   : > { %v1602_v33 = vpop.permute.xlu1 %1601 }
 0x358   : > { %v1656_v30 = vsel %vm765_vm8, %v1602_v33, 0.0  ;;  %v1708_v33 = vmul.f32 %v5648_v57, %v5648_v57 }
 0x359   : > { %1657 = vadd.xlane.f32.xlu0 %v1656_v30 }
 0x35c   : > { %v5661_v35 = vpop.xlane.xlu0 %1211 }
 0x361   : > { %1783 = vadd.xlane.f32.xlu0 %v1782_v23  ;;  %v1746_v23 = vpop.permute.xlu2 %1745 }
 0x362   : > { %v1800_v30 = vsel %vm765_vm8, %v1746_v23, 0.0  ;;  %v5670_v23 = vld [vmem:[%s8918_s2 + $0x3] ss:$0 sm:$0xff] }
 0x364   : > { %v5663_v0 = vpop.xlane.xlu0 %1127 }
 0x369   : > { %1792 = vadd.xlane.f32.xlu0 %v1791_v15  ;;  %v1818_v15 = vsel %vm765_vm8, %v1758_v11, 0.0 }
 0x36b   : > { %1749 = vrot.lane.b32.xlu1 %v1708_v33, %s4642_s9  ;;  %v1188_v33 = vmul.f32 %v5561_v32, %v5561_v32  ;;  %v1644_v32 = vsel %vm765_vm8, %v5581_v22, 0.0 }
 0x36c   : > { %1605 = vrot.lane.b32.xlu2 %v5648_v57, %s4642_s9  ;;  %v1616_v11 = vpop.permute.xlu0 %1615 }
 0x371   : > { %1801 = vadd.xlane.f32.xlu0 %v1800_v30  ;;  %v1222_v30 = vsel %vm765_vm8, %v1188_v33, 0.0  ;;  %v1650_v33 = vsel %vm765_vm8, %v1598_v51, 0.0  ;;  %v1785_v51 = vsel %vm765_vm8, %v5529_v31, 0.0  ;;  %v1797_v31 = vsel %vm765_vm8, %v5626_v17, 0.0 }
 0x372   : > { %v1815_v17 = vsel %vm765_vm8, %v5579_v10, 0.0  ;;  %v5723_v10 = vld [vmem:[%s8918_s2 + $0x4] ss:$0 sm:$0xff] }
 0x374   : > { %v1760_v57 = vpop.permute.xlu0 %1759 }
 0x379   : > { %1810 = vadd.xlane.f32.xlu0 %v1809_v2  ;;  %v1635_v2 = vsel %vm765_vm8, %v1588_v3, 0.0 }
 0x381   : > { %1819 = vadd.xlane.f32.xlu0 %v1818_v15  ;;  %v1668_v15 = vsel %vm765_vm8, %v1610_v24, 0.0  ;;  %v1653_v24 = vsel %vm765_vm8, %v1600_v14, 0.0  ;;  %v1788_v14 = vsel %vm765_vm8, %v5624_v1, 0.0 }
 0x395   : > { %1223 = vadd.xlane.f32.xlu1 %v1222_v30  ;;  %2084 = vrot.lane.b32.xlu0 %v5670_v23, %s4641_s8  ;;  %v5681_v30 = vpop.xlane.xlu0 %1238 }
 0x396   : > { %1642 = vadd.xlane.f32.xlu2 %v1641_v59  ;;  %v1677_v59 = vsel %vm765_vm8, %v1616_v11, 0.0 }
 0x39d   : > { %1636 = vadd.xlane.f32.xlu1 %v1635_v2  ;;  %v5685_v3 = vpop.xlane.xlu0 %1154  ;;  %v5688_v2 = vpop.xlane.xlu2 %1217 }
 0x39e   : > { %1669 = vadd.xlane.f32.xlu2 %v1668_v15 }
 0x3a5   : > { %1645 = vadd.xlane.f32.xlu1 %v1644_v32  ;;  %v1779_v32 = vsel %vm765_vm8, %v5607_v63, 0.0  ;;  %v1604_v22 = vpop.permute.xlu0 %1603  ;;  %v1618_v11 = vpop.permute.xlu2 %1617 }
 0x3a6   : > { %1651 = vadd.xlane.f32.xlu2 %v1650_v33  ;;  %v1659_v21 = vsel %vm765_vm8, %v1604_v22, 0.0  ;;  %v1680_v15 = vsel %vm765_vm8, %v1618_v11, 0.0  ;;  %v5696_v33 = vpop.xlane.xlu1 %1130  ;;  %v1794_v22 = vsel %vm765_vm8, %v1742_v41, 0.0  ;;  %v1821_v41 = vsel %vm765_vm8, %v1760_v57, 0.0 }
 0x3ad   : > { %1672 = vadd.xlane.f32.xlu1 %v1671_v6 }
 0x3ae   : > { %1678 = vadd.xlane.f32.xlu2 %v1677_v59  ;;  %v1762_v6 = vpop.permute.xlu1 %1761 }
 0x3b5   : > { %1654 = vadd.xlane.f32.xlu1 %v1653_v24 }
 0x3b6   : > { %1780 = vadd.xlane.f32.xlu2 %v1779_v32 }
 0x3bd   : > { %1786 = vadd.xlane.f32.xlu1 %v1785_v51  ;;  %v1748_v51 = vpop.permute.xlu0 %1747 }
 0x3be   : > { %1660 = vadd.xlane.f32.xlu2 %v1659_v21  ;;  %v1803_v11 = vsel %vm765_vm8, %v1748_v51, 0.0 }
 0x3c5   : > { %1681 = vadd.xlane.f32.xlu1 %v1680_v15  ;;  %v5705_v32 = vpop.xlane.xlu1 %1241  ;;  %v1812_v15 = vsel %vm765_vm8, %v5635_v8, 0.0 }
 0x3c6   : > { %1789 = vadd.xlane.f32.xlu2 %v1788_v14  ;;  %v1824_v14 = vsel %vm765_vm8, %v1762_v6, 0.0 }
 0x3c7   : > { %v5700_v63 = vpop.xlane.xlu2 %1133 }
 0x3ce   : > { %1798 = vadd.xlane.f32.xlu2 %v1797_v31  ;;  %v4296_v31 = vld [vmem:[%s8918_s2 + $0x2] ss:$0 sm:$0xff] }
 0x3cf   : > { %v1606_v59 = vpop.permute.xlu2 %1605 }
 0x3d0   : > { %v1662_v24 = vsel %vm765_vm8, %v1606_v59, 0.0 }
 0x3d1   : > { %1663 = vadd.xlane.f32.xlu1 %v1662_v24 }
 0x3d9   : > { %1795 = vadd.xlane.f32.xlu1 %v1794_v22 }
 0x3dd   : > { %v1750_v21 = vpop.permute.xlu1 %1749 }
 0x3de   : > { %v1806_v1 = vsel %vm765_vm8, %v1750_v21, 0.0 }
 0x3df   : > { %1807 = vadd.xlane.f32.xlu2 %v1806_v1 }
 0x3e1   : > { %1804 = vadd.xlane.f32.xlu1 %v1803_v11 }
 0x3e7   : > { %1816 = vadd.xlane.f32.xlu2 %v1815_v17 }
 0x3e9   : > { %1813 = vadd.xlane.f32.xlu1 %v1812_v15  ;;  %v5749_v15 = vpop.xlane.xlu0 %1220 }
 0x3ef   : > { %1825 = vadd.xlane.f32.xlu2 %v1824_v14 }
 0x3f1   : > { %1822 = vadd.xlane.f32.xlu1 %v1821_v41 }
 0x407   : > { %2142 = vrot.lane.b32.xlu2 %v4296_v31, %s4640_s7 }
 0x408   : > { %v5751_v14 = vpop.xlane.xlu1 %1223 }
 0x409   : > { %v5725_v59 = vpop.xlane.xlu2 %1642  ;;  %9155 = vst [vmem:[#allocation46_spill] sm:$0xff] %v5751_v14 }
 0x40a   : > { %9144 = vst [vmem:[#allocation35_spill] sm:$0xff] %v5725_v59  ;;  %2104 = vrot.lane.b32.xlu1 %v5723_v10, %s4641_s8 }
 0x411   : > { %v5729_v8 = vpop.xlane.xlu2 %1669 }
 0x412   : > { %9145 = vst [vmem:[#allocation36_spill] sm:$0xff] %v5729_v8 }
 0x419   : > { %v5731_v57 = vpop.xlane.xlu2 %1651 }
 0x41a   : > { %9146 = vst [vmem:[#allocation37_spill] sm:$0xff] %v5731_v57 }
 0x421   : > { %v5733_v6 = vpop.xlane.xlu2 %1678 }
 0x422   : > { %9147 = vst [vmem:[#allocation38_spill] sm:$0xff] %v5733_v6 }
 0x429   : > { %v5735_v24 = vpop.xlane.xlu2 %1780 }
 0x42a   : > { %9148 = vst [vmem:[#allocation39_spill] sm:$0xff] %v5735_v24 }
 0x431   : > { %v5737_v22 = vpop.xlane.xlu2 %1660 }
 0x432   : > { %9149 = vst [vmem:[#allocation40_spill] sm:$0xff] %v5737_v22 }
 0x439   : > { %v5739_v51 = vpop.xlane.xlu2 %1789 }
 0x43a   : > { %9150 = vst [vmem:[#allocation41_spill] sm:$0xff] %v5739_v51 }
 0x441   : > { %v5741_v21 = vpop.xlane.xlu2 %1798 }
 0x442   : > { %9151 = vst [vmem:[#allocation42_spill] sm:$0xff] %v5741_v21 }
 0x452   : > { %v5743_v1 = vpop.xlane.xlu2 %1807 }
 0x453   : > { %9152 = vst [vmem:[#allocation43_spill] sm:$0xff] %v5743_v1 }
 0x45a   : > { %v5745_v11 = vpop.xlane.xlu2 %1816 }
 0x45b   : > { %9153 = vst [vmem:[#allocation44_spill] sm:$0xff] %v5745_v11  ;;  %v5764_v11 = vpop.xlane.xlu0 %1136 }
 0x45c   : > { %9159 = vst [vmem:[#allocation50_spill] sm:$0xff] %v5764_v11 }
 0x462   : > { %v5747_v17 = vpop.xlane.xlu2 %1825 }
 0x463   : > { %9154 = vst [vmem:[#allocation45_spill] sm:$0xff] %v5747_v17  ;;  %v5766_v17 = vpop.xlane.xlu1 %1636  ;;  %v5787_v1 = vpop.xlane.xlu0 %1639 }
 0x464   : > { %9160 = vst [vmem:[#allocation51_spill] sm:$0xff] %v5766_v17 }
 0x465   : > { %9164 = vst [vmem:[#allocation55_spill] sm:$0xff] %v5787_v1 }
 0x46a   : > { %v2143_v41 = vpop.permute.xlu2 %2142 }
 0x46b   : > { %v5754_v31 = vadd.f32 %v2143_v41, %v5341_v18  ;;  %v5757_v6 = vadd.f32 %v2143_v41, %v5269_v27  ;;  %v5760_v22 = vadd.f32 %v2143_v41, %v5283_v44  ;;  %v5773_v18 = vadd.f32 %v2143_v41, %v5445_v28  ;;  %v5789_v21 = vpop.xlane.xlu1 %1645  ;;  %v5806_v8 = vpop.xlane.xlu0 %1666 }
 0x46c   : > { %v5776_v27 = vadd.f32 %v2143_v41, %v5297_v50  ;;  %v5779_v44 = vadd.f32 %v2143_v41, %v5379_v62  ;;  %9165 = vst [vmem:[#allocation56_spill] sm:$0xff] %v5789_v21  ;;  %v5792_v28 = vadd.f32 %v2143_v41, %v5552_v34  ;;  %v5795_v50 = vadd.f32 %v2143_v41, %v5415_v20 }
 0x46d   : > { %9156 = vst [vmem:[#allocation47_spill] sm:$0xff] %v5754_v31  ;;  %2183 = vrot.lane.b32.xlu2 %v5754_v31, %s4640_s7  ;;  %2177 = vrot.lane.b32.xlu0 %v5757_v6, %s4640_s7  ;;  %v5798_v62 = vadd.f32 %v2143_v41, %v5555_v36  ;;  %v5811_v34 = vadd.f32 %v2143_v41, %v5397_v61 }
 0x46e   : > { %9157 = vst [vmem:[#allocation48_spill] sm:$0xff] %v5757_v6  ;;  %2179 = vrot.lane.b32.xlu1 %v5760_v22, %s4640_s7  ;;  %v5814_v20 = vadd.f32 %v2143_v41, %v5516_v25  ;;  %v5817_v36 = vadd.f32 %v2143_v41, %v5321_v42  ;;  %v5833_v25 = vadd.f32 %v2143_v41, %v5362_v29 }
 0x46f   : > { %9158 = vst [vmem:[#allocation49_spill] sm:$0xff] %v5760_v22  ;;  %v5836_v42 = vadd.f32 %v2143_v41, %v5461_v4 }
 0x470   : > { %9161 = vst [vmem:[#allocation52_spill] sm:$0xff] %v5773_v18 }
 0x471   : > { %9162 = vst [vmem:[#allocation53_spill] sm:$0xff] %v5776_v27 }
 0x472   : > { %9163 = vst [vmem:[#allocation54_spill] sm:$0xff] %v5779_v44 }
 0x473   : > { %9166 = vst [vmem:[#allocation57_spill] sm:$0xff] %v5792_v28  ;;  %v5808_v57 = vpop.xlane.xlu1 %1672  ;;  %v5828_v61 = vpop.xlane.xlu0 %1648 }
 0x474   : > { %9167 = vst [vmem:[#allocation58_spill] sm:$0xff] %v5795_v50 }
 0x475   : > { %2189 = vrot.lane.b32.xlu2 %v5773_v18, %s4640_s7  ;;  %2181 = vrot.lane.b32.xlu0 %v5776_v27, %s4640_s7  ;;  %9168 = vst [vmem:[#allocation59_spill] sm:$0xff] %v5798_v62 }
 0x476   : > { %2185 = vrot.lane.b32.xlu1 %v5779_v44, %s4640_s7  ;;  %9169 = vst [vmem:[#allocation60_spill] sm:$0xff] %v5806_v8 }
 0x477   : > { %9170 = vst [vmem:[#allocation61_spill] sm:$0xff] %v5808_v57  ;;  %v5826_v57 = vadd.f32 %v2143_v41, %v5492_v55  ;;  %v5845_v55 = vadd.f32 %v2143_v41, %v5457_v38 }
 0x478   : > { %9171 = vst [vmem:[#allocation62_spill] sm:$0xff] %v5811_v34 }
 0x479   : > { %9172 = vst [vmem:[#allocation63_spill] sm:$0xff] %v5814_v20 }
 0x47a   : > { %9173 = vst [vmem:[#allocation64_spill] sm:$0xff] %v5817_v36 }
 0x47b   : > { %9174 = vst [vmem:[#allocation65_spill] sm:$0xff] %v5826_v57  ;;  %v5830_v51 = vpop.xlane.xlu1 %1654  ;;  %v5847_v24 = vpop.xlane.xlu0 %1675 }
 0x47c   : > { %9175 = vst [vmem:[#allocation66_spill] sm:$0xff] %v5828_v61 }
 0x47d   : > { %2195 = vrot.lane.b32.xlu2 %v5792_v28, %s4640_s7  ;;  %2187 = vrot.lane.b32.xlu0 %v5795_v50, %s4640_s7  ;;  %9176 = vst [vmem:[#allocation67_spill] sm:$0xff] %v5830_v51 }
 0x47e   : > { %2191 = vrot.lane.b32.xlu1 %v5798_v62, %s4640_s7  ;;  %9177 = vst [vmem:[#allocation68_spill] sm:$0xff] %v5833_v25 }
 0x47f   : > { %9178 = vst [vmem:[#allocation69_spill] sm:$0xff] %v5836_v42 }
 0x480   : > { %9179 = vst [vmem:[#allocation70_spill] sm:$0xff] %v5845_v55 }
 0x481   : > { %9180 = vst [vmem:[#allocation71_spill] sm:$0xff] %v5847_v24 }
 0x483   : > { %v5849_v51 = vpop.xlane.xlu1 %1786  ;;  %v5853_v29 = vpop.xlane.xlu0 %1657 }
 0x484   : > { %9181 = vst [vmem:[#allocation72_spill] sm:$0xff] %v5849_v51 }
 0x485   : > { %2201 = vrot.lane.b32.xlu2 %v5811_v34, %s4640_s7  ;;  %2193 = vrot.lane.b32.xlu0 %v5814_v20, %s4640_s7  ;;  %9182 = vst [vmem:[#allocation73_spill] sm:$0xff] %v5853_v29 }
 0x486   : > { %2197 = vrot.lane.b32.xlu1 %v5817_v36, %s4640_s7 }
 0x48b   : > { %v5855_v4 = vpop.xlane.xlu1 %1681  ;;  %v5857_v21 = vpop.xlane.xlu0 %1783 }
 0x48c   : > { %9183 = vst [vmem:[#allocation74_spill] sm:$0xff] %v5855_v4 }
 0x48d   : > { %2207 = vrot.lane.b32.xlu2 %v5826_v57, %s4640_s7  ;;  %2199 = vrot.lane.b32.xlu0 %v5833_v25, %s4640_s7  ;;  %9184 = vst [vmem:[#allocation75_spill] sm:$0xff] %v5857_v21 }
 0x48e   : > { %2203 = vrot.lane.b32.xlu1 %v5836_v42, %s4640_s7 }
 0x493   : > { %v5859_v59 = vpop.xlane.xlu1 %1663  ;;  %v5861_v17 = vpop.xlane.xlu0 %1792 }
 0x494   : > { %9185 = vst [vmem:[#allocation76_spill] sm:$0xff] %v5859_v59 }
 0x495   : > { %2205 = vrot.lane.b32.xlu0 %v5845_v55, %s4640_s7  ;;  %9186 = vst [vmem:[#allocation77_spill] sm:$0xff] %v5861_v17 }
 0x49b   : > { %v5863_v14 = vpop.xlane.xlu1 %1795  ;;  %v5865_v38 = vpop.xlane.xlu0 %1801 }
 0x49c   : > { %9187 = vst [vmem:[#allocation78_spill] sm:$0xff] %v5863_v14 }
 0x49d   : > { %9188 = vst [vmem:[#allocation79_spill] sm:$0xff] %v5865_v38 }
 0x4a3   : > { %v5867_v41 = vpop.xlane.xlu1 %1804  ;;  %v5869_v51 = vpop.xlane.xlu0 %1810 }
 0x4a4   : > { %9189 = vst [vmem:[#allocation80_spill] sm:$0xff] %v5867_v41 }
 0x4a5   : > { %9190 = vst [vmem:[#allocation81_spill] sm:$0xff] %v5869_v51 }
 0x4ab   : > { %v5871_v24 = vpop.xlane.xlu1 %1813  ;;  %v5873_v8 = vpop.xlane.xlu0 %1819 }
 0x4ac   : > { %9191 = vst [vmem:[#allocation82_spill] sm:$0xff] %v5871_v24 }
 0x4ad   : > { %9192 = vst [vmem:[#allocation83_spill] sm:$0xff] %v5873_v8 }
 0x4b3   : > { %v5875_v29 = vpop.xlane.xlu1 %1822  ;;  %v5877_v4 = vpop.permute.xlu0 %2084 }
 0x4b4   : > { %9193 = vst [vmem:[#allocation84_spill] sm:$0xff] %v5875_v29 }
 0x4b5   : > { %9194 = vst [vmem:[#allocation85_spill] sm:$0xff] %v5877_v4 }
 0x4bb   : > { %v5879_v11 = vpop.permute.xlu1 %2104 }
 0x4bc   : > { %9195 = vst [vmem:[#allocation86_spill] sm:$0xff] %v5879_v11 }
 0x4c7   : > { %v2184_v59 = vpop.permute.xlu2 %2183 }
 0x4c8   : > { %v2234_v29 = vsel %vm765_vm8, %v2184_v59, 0.0 }
 0x4cf   : > { %v2190_v41 = vpop.permute.xlu2 %2189 }
 0x4df   : > { %v2178_v61 = vpop.permute.xlu0 %2177 }
 0x4e0   : > { %v2180_v17 = vpop.permute.xlu1 %2179  ;;  %v2225_v38 = vsel %vm765_vm8, %v2178_v61, 0.0  ;;  %v2243_v61 = vsel %vm765_vm8, %v2190_v41, 0.0 }
 0x4e1   : > { %v2228_v14 = vsel %vm765_vm8, %v2180_v17, 0.0  ;;  %2226 = vadd.xlane.f32.xlu1 %v2225_v38  ;;  %v2196_v38 = vpop.permute.xlu2 %2195 }
 0x4e2   : > { %2229 = vadd.xlane.f32.xlu0 %v2228_v14 }
 0x4e7   : > { %v2182_v24 = vpop.permute.xlu0 %2181 }
 0x4e8   : > { %v2186_v51 = vpop.permute.xlu1 %2185  ;;  %v2231_v4 = vsel %vm765_vm8, %v2182_v24, 0.0 }
 0x4e9   : > { %v2237_v8 = vsel %vm765_vm8, %v2186_v51, 0.0  ;;  %2235 = vadd.xlane.f32.xlu1 %v2234_v29  ;;  %2232 = vadd.xlane.f32.xlu2 %v2231_v4 }
 0x4ea   : > { %2238 = vadd.xlane.f32.xlu0 %v2237_v8  ;;  %v2252_v8 = vsel %vm765_vm8, %v2196_v38, 0.0 }
 0x4ef   : > { %v2188_v21 = vpop.permute.xlu0 %2187 }
 0x4f0   : > { %v2192_v11 = vpop.permute.xlu1 %2191  ;;  %v2240_v14 = vsel %vm765_vm8, %v2188_v21, 0.0 }
 0x4f1   : > { %v2246_v17 = vsel %vm765_vm8, %v2192_v11, 0.0  ;;  %2244 = vadd.xlane.f32.xlu1 %v2243_v61  ;;  %2241 = vadd.xlane.f32.xlu2 %v2240_v14  ;;  %v2202_v11 = vpop.permute.xlu2 %2201 }
 0x4f2   : > { %2247 = vadd.xlane.f32.xlu0 %v2246_v17  ;;  %v2261_v41 = vsel %vm765_vm8, %v2202_v11, 0.0  ;;  %v2291_v11 = vmul.f32 %v5776_v27, %v5776_v27 }
 0x4f7   : > { %v2194_v1 = vpop.permute.xlu0 %2193 }
 0x4f8   : > { %v2198_v51 = vpop.permute.xlu1 %2197  ;;  %v2249_v24 = vsel %vm765_vm8, %v2194_v1, 0.0 }
 0x4f9   : > { %v2255_v59 = vsel %vm765_vm8, %v2198_v51, 0.0  ;;  %2253 = vadd.xlane.f32.xlu1 %v2252_v8  ;;  %2250 = vadd.xlane.f32.xlu2 %v2249_v24  ;;  %v2208_v61 = vpop.permute.xlu2 %2207  ;;  %v2289_v51 = vmul.f32 %v5757_v6, %v5757_v6  ;;  %v4643_v8 = vmov 32.0   ;;  %v2290_v24 = vmul.f32 %v5760_v22, %v5760_v22 }
 0x4fa   : > { %2256 = vadd.xlane.f32.xlu0 %v2255_v59  ;;  %v2270_v38 = vsel %vm765_vm8, %v2208_v61, 0.0  ;;  %v2292_v59 = vmul.f32 %v5754_v31, %v5754_v31  ;;  %4299 = vrcp.f32 %v4643_v8  ;;  %v2300_v8 = vmul.f32 %v5833_v25, %v5833_v25 }
 0x4ff   : > { %v2200_v4 = vpop.permute.xlu0 %2199 }
 0x500   : > { %v2204_v29 = vpop.permute.xlu1 %2203  ;;  %v2258_v17 = vsel %vm765_vm8, %v2200_v4, 0.0  ;;  %v4300_v4 = vpop.eup %4299 }
 0x501   : > { %v2264_v21 = vsel %vm765_vm8, %v2204_v29, 0.0  ;;  %2262 = vadd.xlane.f32.xlu1 %v2261_v41  ;;  %2259 = vadd.xlane.f32.xlu2 %v2258_v17  ;;  %v2294_v29 = vmul.f32 %v5795_v50, %v5795_v50  ;;  %v2293_v41 = vmul.f32 %v5779_v44, %v5779_v44  ;;  %v2295_v17 = vmul.f32 %v5773_v18, %v5773_v18 }
 0x502   : > { %2265 = vadd.xlane.f32.xlu0 %v2264_v21  ;;  %v1157_v21 = vmul.f32 32.0, %v4300_v4  ;;  %vm1161_vm12 = vweird.f32 %v4300_v4 }
 0x504   : > { %v1158_v61 = vsub.f32 1.0, %v1157_v21 }
 0x507   : > { %v2206_v14 = vpop.permute.xlu0 %2205 }
 0x508   : > { %v2267_v1 = vsel %vm765_vm8, %v2206_v14, 0.0  ;;  %v2297_v14 = vmul.f32 %v5814_v20, %v5814_v20 }
 0x509   : > { %2271 = vadd.xlane.f32.xlu1 %v2270_v38  ;;  %2268 = vadd.xlane.f32.xlu2 %v2267_v1  ;;  %v1159_v38 = vmul.f32 %v4300_v4, %v1158_v61  ;;  %v2296_v1 = vmul.f32 %v5798_v62, %v5798_v62 }
 0x516   : > { %2321 = vrot.lane.b32.xlu0 %v2289_v51, %s4640_s7  ;;  %v2298_v51 = vmul.f32 %v5792_v28, %v5792_v28 }
 0x51e   : > { %2327 = vrot.lane.b32.xlu0 %v2292_v59, %s4640_s7  ;;  %v1160_v59 = vadd.f32 %v4300_v4, %v1159_v38 }
 0x521   : > { %2323 = vrot.lane.b32.xlu2 %v2290_v24, %s4640_s7  ;;  %v5930_v24 = vsel %vm1161_vm12, %v4300_v4, %v1160_v59 }
 0x522   : > { %2325 = vrot.lane.b32.xlu1 %v2291_v11, %s4640_s7  ;;  %v2299_v11 = vmul.f32 %v5817_v36, %v5817_v36  ;;  %v5938_v21 = vmul.f32 %v5930_v24, %v5512_v12  ;;  %v1243_v4 = vmul.f32 %v5522_v13, %v5930_v24  ;;  %v5951_v61 = vmul.f32 %v5930_v24, %v5616_v46 }
 0x523   : > { %v5955_v12 = vmul.f32 %v5930_v24, %v5545_v26  ;;  %v1245_v38 = vmul.f32 %v5618_v19, %v5930_v24  ;;  %v2302_v13 = vmul.f32 %v5836_v42, %v5836_v42  ;;  %v1244_v46 = vmul.f32 %v5573_v43, %v5930_v24 }
 0x524   : > { %v1247_v20 = vmul.f32 %v5612_v37, %v5930_v24  ;;  %v6048_v37 = vmul.f32 %v5930_v24, %v5620_v47  ;;  %v1248_v28 = vmul.f32 %v5661_v35, %v5930_v24 }
 0x525   : > { %v1260_v26 = vmul.f32 %v5955_v12, %v5955_v12 }
 0x526   : > { %2331 = vrot.lane.b32.xlu0 %v2294_v29, %s4640_s7  ;;  %v2301_v29 = vmul.f32 %v5811_v34, %v5811_v34  ;;  %v6026_v34 = vmul.f32 %v5930_v24, %v5575_v40 }
 0x528   : > { %v1263_v40 = vmul.f32 %v6026_v34, %v6026_v34 }
 0x529   : > { %2329 = vrot.lane.b32.xlu2 %v2293_v41, %s4640_s7  ;;  %v2303_v41 = vmul.f32 %v5845_v55, %v5845_v55 }
 0x52a   : > { %2333 = vrot.lane.b32.xlu1 %v2295_v17, %s4640_s7  ;;  %v1259_v17 = vmul.f32 %v5938_v21, %v5938_v21 }
 0x52e   : > { %2337 = vrot.lane.b32.xlu0 %v2297_v14, %s4640_s7  ;;  %v1275_v14 = vsub.f32 %v1243_v4, %v1259_v17  ;;  %v1246_v17 = vmul.f32 %v5549_v49, %v5930_v24 }
 0x530   : > { %v1307_v19 = vadd.f32 1e-05, %v1275_v14  ;;  %v5989_v14 = vmul.f32 %v5930_v24, %v5537_v58 }
 0x531   : > { %2335 = vrot.lane.b32.xlu2 %v2296_v1, %s4640_s7  ;;  %v2304_v1 = vmul.f32 %v5826_v57, %v5826_v57 }
 0x532   : > { %2339 = vrot.lane.b32.xlu1 %v2298_v51, %s4640_s7  ;;  %v1261_v51 = vmul.f32 %v5951_v61, %v5951_v61  ;;  %4301 = vrsqrt.f32 %v1307_v19  ;;  %v1269_v49 = vmul.f32 %v5989_v14, %v5989_v14  ;;  %vm1329_vm14 = vweird.f32 %v1307_v19 }
 0x534   : > { %v1277_v59 = vsub.f32 %v1245_v38, %v1261_v51  ;;  %v5998_v51 = vmul.f32 %v5930_v24, %v5601_v45 }
 0x536   : > { %2343 = vrot.lane.b32.xlu0 %v2300_v8, %s4640_s7  ;;  %v1276_v8 = vsub.f32 %v1244_v46, %v1260_v26  ;;  %v1270_v45 = vmul.f32 %v5998_v51, %v5998_v51 }
 0x538   : > { %v5982_v4 = vpop.eup %4301 }
 0x539   : > { %2341 = vrot.lane.b32.xlu2 %v2299_v11, %s4640_s7  ;;  %v5971_v11 = vadd.f32 1e-05, %v1277_v59  ;;  %vm1330_vm13 = vweird.f32 %v5982_v4 }
 0x53a   : > { %2345 = vrot.lane.b32.xlu1 %v2301_v29, %s4640_s7  ;;  %v5975_v29 = vmul.f32 %v5930_v24, %v5587_v5  ;;  %v1324_v5 = vmul.f32 %v5982_v4, %v1307_v19  ;;  %vm6054_vm15 = vmor %vm1329_vm14, %vm1330_vm13  ;;  %v6060_v19 = vmul.f32 %v5930_v24, %v5653_v16  ;;  %v1255_v16 = vmul.f32 %v5584_v52, %v5930_v24 }
 0x53b   : > { %4303 = vrsqrt.f32 %v5971_v11  ;;  %vm1349_vm0 = vweird.f32 %v5971_v11 }
 0x53c   : > { %v1262_v43 = vmul.f32 %v5975_v29, %v5975_v29  ;;  %v1325_v58 = vmul.f32 %v5982_v4, %v1324_v5  ;;  %v1254_v5 = vmul.f32 %v5640_v56, %v5930_v24  ;;  %v1271_v52 = vmul.f32 %v6060_v19, %v6060_v19 }
 0x53e   : > { %2349 = vrot.lane.b32.xlu0 %v2303_v41, %s4640_s7  ;;  %v5977_v41 = vadd.f32 1e-05, %v1276_v8  ;;  %v1278_v38 = vsub.f32 %v1246_v17, %v1262_v43  ;;  %v1326_v17 = vmul.f32 0.5, %v1325_v58 }
 0x540   : > { %4305 = vrsqrt.f32 %v5977_v41  ;;  %v6007_v59 = vadd.f32 1e-05, %v1278_v38  ;;  %v1327_v25 = vsub.f32 1.5, %v1326_v17  ;;  %vm1339_vm4 = vweird.f32 %v5977_v41 }
 0x541   : > { %2347 = vrot.lane.b32.xlu2 %v2302_v13, %s4640_s7  ;;  %v5992_v13 = vpop.eup %4303 }
 0x542   : > { %2351 = vrot.lane.b32.xlu1 %v2304_v1, %s4640_s7  ;;  %v1253_v1 = vmul.f32 %v5598_v7, %v5930_v24  ;;  %v1344_v26 = vmul.f32 %v5992_v13, %v5971_v11  ;;  %4307 = vrsqrt.f32 %v6007_v59  ;;  %vm1350_vm1 = vweird.f32 %v5992_v13 }
 0x543   : > { %vm6087_vm3 = vmor %vm1349_vm0, %vm1350_vm1  ;;  %vm1359_vm7 = vweird.f32 %v6007_v59 }
 0x544   : > { %v1285_v8 = vsub.f32 %v1253_v1, %v1269_v49  ;;  %v1345_v55 = vmul.f32 %v5992_v13, %v1344_v26  ;;  %v1286_v49 = vsub.f32 %v1254_v5, %v1270_v45 }
 0x546   : > { %v6000_v46 = vpop.eup %4305  ;;  %v6019_v57 = vadd.f32 1e-05, %v1285_v8  ;;  %v1346_v42 = vmul.f32 0.5, %v1345_v55  ;;  %v6033_v8 = vadd.f32 1e-05, %v1286_v49  ;;  %v9209_v49 = vld [vmem:[#allocation33_spill] sm:$0xff] }
 0x547   : > { %v1334_v7 = vmul.f32 %v6000_v46, %v5977_v41  ;;  %vm1340_vm2 = vweird.f32 %v6000_v46  ;;  %v6132_v50 = vmul.f32 %v5930_v24, %v9209_v49 }
 0x548   : > { %4309 = vrsqrt.f32 %v6019_v57  ;;  %v6031_v26 = vpop.eup %4307  ;;  %v1347_v55 = vsub.f32 1.5, %v1346_v42  ;;  %v1291_v42 = vsub.f32 %v5277_v39, %v5938_v21  ;;  %vm6107_vm5 = vmor %vm1339_vm4, %vm1340_vm2  ;;  %vm1429_vm12 = vweird.f32 %v6019_v57 }
 0x549   : > { %v1335_v1 = vmul.f32 %v6000_v46, %v1334_v7  ;;  %v1328_v7 = vmul.f32 %v5982_v4, %v1327_v25  ;;  %v1354_v17 = vmul.f32 %v6031_v26, %v6007_v59  ;;  %4311 = vrsqrt.f32 %v6033_v8 }
 0x54a   : > { %vm1360_vm6 = vweird.f32 %v6031_v26 }
 0x54b   : > { %v1336_v56 = vmul.f32 0.5, %v1335_v1  ;;  %v1279_v1 = vsub.f32 %v1247_v20, %v1263_v40  ;;  %v1332_v47 = vsel %vm6054_vm15, %v5982_v4, %v1328_v7  ;;  %v1348_v20 = vmul.f32 %v5992_v13, %v1347_v55  ;;  %vm6179_vm10 = vmor %vm1359_vm7, %vm1360_vm6 }
 0x54c   : > { %v1355_v21 = vmul.f32 %v6031_v26, %v1354_v17  ;;  %v6078_v40 = vmul.f32 %v5930_v24, %v5622_v54  ;;  %v1264_v55 = vmul.f32 %v6048_v37, %v6048_v37  ;;  %v1256_v54 = vmul.f32 %v5638_v53, %v5930_v24 }
 0x54d   : > { %v1337_v5 = vsub.f32 1.5, %v1336_v56  ;;  %v6083_v7 = vadd.f32 1e-05, %v1279_v1  ;;  %v1483_v17 = vmul.f32 %v1332_v47, %v1291_v42  ;;  %v1293_v1 = vsub.f32 %v5331_v48, %v5951_v61 }
 0x54e   : > { %v6050_v25 = vpop.eup %4309  ;;  %v1352_v36 = vsel %vm6087_vm3, %v5992_v13, %v1348_v20  ;;  %v1356_v53 = vmul.f32 0.5, %v1355_v21  ;;  %v1287_v42 = vsub.f32 %v1255_v16, %v1271_v52  ;;  %v6113_v48 = vmul.f32 %v5930_v24, %v5663_v0 }
 0x54f   : > { %v1338_v4 = vmul.f32 %v6000_v46, %v1337_v5  ;;  %v1424_v11 = vmul.f32 %v6050_v25, %v6019_v57  ;;  %v6095_v5 = vpop.eup %4311  ;;  %v1272_v61 = vmul.f32 %v6078_v40, %v6078_v40  ;;  %4313 = vrsqrt.f32 %v6083_v7 }
 0x550   : > { %v1280_v13 = vsub.f32 %v1248_v28, %v1264_v55  ;;  %v1292_v20 = vsub.f32 %v5291_v9, %v5955_v12  ;;  %v1434_v0 = vmul.f32 %v6095_v5, %v6033_v8  ;;  %v1249_v16 = vmul.f32 %v5630_v60, %v5930_v24 }
 0x551   : > { %v1342_v41 = vsel %vm6107_vm5, %v6000_v46, %v1338_v4  ;;  %v1425_v35 = vmul.f32 %v6050_v25, %v1424_v11  ;;  %v1288_v21 = vsub.f32 %v1256_v54, %v1272_v61  ;;  %v1500_v28 = vmul.f32 %v5670_v23, %v1483_v17 }
 0x552   : > { %v1485_v4 = vmul.f32 %v1352_v36, %v1293_v1  ;;  %v1357_v11 = vsub.f32 1.5, %v1356_v53  ;;  %v6137_v55 = vadd.f32 1e-05, %v1287_v42  ;;  %v1265_v9 = vmul.f32 %v6113_v48, %v6113_v48 }
 0x553   : > { %v1484_v52 = vmul.f32 %v1342_v41, %v1292_v20  ;;  %v1426_v54 = vmul.f32 0.5, %v1425_v35  ;;  %v6143_v60 = vadd.f32 1e-05, %v1280_v13  ;;  %v1435_v61 = vmul.f32 %v6095_v5, %v1434_v0 }
 0x554   : > { %v6021_v38 = vpop.xlane.xlu1 %2226  ;;  %v6146_v49 = vadd.f32 1e-05, %v1288_v21  ;;  %v1273_v36 = vmul.f32 %v6132_v50, %v6132_v50  ;;  %v1517_v17 = vadd.f32 %v5723_v10, %v1500_v28  ;;  %v1502_v1 = vmul.f32 %v5670_v23, %v1485_v4 }
 0x555   : > { %v6013_v43 = vpop.xlane.xlu0 %2229  ;;  %9197 = vst [vmem:[#allocation88_spill] sm:$0xff] %v6021_v38  ;;  %v6148_v62 = vpop.eup %4313  ;;  %v1358_v53 = vmul.f32 %v6031_v26, %v1357_v11  ;;  %4315 = vrsqrt.f32 %v6137_v55  ;;  %v1501_v42 = vmul.f32 %v5670_v23, %v1484_v52  ;;  %v1427_v41 = vsub.f32 1.5, %v1426_v54  ;;  %v6197_v54 = vld [vmem:[%s8918_s2 + $0x5] ss:$0 sm:$0xff] }
 0x556   : > { %9196 = vst [vmem:[#allocation87_spill] sm:$0xff] %v6013_v43  ;;  %4317 = vrsqrt.f32 %v6143_v60  ;;  %v1257_v35 = vmul.f32 %v5681_v30, %v5930_v24  ;;  %v6163_v13 = vmul.f32 %v5930_v24, %v5696_v33  ;;  %v1436_v20 = vmul.f32 0.5, %v1435_v61 }
 0x557   : > { %v1364_v0 = vmul.f32 %v6148_v62, %v6083_v7  ;;  %4319 = vrsqrt.f32 %v6146_v49  ;;  %v1250_v28 = vmul.f32 %v5688_v2, %v5930_v24  ;;  %v6183_v11 = vmax.f32 %v1517_v17, 0.0 }
 0x558   : > { %v1519_v59 = vadd.f32 %v5723_v10, %v1502_v1  ;;  %v1362_v2 = vsel %vm6179_vm10, %v6031_v26, %v1358_v53  ;;  %vm1430_vm11 = vweird.f32 %v6050_v25  ;;  %v1266_v52 = vmul.f32 %v6163_v13, %v6163_v13 }
 0x559   : > { %9216 = vst [vmem:[#allocation97_spill] sm:$0xff] %v6183_v11  ;;  %v1437_v1 = vsub.f32 1.5, %v1436_v20  ;;  %v1365_v26 = vmul.f32 %v6148_v62, %v1364_v0  ;;  %vm6216_vm13 = vmor %vm1429_vm12, %vm1430_vm11  ;;  %vm1440_vm14 = vweird.f32 %v6095_v5  ;;  %v2793_v57 = vmul.f32 %v6197_v54, %v6183_v11 }
 0x55a   : > { %v6220_v20 = vmax.f32 %v1519_v59, 0.0  ;;  %vm1439_vm15 = vweird.f32 %v6033_v8  ;;  %vm1370_vm1 = vweird.f32 %v6148_v62  ;;  %vm1369_vm2 = vweird.f32 %v6083_v7 }
 0x55b   : > { %v6199_v61 = vpop.eup %4315  ;;  %vm6258_vm0 = vmor %vm1439_vm15, %vm1440_vm14  ;;  %vm1449_vm4 = vweird.f32 %v6137_v55  ;;  %vm1379_vm11 = vweird.f32 %v6143_v60 }
 0x55c   : > { %v6028_v58 = vpop.xlane.xlu2 %2232  ;;  %v6062_v56 = vpop.xlane.xlu1 %2235  ;;  %9221 = vst [vmem:[#allocation98_spill] sm:$0xff] %v6220_v20  ;;  %vm6321_vm3 = vmor %vm1369_vm2, %vm1370_vm1  ;;  %vm1450_vm5 = vweird.f32 %v6199_v61 }
 0x55d   : > { %9198 = vst [vmem:[#allocation89_spill] sm:$0xff] %v6028_v58  ;;  %v6041_v45 = vpop.xlane.xlu0 %2238  ;;  %vm6358_vm10 = vmor %vm1449_vm4, %vm1450_vm5 }
 0x55e   : > { %9199 = vst [vmem:[#allocation90_spill] sm:$0xff] %v6041_v45 }
 0x55f   : > { %9202 = vst [vmem:[#allocation91_spill] sm:$0xff] %v6062_v56 }
 0x564   : > { %v6070_v39 = vpop.xlane.xlu2 %2241  ;;  %v6141_v12 = vpop.xlane.xlu1 %2244 }
 0x565   : > { %9203 = vst [vmem:[#allocation92_spill] sm:$0xff] %v6070_v39  ;;  %v6122_v47 = vpop.xlane.xlu0 %2247 }
 0x566   : > { %9208 = vst [vmem:[#allocation93_spill] sm:$0xff] %v6122_v47 }
 0x567   : > { %9211 = vst [vmem:[#allocation94_spill] sm:$0xff] %v6141_v12 }
 0x56c   : > { %v6134_v46 = vpop.xlane.xlu2 %2250  ;;  %v6205_v53 = vpop.xlane.xlu1 %2253 }
 0x56d   : > { %9210 = vst [vmem:[#allocation33_spill] sm:$0xff] %v6134_v46  ;;  %v1281_v46 = vsub.f32 %v1249_v16, %v1265_v9  ;;  %v1289_v16 = vsub.f32 %v1257_v35, %v1273_v36  ;;  %v6173_v4 = vpop.xlane.xlu0 %2256  ;;  %v1428_v9 = vmul.f32 %v6050_v25, %v1427_v41  ;;  %v9217_v36 = vld [vmem:[#allocation11_spill] sm:$0xff]  ;;  %v1282_v35 = vsub.f32 %v1250_v28, %v1266_v52 }
 0x56e   : > { %9212 = vst [vmem:[#allocation95_spill] sm:$0xff] %v6173_v4  ;;  %v1294_v17 = vsub.f32 %v9217_v36, %v5975_v29  ;;  %v1438_v28 = vmul.f32 %v6095_v5, %v1437_v1  ;;  %v1444_v52 = vmul.f32 %v6199_v61, %v6137_v55  ;;  %v9223_v36 = vld [vmem:[#allocation9_spill] sm:$0xff]  ;;  %v6250_v29 = vmul.f32 %v5930_v24, %v5700_v63 }
 0x56f   : > { %v6168_v21 = vadd.f32 1e-05, %v1281_v46  ;;  %v1518_v46 = vadd.f32 %v5723_v10, %v1501_v42  ;;  %9218 = vst [vmem:[#allocation11_spill] sm:$0xff] %v6205_v53  ;;  %v6207_v42 = vpop.eup %4317  ;;  %v6210_v41 = vadd.f32 1e-05, %v1289_v16  ;;  %v1432_v0 = vsel %vm6216_vm13, %v6050_v25, %v1428_v9 }
 0x570   : > { %v6212_v33 = vpop.eup %4319  ;;  %v1374_v59 = vmul.f32 %v6207_v42, %v6143_v60  ;;  %v6240_v9 = vadd.f32 1e-05, %v1282_v35  ;;  %v1445_v18 = vmul.f32 %v6199_v61, %v1444_v52  ;;  %vm1380_vm6 = vweird.f32 %v6207_v42 }
 0x571   : > { %4321 = vrsqrt.f32 %v6168_v21  ;;  %v6228_v16 = vmax.f32 %v1518_v46, 0.0  ;;  %v1454_v25 = vmul.f32 %v6212_v33, %v6146_v49  ;;  %vm1460_vm7 = vweird.f32 %v6212_v33  ;;  %vm6377_vm12 = vmor %vm1379_vm11, %vm1380_vm6 }
 0x572   : > { %4323 = vrsqrt.f32 %v6210_v41  ;;  %v1375_v27 = vmul.f32 %v6207_v42, %v1374_v59  ;;  %vm1459_vm13 = vweird.f32 %v6146_v49  ;;  %v9246_v49 = vld [vmem:[#allocation55_spill] sm:$0xff]  ;;  %vm1399_vm6 = vweird.f32 %v6240_v9 }
 0x573   : > { %9222 = vst [vmem:[#allocation99_spill] sm:$0xff] %v6228_v16  ;;  %v2794_v63 = vmul.f32 %v6197_v54, %v6228_v16  ;;  %v1455_v53 = vmul.f32 %v6212_v33, %v1454_v25  ;;  %4325 = vrsqrt.f32 %v6240_v9  ;;  %vm6391_vm14 = vmor %vm1459_vm13, %vm1460_vm7 }
 0x574   : > { %v6175_v30 = vpop.xlane.xlu2 %2259 }
 0x575   : > { %9213 = vst [vmem:[#allocation96_spill] sm:$0xff] %v6175_v30  ;;  %v1486_v30 = vmul.f32 %v1362_v2, %v1294_v17  ;;  %v1366_v2 = vmul.f32 0.5, %v1365_v26  ;;  %v1301_v17 = vsub.f32 %v9223_v36, %v5989_v14  ;;  %v2795_v14 = vmul.f32 %v6197_v54, %v6220_v20  ;;  %v9225_v36 = vld [vmem:[#allocation14_spill] sm:$0xff]  ;;  %v6266_v8 = vpop.xlane.xlu0 %2265  ;;  %v9311_v20 = vld [vmem:[#allocation36_spill] sm:$0xff] }
 0x576   : > { %v1302_v4 = vsub.f32 %v9225_v36, %v5998_v51  ;;  %9228 = vst [vmem:[#allocation14_spill] sm:$0xff] %v6266_v8  ;;  %v1442_v51 = vsel %vm6258_vm0, %v6095_v5, %v1438_v28  ;;  %v1258_v8 = vmul.f32 %v5705_v32, %v5930_v24  ;;  %v6286_v5 = vsel %vm765_vm8, %v2793_v57, 0.0 }
 0x577   : > { %v6244_v1 = vpop.eup %4321  ;;  %v1503_v26 = vmul.f32 %v5670_v23, %v1486_v30  ;;  %v6264_v30 = vmul.f32 %v5930_v24, %v5685_v3  ;;  %v1367_v36 = vsub.f32 1.5, %v1366_v2  ;;  %v6290_v2 = vsel %vm765_vm8, %v2795_v14, 0.0 }
 0x578   : > { %v1384_v3 = vmul.f32 %v6244_v1, %v6168_v21  ;;  %9230 = vst [vmem:[#allocation101_spill] sm:$0xff] %v6290_v2  ;;  %v6292_v52 = vpop.eup %4323  ;;  %v1494_v59 = vmul.f32 %v1442_v51, %v1302_v4  ;;  %v6297_v32 = vsel %vm765_vm8, %v2794_v63, 0.0  ;;  %v1446_v57 = vmul.f32 0.5, %v1445_v18 }
 0x579   : > { %v1520_v28 = vadd.f32 %v5723_v10, %v1503_v26  ;;  %v1274_v25 = vmul.f32 %v6264_v30, %v6264_v30  ;;  %v1251_v26 = vmul.f32 %v5749_v15, %v5930_v24  ;;  %v1368_v14 = vmul.f32 %v6148_v62, %v1367_v36  ;;  %v6310_v18 = vpop.eup %4325 }
 0x57a   : > { %v1456_v44 = vmul.f32 0.5, %v1455_v53  ;;  %v1385_v4 = vmul.f32 %v6244_v1, %v1384_v3  ;;  %v1464_v63 = vmul.f32 %v6292_v52, %v6210_v41  ;;  %v1511_v36 = vmul.f32 %v5670_v23, %v1494_v59  ;;  %v9233_v3 = vld [vmem:[#allocation16_spill] sm:$0xff] }
 0x57b   : > { %v1290_v51 = vsub.f32 %v1258_v8, %v1274_v25  ;;  %v6308_v22 = vmax.f32 %v1520_v28, 0.0  ;;  %v1447_v28 = vsub.f32 1.5, %v1446_v57  ;;  %v1372_v7 = vsel %vm6321_vm3, %v6148_v62, %v1368_v14 }
 0x57c   : > { %v6242_v46 = vpop.xlane.xlu2 %2268  ;;  %v1457_v59 = vsub.f32 1.5, %v1456_v44  ;;  %v1528_v44 = vadd.f32 %v5723_v10, %v1511_v36  ;;  %vm1390_vm15 = vweird.f32 %v6244_v1  ;;  %vm1389_vm0 = vweird.f32 %v6168_v21 }
 0x57d   : > { %9224 = vst [vmem:[#allocation9_spill] sm:$0xff] %v6242_v46  ;;  %v1493_v46 = vmul.f32 %v1432_v0, %v1301_v17  ;;  %v1267_v0 = vmul.f32 %v6250_v29, %v6250_v29  ;;  %v6283_v17 = vpop.xlane.xlu1 %2262  ;;  %v1448_v57 = vmul.f32 %v6199_v61, %v1447_v28  ;;  %vm6420_vm1 = vmor %vm1389_vm0, %vm1390_vm15  ;;  %vm1470_vm2 = vweird.f32 %v6292_v52 }
 0x57e   : > { %9229 = vst [vmem:[#allocation100_spill] sm:$0xff] %v6283_v17  ;;  %v1376_v17 = vmul.f32 0.5, %v1375_v27  ;;  %v9232_v27 = vld [vmem:[#allocation15_spill] sm:$0xff]  ;;  %vm1469_vm3 = vweird.f32 %v6210_v41  ;;  %vm1400_vm5 = vweird.f32 %v6310_v18 }
 0x57f   : > { %v1510_v35 = vmul.f32 %v5670_v23, %v1493_v46  ;;  %v1283_v31 = vsub.f32 %v1251_v26, %v1267_v0  ;;  %9231 = vst [vmem:[#allocation102_spill] sm:$0xff] %v6308_v22  ;;  %v1295_v0 = vsub.f32 %v9233_v3, %v6026_v34  ;;  %v1465_v34 = vmul.f32 %v6292_v52, %v1464_v63  ;;  %vm6459_vm4 = vmor %vm1469_vm3, %vm1470_vm2 }
 0x580   : > { %v1377_v25 = vsub.f32 1.5, %v1376_v17  ;;  %v1394_v3 = vmul.f32 %v6310_v18, %v6240_v9  ;;  %v2796_v17 = vmul.f32 %v6197_v54, %v6308_v22  ;;  %v1452_v55 = vsel %vm6358_vm10, %v6199_v61, %v1448_v57  ;;  %vm6491_vm7 = vmor %vm1399_vm6, %vm1400_vm5 }
 0x581   : > { %v1527_v8 = vadd.f32 %v5723_v10, %v1510_v35  ;;  %v6329_v35 = vadd.f32 1e-05, %v1290_v51  ;;  %v6334_v15 = vadd.f32 1e-05, %v1283_v31  ;;  %v1487_v31 = vmul.f32 %v1372_v7, %v1295_v0 }
 0x582   : > { %v1378_v14 = vmul.f32 %v6207_v42, %v1377_v25  ;;  %v1458_v51 = vmul.f32 %v6212_v33, %v1457_v59  ;;  %v1395_v36 = vmul.f32 %v6310_v18, %v1394_v3  ;;  %v6364_v25 = vsel %vm765_vm8, %v2796_v17, 0.0 }
 0x583   : > { %v6340_v62 = vmax.f32 %v1527_v8, 0.0  ;;  %4327 = vrsqrt.f32 %v6329_v35  ;;  %v1466_v8 = vmul.f32 0.5, %v1465_v34  ;;  %v6370_v7 = vmax.f32 %v1528_v44, 0.0  ;;  %v9243_v34 = vld [vmem:[#allocation19_spill] sm:$0xff] }
 0x584   : > { %v2324_v39 = vpop.permute.xlu2 %2323  ;;  %4329 = vrsqrt.f32 %v6334_v15  ;;  %v1296_v3 = vsub.f32 %v9243_v34, %v6048_v37  ;;  %v1382_v17 = vsel %vm6377_vm12, %v6207_v42, %v1378_v14  ;;  %v6402_v57 = vmul.f32 %v9246_v49, %v5930_v24 }
 0x585   : > { %v2372_v46 = vsel %vm765_vm8, %v2324_v39, 0.0  ;;  %9236 = vst [vmem:[#allocation15_spill] sm:$0xff] %v6340_v62  ;;  %v1467_v37 = vsub.f32 1.5, %v1466_v8  ;;  %v1396_v42 = vmul.f32 0.5, %v1395_v36  ;;  %v9249_v8 = vld [vmem:[#allocation20_spill] sm:$0xff]  ;;  %vm1479_vm12 = vweird.f32 %v6329_v35 }
 0x586   : > { %2373 = vadd.xlane.f32.xlu0 %v2372_v46  ;;  %v1386_v46 = vmul.f32 0.5, %v1385_v4  ;;  %v6346_v4 = vpop.xlane.xlu1 %2271  ;;  %9240 = vst [vmem:[#allocation103_spill] sm:$0xff] %v6370_v7  ;;  %v1297_v36 = vsub.f32 %v9249_v8, %v6113_v48  ;;  %v1488_v0 = vmul.f32 %v1382_v17, %v1296_v3  ;;  %v1844_v3 = vmul.f32 %v6402_v57, %v6402_v57  ;;  %v9254_v8 = vld [vmem:[#allocation24_spill] sm:$0xff] }
 0x587   : > { %9237 = vst [vmem:[#allocation16_spill] sm:$0xff] %v6346_v4  ;;  %v1468_v34 = vmul.f32 %v6292_v52, %v1467_v37  ;;  %v1397_v17 = vsub.f32 1.5, %v1396_v42  ;;  %v6449_v37 = vld [vmem:[%s8918_s2 + $0x3] ss:$0 sm:$0xff] }
 0x588   : > { %v2322_v53 = vpop.permute.xlu0 %2321  ;;  %v1387_v63 = vsub.f32 1.5, %v1386_v46  ;;  %v1504_v46 = vmul.f32 %v5670_v23, %v1487_v31  ;;  %v1462_v23 = vsel %vm6391_vm14, %v6212_v33, %v1458_v51  ;;  %v9247_v31 = vld [vmem:[#allocation23_spill] sm:$0xff]  ;;  %v6414_v33 = vmul.f32 %v6197_v54, %v6370_v7 }
 0x589   : > { %v2369_v26 = vsel %vm765_vm8, %v2322_v53, 0.0  ;;  %v6404_v14 = vpop.eup %4327  ;;  %vm1409_vm14 = vweird.f32 %v6334_v15 }
 0x58a   : > { %2370 = vadd.xlane.f32.xlu2 %v2369_v26  ;;  %v6368_v26 = vmul.f32 %v6197_v54, %v6340_v62  ;;  %v1388_v44 = vmul.f32 %v6244_v1, %v1387_v63  ;;  %v9248_v63 = vsub.f32 %v9232_v27, %v6060_v19  ;;  %v6416_v51 = vpop.eup %4329  ;;  %v6427_v19 = vadd.f32 %v5723_v10, %v1504_v46  ;;  %v9253_v46 = vld [vmem:[#allocation66_spill] sm:$0xff] }
 0x58b   : > { %v6440_v61 = vmul.f32 %v9253_v46, %v5930_v24  ;;  %vm1480_vm10 = vweird.f32 %v6404_v14  ;;  %vm1410_vm11 = vweird.f32 %v6416_v51 }
 0x58c   : > { %v2330_v53 = vpop.permute.xlu2 %2329  ;;  %v1392_v27 = vsel %vm6420_vm1, %v6244_v1, %v1388_v44  ;;  %v1474_v1 = vmul.f32 %v6404_v14, %v6329_v35  ;;  %v1404_v44 = vmul.f32 %v6416_v51, %v6334_v15  ;;  %vm6562_vm13 = vmor %vm1479_vm12, %vm1480_vm10 }
 0x58d   : > { %v2381_v39 = vsel %vm765_vm8, %v2330_v53, 0.0  ;;  %v1304_v53 = vsub.f32 %v9247_v31, %v6078_v40  ;;  %v9252_v40 = vld [vmem:[#allocation75_spill] sm:$0xff]  ;;  %vm6574_vm15 = vmor %vm1409_vm14, %vm1410_vm11 }
 0x58e   : > { %2382 = vadd.xlane.f32.xlu0 %v2381_v39  ;;  %v1495_v39 = vmul.f32 %v1452_v55, %v9248_v63  ;;  %v1828_v21 = vmul.f32 %v9252_v40, %v5930_v24  ;;  %v1505_v63 = vmul.f32 %v6449_v37, %v1488_v0  ;;  %v9258_v0 = vld [vmem:[#allocation50_spill] sm:$0xff] }
 0x590   : > { %v2328_v28 = vpop.permute.xlu0 %2327  ;;  %v1512_v49 = vmul.f32 %v6449_v37, %v1495_v39  ;;  %v1860_v42 = vsub.f32 %v1828_v21, %v1844_v3  ;;  %v6471_v21 = vmul.f32 %v5930_v24, %v9258_v0  ;;  %v9264_v0 = vld [vmem:[#allocation31_spill] sm:$0xff] }
 0x591   : > { %v2378_v60 = vsel %vm765_vm8, %v2328_v28, 0.0  ;;  %v1305_v28 = vsub.f32 %v9254_v8, %v6132_v50  ;;  %v1398_v50 = vmul.f32 %v6310_v18, %v1397_v17  ;;  %v1298_v9 = vsub.f32 %v9264_v0, %v6163_v13 }
 0x592   : > { %2379 = vadd.xlane.f32.xlu2 %v2378_v60  ;;  %v1496_v60 = vmul.f32 %v1462_v23, %v1304_v53  ;;  %v1489_v53 = vmul.f32 %v1392_v27, %v1297_v36  ;;  %v1472_v36 = vsel %vm6459_vm4, %v6292_v52, %v1468_v34  ;;  %v1847_v27 = vmul.f32 %v6440_v61, %v6440_v61  ;;  %v9260_v52 = vld [vmem:[#allocation60_spill] sm:$0xff] }
 0x593   : > { %v6485_v34 = vmul.f32 %v9260_v52, %v5930_v24  ;;  %v6488_v17 = vadd.f32 1e-05, %v1860_v42  ;;  %v1402_v42 = vsel %vm6491_vm7, %v6310_v18, %v1398_v50  ;;  %v9266_v52 = vld [vmem:[#allocation46_spill] sm:$0xff]  ;;  %v9267_v18 = vld [vmem:[#allocation71_spill] sm:$0xff] }
 0x594   : > { %v2326_v59 = vpop.permute.xlu1 %2325  ;;  %v2336_v55 = vpop.permute.xlu2 %2335  ;;  %v1513_v41 = vmul.f32 %v6449_v37, %v1496_v60  ;;  %v9259_v60 = vld [vmem:[#allocation73_spill] sm:$0xff]  ;;  %v1506_v46 = vmul.f32 %v6449_v37, %v1489_v53  ;;  %v6514_v50 = vmul.f32 %v9267_v18, %v5930_v24 }
 0x595   : > { %v2375_v48 = vsel %vm765_vm8, %v2326_v59, 0.0  ;;  %v2390_v10 = vsel %vm765_vm8, %v2336_v55, 0.0  ;;  %v9257_v59 = vld [vmem:[#allocation77_spill] sm:$0xff]  ;;  %v1475_v55 = vmul.f32 %v6404_v14, %v1474_v1  ;;  %v6481_v3 = vmul.f32 %v9259_v60, %v5930_v24 }
 0x596   : > { %2376 = vadd.xlane.f32.xlu1 %v2375_v48  ;;  %2391 = vadd.xlane.f32.xlu0 %v2390_v10  ;;  %v1831_v39 = vmul.f32 %v9257_v59, %v5930_v24  ;;  %v1405_v48 = vmul.f32 %v6416_v51, %v1404_v44  ;;  %v9265_v53 = vld [vmem:[#allocation81_spill] sm:$0xff]  ;;  %v1853_v1 = vmul.f32 %v6485_v34, %v6485_v34  ;;  %4331 = vrsqrt.f32 %v6488_v17 }
 0x597   : > { %v1850_v60 = vmul.f32 %v6481_v3, %v6481_v3  ;;  %vm1923_vm0 = vweird.f32 %v6488_v17 }
 0x598   : > { %v2332_v23 = vpop.permute.xlu0 %2331  ;;  %v1863_v44 = vsub.f32 %v1831_v39, %v1847_v27  ;;  %v1476_v39 = vmul.f32 0.5, %v1475_v55  ;;  %v1406_v27 = vmul.f32 0.5, %v1405_v48  ;;  %v1268_v48 = vmul.f32 %v6471_v21, %v6471_v21 }
 0x599   : > { %v2384_v31 = vsel %vm765_vm8, %v2332_v23, 0.0  ;;  %v1497_v23 = vmul.f32 %v1472_v36, %v1305_v28  ;;  %v1837_v28 = vmul.f32 %v9265_v53, %v5930_v24  ;;  %v6525_v53 = vld [vmem:[%s8918_s2 + $0x4] ss:$0 sm:$0xff] }
 0x59a   : > { %2385 = vadd.xlane.f32.xlu2 %v2384_v31  ;;  %v9263_v31 = vld [vmem:[#allocation79_spill] sm:$0xff]  ;;  %v1477_v18 = vsub.f32 1.5, %v1476_v39  ;;  %v1407_v4 = vsub.f32 1.5, %v1406_v27 }
 0x59b   : > { %v1834_v8 = vmul.f32 %v9263_v31, %v5930_v24  ;;  %v6520_v31 = vadd.f32 1e-05, %v1863_v44  ;;  %v1869_v0 = vsub.f32 %v1837_v28, %v1853_v1  ;;  %v9269_v44 = vld [vmem:[#allocation83_spill] sm:$0xff]  ;;  %v1523_v1 = vadd.f32 %v6525_v53, %v1506_v46 }
 0x59c   : > { %v2334_v10 = vpop.permute.xlu1 %2333  ;;  %v2342_v40 = vpop.permute.xlu2 %2341  ;;  %v1478_v46 = vmul.f32 %v6404_v14, %v1477_v18 }
 0x59d   : > { %v2387_v59 = vsel %vm765_vm8, %v2334_v10, 0.0  ;;  %v2399_v36 = vsel %vm765_vm8, %v2342_v40, 0.0  ;;  %v1252_v10 = vmul.f32 %v9266_v52, %v5930_v24  ;;  %v1866_v40 = vsub.f32 %v1834_v8, %v1850_v60 }
 0x59e   : > { %2388 = vadd.xlane.f32.xlu1 %v2387_v59  ;;  %2400 = vadd.xlane.f32.xlu0 %v2399_v36  ;;  %v1490_v59 = vmul.f32 %v1402_v42, %v1298_v9  ;;  %v1522_v36 = vadd.f32 %v6525_v53, %v1505_v63  ;;  %v6529_v52 = vmax.f32 %v6427_v19, 0.0  ;;  %v1840_v8 = vmul.f32 %v9269_v44, %v5930_v24 }
 0x59f   : > { %v1284_v60 = vsub.f32 %v1252_v10, %v1268_v48  ;;  %v1514_v9 = vmul.f32 %v6449_v37, %v1497_v23  ;;  %v1856_v42 = vmul.f32 %v6514_v50, %v6514_v50  ;;  %v1530_v63 = vadd.f32 %v6525_v53, %v1513_v41  ;;  %v6544_v10 = vpop.eup %4331 }
 0x5a0   : > { %v2338_v13 = vpop.permute.xlu0 %2337  ;;  %9268 = vst [vmem:[#allocation19_spill] sm:$0xff] %v6529_v52  ;;  %4333 = vrsqrt.f32 %v6520_v31  ;;  %v6540_v19 = vadd.f32 1e-05, %v1866_v40  ;;  %v1507_v27 = vmul.f32 %v6449_v37, %v1490_v59  ;;  %v6548_v23 = vadd.f32 1e-05, %v1869_v0 }
 0x5a1   : > { %v2393_v55 = vsel %vm765_vm8, %v2338_v13, 0.0  ;;  %v1529_v13 = vadd.f32 %v6525_v53, %v1512_v49  ;;  %v1872_v48 = vsub.f32 %v1840_v8, %v1856_v42  ;;  %v6553_v40 = vadd.f32 1e-05, %v1284_v60 }
 0x5a2   : > { %2394 = vadd.xlane.f32.xlu2 %v2393_v55  ;;  %v1408_v55 = vmul.f32 %v6416_v51, %v1407_v4  ;;  %v1531_v0 = vadd.f32 %v6525_v53, %v1514_v9  ;;  %v1918_v4 = vmul.f32 %v6544_v10, %v6488_v17  ;;  %4335 = vrsqrt.f32 %v6540_v19 }
 0x5a3   : > { %v6570_v35 = vmax.f32 %v1522_v36, 0.0  ;;  %4337 = vrsqrt.f32 %v6548_v23  ;;  %v6579_v18 = vmax.f32 %v1523_v1, 0.0  ;;  %v1524_v15 = vadd.f32 %v6525_v53, %v1507_v27  ;;  %v9278_v1 = vld [vmem:[#allocation25_spill] sm:$0xff] }
 0x5a4   : > { %v2340_v28 = vpop.permute.xlu1 %2339  ;;  %v2348_v49 = vpop.permute.xlu2 %2347  ;;  %v6582_v8 = vmax.f32 %v1530_v63, 0.0  ;;  %v1482_v36 = vsel %vm6562_vm13, %v6404_v14, %v1478_v46  ;;  %v1412_v9 = vsel %vm6574_vm15, %v6416_v51, %v1408_v55  ;;  %v6592_v42 = vadd.f32 1e-05, %v1872_v48  ;;  %v9279_v63 = vld [vmem:[#allocation28_spill] sm:$0xff] }
 0x5a5   : > { %v2396_v39 = vsel %vm765_vm8, %v2340_v28, 0.0  ;;  %v2408_v41 = vsel %vm765_vm8, %v2348_v49, 0.0  ;;  %v6557_v28 = vmax.f32 %v1529_v13, 0.0  ;;  %9273 = vst [vmem:[#allocation23_spill] sm:$0xff] %v6570_v35  ;;  %4339 = vrsqrt.f32 %v6553_v40 }
 0x5a6   : > { %2397 = vadd.xlane.f32.xlu1 %v2396_v39  ;;  %2409 = vadd.xlane.f32.xlu0 %v2408_v41  ;;  %9276 = vst [vmem:[#allocation20_spill] sm:$0xff] %v6579_v18  ;;  %v6584_v60 = vpop.eup %4333  ;;  %v1306_v39 = vsub.f32 %v9278_v1, %v6264_v30  ;;  %v1299_v27 = vsub.f32 %v9279_v63, %v6250_v29  ;;  %v6611_v48 = vmax.f32 %v1524_v15, 0.0  ;;  %4341 = vrsqrt.f32 %v6592_v42 }
 0x5a7   : > { %9270 = vst [vmem:[#allocation55_spill] sm:$0xff] %v6557_v28  ;;  %v1919_v14 = vmul.f32 %v6544_v10, %v1918_v4  ;;  %v2798_v46 = vmul.f32 %v6197_v54, %v6570_v35  ;;  %v2805_v55 = vmul.f32 %v6197_v54, %v6557_v28  ;;  %v1948_v29 = vmul.f32 %v6584_v60, %v6520_v31 }
 0x5a8   : > { %v2344_v59 = vpop.permute.xlu0 %2343  ;;  %9277 = vst [vmem:[#allocation75_spill] sm:$0xff] %v6582_v8  ;;  %v1491_v30 = vmul.f32 %v1412_v9, %v1299_v27  ;;  %v1498_v49 = vmul.f32 %v1482_v36, %v1306_v39  ;;  %v2799_v13 = vmul.f32 %v6197_v54, %v6579_v18  ;;  %v6620_v1 = vsel %vm765_vm8, %v6368_v26, 0.0  ;;  %v9285_v26 = vld [vmem:[#allocation29_spill] sm:$0xff] }
 0x5a9   : > { %v2402_v44 = vsel %vm765_vm8, %v2344_v59, 0.0  ;;  %v2797_v59 = vmul.f32 %v6197_v54, %v6529_v52  ;;  %9281 = vst [vmem:[#allocation24_spill] sm:$0xff] %v6611_v48  ;;  %v2806_v9 = vmul.f32 %v6197_v54, %v6582_v8  ;;  %v6632_v39 = vsel %vm765_vm8, %v6414_v33, 0.0  ;;  %v9301_v52 = vld [vmem:[#allocation72_spill] sm:$0xff] }
 0x5aa   : > { %2403 = vadd.xlane.f32.xlu2 %v2402_v44  ;;  %v6601_v44 = vmax.f32 %v1531_v0, 0.0  ;;  %v6613_v0 = vpop.eup %4335  ;;  %9282 = vst [vmem:[#allocation77_spill] sm:$0xff] %v6620_v1  ;;  %v1920_v47 = vmul.f32 0.5, %v1919_v14  ;;  %v6641_v12 = vsel %vm765_vm8, %v2798_v46, 0.0  ;;  %v1949_v33 = vmul.f32 %v6584_v60, %v1948_v29 }
 0x5ab   : > { %v6624_v63 = vpop.eup %4337  ;;  %v6628_v36 = vsel %vm765_vm8, %v2797_v59, 0.0  ;;  %9284 = vst [vmem:[#allocation73_spill] sm:$0xff] %v6632_v39  ;;  %v6644_v59 = vsel %vm765_vm8, %v2805_v55, 0.0  ;;  %v1515_v58 = vmul.f32 %v6449_v37, %v1498_v49  ;;  %v6656_v46 = vsel %vm765_vm8, %v2799_v13, 0.0  ;;  %v9292_v13 = vld [vmem:[#allocation13_spill] sm:$0xff] }
 0x5ac   : > { %v2346_v41 = vpop.permute.xlu1 %2345  ;;  %9280 = vst [vmem:[#allocation66_spill] sm:$0xff] %v6601_v44  ;;  %v2807_v27 = vmul.f32 %v6197_v54, %v6601_v44  ;;  %v2800_v44 = vmul.f32 %v6197_v54, %v6611_v48  ;;  %v2008_v14 = vmul.f32 %v6624_v63, %v6548_v23  ;;  %v6659_v55 = vsel %vm765_vm8, %v2806_v9, 0.0  ;;  %v9293_v9 = vld [vmem:[#allocation22_spill] sm:$0xff] }
 0x5ad   : > { %v2405_v51 = vsel %vm765_vm8, %v2346_v41, 0.0  ;;  %9283 = vst [vmem:[#allocation50_spill] sm:$0xff] %v6628_v36  ;;  %v6636_v41 = vpop.eup %4339  ;;  %v1921_v45 = vsub.f32 1.5, %v1920_v47  ;;  %v1950_v48 = vmul.f32 0.5, %v1949_v33  ;;  %v9296_v47 = vld [vmem:[#allocation51_spill] sm:$0xff]  ;;  %vm1924_vm1 = vweird.f32 %v6544_v10 }
 0x5ae   : > { %2406 = vadd.xlane.f32.xlu1 %v2405_v51  ;;  %9286 = vst [vmem:[#allocation60_spill] sm:$0xff] %v6644_v59  ;;  %v1978_v51 = vmul.f32 %v6613_v0, %v6540_v19  ;;  %v1414_v49 = vmul.f32 %v6636_v41, %v6553_v40  ;;  %v6668_v28 = vsel %vm765_vm8, %v2807_v27, 0.0  ;;  %v6670_v7 = vpop.eup %4341  ;;  %v6678_v6 = vsel %vm765_vm8, %v2800_v44, 0.0  ;;  %vm6724_vm2 = vmor %vm1923_vm0, %vm1924_vm1 }
 0x5af   : > { %9287 = vst [vmem:[#allocation79_spill] sm:$0xff] %v6656_v46  ;;  %v1532_v27 = vadd.f32 %v6525_v53, %v1515_v58  ;;  %v2009_v35 = vmul.f32 %v6624_v63, %v2008_v14  ;;  %v6688_v56 = vmul.f32 %v9296_v47, %v5930_v24  ;;  %v9297_v58 = vld [vmem:[#allocation35_spill] sm:$0xff]  ;;  %v6699_v33 = vmul.f32 %v6544_v10, %v1921_v45  ;;  %v9322_v46 = vld [vmem:[#allocation80_spill] sm:$0xff] }
 0x5b0   : > { %v2350_v4 = vpop.permute.xlu0 %2349  ;;  %9288 = vst [vmem:[#allocation31_spill] sm:$0xff] %v6659_v55  ;;  %v1979_v62 = vmul.f32 %v6613_v0, %v1978_v51  ;;  %v1415_v44 = vmul.f32 %v6636_v41, %v1414_v49  ;;  %v9298_v51 = vld [vmem:[#allocation56_spill] sm:$0xff]  ;;  %v1951_v39 = vsub.f32 1.5, %v1950_v48  ;;  %v1829_v49 = vmul.f32 %v9301_v52, %v5930_v24  ;;  %v9307_v48 = vld [vmem:[#allocation67_spill] sm:$0xff]  ;;  %v9313_v55 = vld [vmem:[#allocation42_spill] sm:$0xff] }
 0x5b1   : > { %v2411_v15 = vsel %vm765_vm8, %v2350_v4, 0.0  ;;  %v1508_v4 = vmul.f32 %v6449_v37, %v1491_v30  ;;  %v9289_v30 = vld [vmem:[#allocation7_spill] sm:$0xff]  ;;  %9291 = vst [vmem:[#allocation81_spill] sm:$0xff] %v6668_v28  ;;  %v9295_v28 = vld [vmem:[#allocation30_spill] sm:$0xff]  ;;  %v6704_v14 = vmul.f32 %v9298_v51, %v5930_v24  ;;  %v6714_v45 = vmul.f32 0.5, %v2009_v35  ;;  %v9304_v51 = vld [vmem:[#allocation41_spill] sm:$0xff] }
 0x5b2   : > { %2412 = vadd.xlane.f32.xlu2 %v2411_v15  ;;  %v9290_v15 = vld [vmem:[#allocation8_spill] sm:$0xff]  ;;  %9294 = vst [vmem:[#allocation46_spill] sm:$0xff] %v6678_v6  ;;  %v1980_v59 = vmul.f32 0.5, %v1979_v62  ;;  %v1843_v11 = vmul.f32 %v6688_v56, %v6688_v56  ;;  %v1830_v16 = vmul.f32 %v9304_v51, %v5930_v24  ;;  %v1416_v62 = vmul.f32 0.5, %v1415_v44  ;;  %v9309_v51 = vld [vmem:[#allocation37_spill] sm:$0xff] }
 0x5b3   : > { %v1525_v18 = vadd.f32 %v6525_v53, %v1508_v4  ;;  %v6696_v4 = vmul.f32 %v9297_v58, %v5930_v24  ;;  %9299 = vst [vmem:[#allocation71_spill] sm:$0xff] %v6704_v14  ;;  %v6712_v58 = vmax.f32 %v1532_v27, 0.0  ;;  %v6733_v27 = vmul.f32 %v9307_v48, %v5930_v24 }
 0x5b4   : > { %v2352_v8 = vpop.permute.xlu1 %2351  ;;  %v1846_v17 = vmul.f32 %v6704_v14, %v6704_v14  ;;  %v6743_v38 = vmul.f32 %v9309_v51, %v5930_v24  ;;  %v6746_v44 = vmul.f32 %v6584_v60, %v1951_v39  ;;  %v6750_v48 = vmul.f32 %v9311_v20, %v5930_v24  ;;  %v9314_v51 = vld [vmem:[#allocation78_spill] sm:$0xff] }
 0x5b5   : > { %v2414_v29 = vsel %vm765_vm8, %v2352_v8, 0.0  ;;  %v2038_v8 = vmul.f32 %v6670_v7, %v6592_v42  ;;  %v6710_v22 = vmax.f32 %v1525_v18, 0.0  ;;  %9303 = vst [vmem:[#allocation25_spill] sm:$0xff] %v6712_v58  ;;  %v1845_v35 = vmul.f32 %v6696_v4, %v6696_v4 }
 0x5b6   : > { %2415 = vadd.xlane.f32.xlu1 %v2414_v29  ;;  %v9300_v29 = vld [vmem:[#allocation39_spill] sm:$0xff]  ;;  %9308 = vst [vmem:[#allocation28_spill] sm:$0xff] %v6733_v27  ;;  %v1833_v36 = vmul.f32 %v9313_v55, %v5930_v24  ;;  %v2011_v1 = vsub.f32 1.5, %v6714_v45  ;;  %v1862_v6 = vsub.f32 %v1830_v16, %v1846_v17  ;;  %vm1954_vm3 = vweird.f32 %v6584_v60 }
 0x5b7   : > { %v1827_v47 = vmul.f32 %v9300_v29, %v5930_v24  ;;  %9302 = vst [vmem:[#allocation83_spill] sm:$0xff] %v6710_v22  ;;  %v2039_v18 = vmul.f32 %v6670_v7, %v2038_v8  ;;  %v1861_v43 = vsub.f32 %v1829_v49, %v1845_v35  ;;  %v1981_v29 = vsub.f32 1.5, %v1980_v59  ;;  %v9315_v49 = vld [vmem:[#allocation76_spill] sm:$0xff]  ;;  %v9319_v17 = vld [vmem:[#allocation43_spill] sm:$0xff] }
 0x5b8   : > { %9310 = vst [vmem:[#allocation29_spill] sm:$0xff] %v6743_v38  ;;  %v1849_v20 = vmul.f32 %v6733_v27, %v6733_v27  ;;  %v6765_v55 = vmul.f32 %v9315_v49, %v5930_v24  ;;  %vm1984_vm4 = vweird.f32 %v6613_v0  ;;  %vm1419_vm5 = vweird.f32 %v6553_v40  ;;  %v9317_v59 = vld [vmem:[#allocation40_spill] sm:$0xff]  ;;  %v9329_v40 = vld [vmem:[#allocation45_spill] sm:$0xff] }
 0x5b9   : > { %v1859_v8 = vsub.f32 %v1827_v47, %v1843_v11  ;;  %9312 = vst [vmem:[#allocation7_spill] sm:$0xff] %v6750_v48  ;;  %v1832_v11 = vmul.f32 %v9314_v51, %v5930_v24  ;;  %v6759_v39 = vmul.f32 0.5, %v2039_v18  ;;  %v1417_v47 = vsub.f32 1.5, %v1416_v62 }
 0x5ba   : > { %2673 = vrot.lane.b32.xlu0 %v6449_v37, %s4640_s7  ;;  %9316 = vst [vmem:[#allocation8_spill] sm:$0xff] %v6765_v55  ;;  %v1848_v16 = vmul.f32 %v6743_v38, %v6743_v38  ;;  %v6775_v45 = vmul.f32 %v9317_v59, %v5930_v24  ;;  %vm1953_vm6 = vweird.f32 %v6520_v31  ;;  %v1854_v18 = vmul.f32 %v6750_v48, %v6750_v48  ;;  %v9330_v48 = vld [vmem:[#allocation84_spill] sm:$0xff] }
 0x5bb   : > { %v6780_v62 = vadd.f32 1e-05, %v1861_v43  ;;  %v1865_v35 = vsub.f32 %v1833_v36, %v1849_v20  ;;  %v1836_v51 = vmul.f32 %v9319_v17, %v5930_v24  ;;  %vm1983_vm7 = vweird.f32 %v6540_v19  ;;  %v9323_v36 = vld [vmem:[#allocation82_spill] sm:$0xff]  ;;  %vm6851_vm13 = vmor %vm1953_vm6, %vm1954_vm3 }
 0x5bc   : > { %9318 = vst [vmem:[#allocation13_spill] sm:$0xff] %v6775_v45  ;;  %v6789_v2 = vadd.f32 1e-05, %v1862_v6  ;;  %v1864_v59 = vsub.f32 %v1832_v11, %v1848_v16  ;;  %v1835_v27 = vmul.f32 %v9322_v46, %v5930_v24  ;;  %v1418_v38 = vmul.f32 %v6636_v41, %v1417_v47  ;;  %v9324_v17 = vld [vmem:[#allocation38_spill] sm:$0xff]  ;;  %v9325_v46 = vld [vmem:[#allocation44_spill] sm:$0xff]  ;;  %vm6873_vm14 = vmor %vm1983_vm7, %vm1984_vm4 }
 0x5bd   : > { %vm1420_vm10 = vweird.f32 %v6636_v41  ;;  %v1852_v43 = vmul.f32 %v6765_v55, %v6765_v55  ;;  %v1838_v20 = vmul.f32 %v9323_v36, %v5930_v24  ;;  %v1851_v6 = vmul.f32 %v6775_v45, %v6775_v45  ;;  %v9326_v47 = vld [vmem:[#allocation74_spill] sm:$0xff] }
 0x5be   : > { %2810 = vadd.xlane.f32.xlu1 %v6286_v5  ;;  %v6771_v5 = vadd.f32 1e-05, %v1859_v8  ;;  %v9320_v8 = vld [vmem:[#allocation61_spill] sm:$0xff]  ;;  %v1839_v11 = vmul.f32 %v9325_v46, %v5930_v24  ;;  %v6811_v16 = vmul.f32 %v9326_v47, %v5930_v24  ;;  %v6813_v55 = vadd.f32 1e-05, %v1865_v35  ;;  %vm6818_vm11 = vmor %vm1419_vm5, %vm1420_vm10 }
 0x5bf   : > { %v6787_v49 = vmul.f32 %v9320_v8, %v5930_v24  ;;  %v6801_v8 = vmul.f32 %v9324_v17, %v5930_v24  ;;  %v1868_v36 = vsub.f32 %v1836_v51, %v1852_v43  ;;  %v6825_v45 = vadd.f32 1e-05, %v1864_v59 }
 0x5c0   : > { %4343 = vrsqrt.f32 %v6771_v5  ;;  %v1867_v47 = vsub.f32 %v1835_v27, %v1851_v6  ;;  %v1982_v35 = vmul.f32 %v6613_v0, %v1981_v29  ;;  %v1870_v51 = vsub.f32 %v1838_v20, %v1854_v18 }
 0x5c1   : > { %9321 = vst [vmem:[#allocation22_spill] sm:$0xff] %v6787_v49  ;;  %4345 = vrsqrt.f32 %v6780_v62  ;;  %v1855_v46 = vmul.f32 %v6787_v49, %v6787_v49  ;;  %v1842_v43 = vmul.f32 %v9329_v40, %v5930_v24  ;;  %vm2014_vm12 = vweird.f32 %v6624_v63 }
 0x5c2   : > { %4347 = vrsqrt.f32 %v6789_v2  ;;  %v2041_v14 = vsub.f32 1.5, %v6759_v39  ;;  %v1841_v59 = vmul.f32 %v9330_v48, %v5930_v24  ;;  %v2012_v27 = vmul.f32 %v6624_v63, %v2011_v1 }
 0x5c3   : > { %v1871_v49 = vsub.f32 %v1839_v11, %v1855_v46  ;;  %4349 = vrsqrt.f32 %v6813_v55  ;;  %v1857_v1 = vmul.f32 %v6801_v8, %v6801_v8  ;;  %v6858_v39 = vadd.f32 1e-05, %v1867_v47  ;;  %v9348_v11 = vld [vmem:[#allocation5_spill] sm:$0xff] }
 0x5c4   : > { %4351 = vrsqrt.f32 %v6825_v45  ;;  %v9333_v18 = vsub.f32 %v9285_v26, %v6471_v21  ;;  %v1956_v31 = vsel %vm6851_vm13, %v6584_v60, %v6746_v44  ;;  %vm2013_vm15 = vweird.f32 %v6548_v23 }
 0x5c5   : > { %vm6884_vm0 = vmor %vm2013_vm15, %vm2014_vm12  ;;  %v2042_v60 = vmul.f32 %v6670_v7, %v2041_v14  ;;  %vm2044_vm1 = vweird.f32 %v6670_v7  ;;  %v6890_v19 = vadd.f32 1e-05, %v1871_v49  ;;  %v1873_v44 = vsub.f32 %v1841_v59, %v1857_v1 }
 0x5c6   : > { %2813 = vadd.xlane.f32.xlu1 %v6297_v32  ;;  %v1422_v32 = vsel %vm6818_vm11, %v6636_v41, %v1418_v38  ;;  %v1858_v38 = vmul.f32 %v6811_v16, %v6811_v16  ;;  %v6843_v41 = vadd.f32 1e-05, %v1868_v36  ;;  %v6845_v29 = vpop.eup %4343  ;;  %v6878_v36 = vadd.f32 1e-05, %v1870_v51 }
 0x5c7   : > { %v1492_v20 = vmul.f32 %v1422_v32, %v9333_v18  ;;  %v6863_v6 = vpop.eup %4345  ;;  %v1986_v23 = vsel %vm6873_vm14, %v6613_v0, %v1982_v35  ;;  %v2016_v46 = vsel %vm6884_vm0, %v6624_v63, %v2012_v27  ;;  %vm2043_vm3 = vweird.f32 %v6592_v42 }
 0x5c8   : > { %v1874_v21 = vsub.f32 %v1842_v43, %v1858_v38  ;;  %v6880_v26 = vpop.eup %4347  ;;  %4353 = vrsqrt.f32 %v6843_v41  ;;  %v1908_v14 = vmul.f32 %v6845_v29, %v6771_v5  ;;  %v1928_v49 = vmul.f32 %v6863_v6, %v6780_v62  ;;  %vm6909_vm4 = vmor %vm2043_vm3, %vm2044_vm1 }
 0x5c9   : > { %4355 = vrsqrt.f32 %v6858_v39  ;;  %v1509_v0 = vmul.f32 %v6449_v37, %v1492_v20  ;;  %v6907_v47 = vpop.eup %4349  ;;  %v1938_v42 = vmul.f32 %v6880_v26, %v6789_v2  ;;  %v2808_v35 = vmul.f32 %v6197_v54, %v6712_v58  ;;  %v9361_v58 = vld [vmem:[#allocation28_spill] sm:$0xff] }
 0x5ca   : > { %2692 = vrot.lane.b32.xlu2 %v6525_v53, %s4640_s7  ;;  %4357 = vrsqrt.f32 %v6878_v36  ;;  %v6920_v32 = vpop.eup %4351  ;;  %v2046_v37 = vsel %vm6909_vm4, %v6670_v7, %v2042_v60  ;;  %v6926_v51 = vadd.f32 1e-05, %v1873_v44  ;;  %v2801_v40 = vmul.f32 %v6197_v54, %v6710_v22 }
 0x5cb   : > { %4359 = vrsqrt.f32 %v6890_v19  ;;  %v9340_v43 = vsub.f32 %v9289_v30, %v6402_v57  ;;  %v9341_v59 = vsel %vm6724_vm2, %v6544_v10, %v6699_v33  ;;  %v9342_v38 = vsub.f32 %v9292_v13, %v6440_v61 }
 0x5cc   : > { %v9343_v48 = vsub.f32 %v9295_v28, %v6481_v3  ;;  %v9344_v18 = vsub.f32 %v9290_v15, %v6485_v34  ;;  %v1909_v57 = vmul.f32 %v6845_v29, %v1908_v14  ;;  %v1929_v30 = vmul.f32 %v6863_v6, %v1928_v49 }
 0x5cd   : > { %v2068_v27 = vmul.f32 %v9341_v59, %v9340_v43  ;;  %v2071_v7 = vmul.f32 %v1956_v31, %v9342_v38  ;;  %v1968_v10 = vmul.f32 %v6907_v47, %v6813_v55  ;;  %v1526_v33 = vadd.f32 %v6525_v53, %v1509_v0  ;;  %v9347_v31 = vld [vmem:[#allocation85_spill] sm:$0xff]  ;;  %v9353_v43 = vld [vmem:[#allocation7_spill] sm:$0xff]  ;;  %v9354_v59 = vld [vmem:[#allocation12_spill] sm:$0xff] }
 0x5ce   : > { %2819 = vadd.xlane.f32.xlu1 %v6364_v25  ;;  %v6916_v25 = vadd.f32 1e-05, %v1874_v21  ;;  %v2074_v1 = vmul.f32 %v1986_v23, %v9343_v48  ;;  %v2077_v20 = vmul.f32 %v2016_v46, %v9344_v18  ;;  %v6952_v52 = vpop.eup %4353  ;;  %v9345_v61 = vsub.f32 %v9293_v9, %v6514_v50  ;;  %v9356_v18 = vld [vmem:[#allocation10_spill] sm:$0xff] }
 0x5cf   : > { %v1939_v28 = vmul.f32 %v6880_v26, %v1938_v42  ;;  %v1958_v34 = vmul.f32 %v6920_v32, %v6825_v45  ;;  %v6961_v15 = vpop.eup %4355  ;;  %v6965_v13 = vsel %vm765_vm8, %v2801_v40, 0.0  ;;  %v6968_v53 = vsel %vm765_vm8, %v2808_v35, 0.0 }
 0x5d0   : > { %v2080_v3 = vmul.f32 %v2046_v37, %v9345_v61  ;;  %4361 = vrsqrt.f32 %v6916_v25  ;;  %9346 = vst [vmem:[#allocation30_spill] sm:$0xff] %v6968_v53  ;;  %v6971_v50 = vmul.f32 %v9347_v31, %v2068_v27  ;;  %v6973_v9 = vpop.eup %4357  ;;  %v6979_v17 = vmul.f32 %v9347_v31, %v2071_v7  ;;  %v9352_v37 = vld [vmem:[#allocation6_spill] sm:$0xff] }
 0x5d1   : > { %4363 = vrsqrt.f32 %v6926_v51  ;;  %v6982_v60 = vmul.f32 %v9347_v31, %v2074_v1  ;;  %v6985_v44 = vmul.f32 %v9347_v31, %v2077_v20  ;;  %v6987_v23 = vpop.eup %4359  ;;  %v1910_v46 = vmul.f32 0.5, %v1909_v57  ;;  %v9355_v1 = vld [vmem:[#allocation71_spill] sm:$0xff]  ;;  %v9357_v57 = vld [vmem:[#allocation29_spill] sm:$0xff]  ;;  %v9360_v61 = vld [vmem:[#allocation18_spill] sm:$0xff] }
 0x5d2   : > { %v1930_v14 = vmul.f32 0.5, %v1929_v30  ;;  %v1969_v49 = vmul.f32 %v6907_v47, %v1968_v10  ;;  %v6990_v0 = vmax.f32 %v1526_v33, 0.0  ;;  %v1940_v63 = vmul.f32 0.5, %v1939_v28  ;;  %v9358_v30 = vld [vmem:[#allocation17_spill] sm:$0xff]  ;;  %v9359_v33 = vld [vmem:[#allocation22_spill] sm:$0xff] }
 0x5d3   : > { %9349 = vst [vmem:[#allocation51_spill] sm:$0xff] %v6985_v44  ;;  %v1998_v42 = vmul.f32 %v6952_v52, %v6843_v41  ;;  %v6996_v35 = vmul.f32 %v9347_v31, %v2080_v3  ;;  %v1875_v40 = vsub.f32 %v9352_v37, %v6688_v56  ;;  %v1988_v38 = vmul.f32 %v6961_v15, %v6858_v39 }
 0x5d4   : > { %9350 = vst [vmem:[#allocation35_spill] sm:$0xff] %v6990_v0  ;;  %v2018_v7 = vmul.f32 %v6973_v9, %v6878_v36  ;;  %v1878_v20 = vsub.f32 %v9356_v18, %v9355_v1  ;;  %v2028_v3 = vmul.f32 %v6987_v23, %v6890_v19  ;;  %v1931_v37 = vsub.f32 1.5, %v1930_v14  ;;  %v9362_v1 = vld [vmem:[#allocation26_spill] sm:$0xff]  ;;  %v9364_v14 = vld [vmem:[#allocation27_spill] sm:$0xff] }
 0x5d5   : > { %9351 = vst [vmem:[#allocation56_spill] sm:$0xff] %v6996_v35  ;;  %v1970_v27 = vmul.f32 0.5, %v1969_v49  ;;  %v7020_v21 = vmul.f32 %v6197_v54, %v6990_v0  ;;  %v1941_v53 = vsub.f32 1.5, %v1940_v63  ;;  %v1999_v22 = vmul.f32 %v6952_v52, %v1998_v42  ;;  %v9363_v54 = vld [vmem:[#allocation13_spill] sm:$0xff] }
 0x5d6   : > { %2825 = vadd.xlane.f32.xlu1 %v6641_v12  ;;  %v1959_v12 = vmul.f32 %v6920_v32, %v1958_v34  ;;  %v7006_v48 = vpop.eup %4361  ;;  %v1911_v34 = vsub.f32 1.5, %v1910_v46  ;;  %vm1913_vm2 = vweird.f32 %v6771_v5  ;;  %v1989_v56 = vmul.f32 %v6961_v15, %v1988_v38 }
 0x5d7   : > { %v7016_v28 = vpop.eup %4363  ;;  %v2019_v35 = vmul.f32 %v6973_v9, %v2018_v7  ;;  %v2058_v46 = vmul.f32 %v7006_v48, %v6916_v25  ;;  %vm1914_vm5 = vweird.f32 %v6845_v29  ;;  %v2029_v18 = vmul.f32 %v6987_v23, %v2028_v3 }
 0x5d8   : > { %v1960_v10 = vmul.f32 0.5, %v1959_v12  ;;  %v2048_v63 = vmul.f32 %v7016_v28, %v6926_v51  ;;  %v9365_v12 = vld [vmem:[#allocation79_spill] sm:$0xff]  ;;  %v1912_v42 = vmul.f32 %v6845_v29, %v1911_v34  ;;  %v1932_v38 = vmul.f32 %v6863_v6, %v1931_v37  ;;  %vm7044_vm10 = vmor %vm1913_vm2, %vm1914_vm5 }
 0x5d9   : > { %vm1934_vm6 = vweird.f32 %v6863_v6  ;;  %v1971_v7 = vsub.f32 1.5, %v1970_v27  ;;  %v1942_v0 = vmul.f32 %v6880_v26, %v1941_v53  ;;  %vm1944_vm7 = vweird.f32 %v6880_v26  ;;  %v9370_v53 = vld [vmem:[#allocation32_spill] sm:$0xff] }
 0x5da   : > { %v1961_v44 = vsub.f32 1.5, %v1960_v10  ;;  %v2000_v49 = vmul.f32 0.5, %v1999_v22  ;;  %vm1933_vm11 = vweird.f32 %v6780_v62  ;;  %v1990_v34 = vmul.f32 0.5, %v1989_v56  ;;  %v9386_v56 = vld [vmem:[#allocation8_spill] sm:$0xff] }
 0x5db   : > { %v2059_v37 = vmul.f32 %v7006_v48, %v2058_v46  ;;  %vm7050_vm12 = vmor %vm1933_vm11, %vm1934_vm6  ;;  %v1890_v10 = vsub.f32 %v9370_v53, %v6811_v16  ;;  %vm1943_vm13 = vweird.f32 %v6789_v2  ;;  %v2030_v22 = vmul.f32 0.5, %v2029_v18 }
 0x5dc   : > { %v2049_v5 = vmul.f32 %v7016_v28, %v2048_v63  ;;  %v1916_v62 = vsel %vm7044_vm10, %v6845_v29, %v1912_v42  ;;  %vm7066_vm14 = vmor %vm1943_vm13, %vm1944_vm7  ;;  %v1972_v46 = vmul.f32 %v6907_v47, %v1971_v7  ;;  %vm1974_vm15 = vweird.f32 %v6907_v47 }
 0x5dd   : > { %v1946_v2 = vsel %vm7066_vm14, %v6880_v26, %v1942_v0  ;;  %v1962_v29 = vmul.f32 %v6920_v32, %v1961_v44  ;;  %vm1964_vm0 = vweird.f32 %v6920_v32  ;;  %v2001_v18 = vsub.f32 1.5, %v2000_v49  ;;  %v9376_v44 = vld [vmem:[#allocation46_spill] sm:$0xff] }
 0x5de   : > { %2828 = vadd.xlane.f32.xlu1 %v9365_v12  ;;  %v2020_v12 = vmul.f32 0.5, %v2019_v35  ;;  %v1936_v35 = vsel %vm7050_vm12, %v6863_v6, %v1932_v38  ;;  %vm1973_vm1 = vweird.f32 %v6813_v55  ;;  %v1991_v6 = vsub.f32 1.5, %v1990_v34  ;;  %v9373_v38 = vld [vmem:[#allocation101_spill] sm:$0xff] }
 0x5df   : > { %v2060_v42 = vmul.f32 0.5, %v2059_v37  ;;  %v2067_v3 = vmul.f32 %v1916_v62, %v1875_v40  ;;  %vm7079_vm3 = vmor %vm1973_vm1, %vm1974_vm15  ;;  %vm1963_vm4 = vweird.f32 %v6825_v45  ;;  %v2031_v26 = vsub.f32 1.5, %v2030_v22 }
 0x5e0   : > { %v2021_v63 = vsub.f32 1.5, %v2020_v12  ;;  %v2050_v0 = vmul.f32 0.5, %v2049_v5  ;;  %v9377_v49 = vsub.f32 %v9348_v11, %v6696_v4  ;;  %v2070_v34 = vmul.f32 %v1946_v2, %v1878_v20  ;;  %vm7093_vm2 = vmor %vm1963_vm4, %vm1964_vm0 }
 0x5e1   : > { %v1976_v12 = vsel %vm7079_vm3, %v6907_v47, %v1972_v46  ;;  %vm2004_vm5 = vweird.f32 %v6952_v52  ;;  %v1966_v45 = vsel %vm7093_vm2, %v6920_v32, %v1962_v29  ;;  %v2002_v4 = vmul.f32 %v6952_v52, %v2001_v18  ;;  %v9387_v46 = vld [vmem:[#allocation34_spill] sm:$0xff]  ;;  %v9392_v29 = vld [vmem:[#allocation77_spill] sm:$0xff] }
 0x5e2   : > { %v2069_v55 = vmul.f32 %v1936_v35, %v9377_v49  ;;  %vm2003_vm6 = vweird.f32 %v6843_v41  ;;  %vm1994_vm7 = vweird.f32 %v6961_v15  ;;  %v1992_v47 = vmul.f32 %v6961_v15, %v1991_v6 }
 0x5e3   : > { %v2022_v11 = vmul.f32 %v6973_v9, %v2021_v63  ;;  %vm2024_vm10 = vweird.f32 %v6973_v9  ;;  %v2061_v20 = vsub.f32 1.5, %v2060_v42  ;;  %vm7107_vm11 = vmor %vm2003_vm6, %vm2004_vm5  ;;  %vm1993_vm12 = vweird.f32 %v6858_v39 }
 0x5e4   : > { %2816 = vadd.xlane.f32.xlu0 %v9373_v38  ;;  %v2032_v32 = vmul.f32 %v6987_v23, %v2031_v26  ;;  %vm2034_vm13 = vweird.f32 %v6987_v23  ;;  %v2051_v41 = vsub.f32 1.5, %v2050_v0  ;;  %v9382_v27 = vsub.f32 %v9362_v1, %v9361_v58  ;;  %vm7120_vm14 = vmor %vm1993_vm12, %vm1994_vm7 }
 0x5e5   : > { %v9383_v5 = vsub.f32 %v9358_v30, %v9357_v57  ;;  %vm2023_vm15 = vweird.f32 %v6878_v36  ;;  %v2087_v39 = vmul.f32 %v9347_v31, %v2067_v3  ;;  %v1884_v2 = vsub.f32 %v9387_v46, %v9386_v56  ;;  %v9416_v57 = vld [vmem:[#allocation99_spill] sm:$0xff] }
 0x5e6   : > { %2831 = vadd.xlane.f32.xlu1 %v9376_v44  ;;  %v2073_v22 = vmul.f32 %v1976_v12, %v9382_v27  ;;  %v2006_v58 = vsel %vm7107_vm11, %v6952_v52, %v2002_v4  ;;  %vm2033_vm0 = vweird.f32 %v6890_v19  ;;  %vm7134_vm1 = vmor %vm2023_vm15, %vm2024_vm10  ;;  %v2089_v30 = vmul.f32 %v9347_v31, %v2069_v55  ;;  %v9402_v55 = vld [vmem:[#allocation21_spill] sm:$0xff]  ;;  %v9411_v27 = vld [vmem:[#allocation98_spill] sm:$0xff] }
 0x5e7   : > { %v2072_v62 = vmul.f32 %v1966_v45, %v9383_v5  ;;  %v1996_v36 = vsel %vm7120_vm14, %v6961_v15, %v1992_v47  ;;  %vm7142_vm3 = vmor %vm2033_vm0, %vm2034_vm13  ;;  %v2026_v19 = vsel %vm7134_vm1, %v6973_v9, %v2022_v11  ;;  %v2062_v52 = vmul.f32 %v7006_v48, %v2061_v20  ;;  %v9393_v9 = vld [vmem:[#allocation86_spill] sm:$0xff]  ;;  %v9404_v11 = vld [vmem:[#allocation31_spill] sm:$0xff] }
 0x5e8   : > { %vm2064_vm4 = vweird.f32 %v7006_v48  ;;  %v2036_v18 = vsel %vm7142_vm3, %v6987_v23, %v2032_v32  ;;  %v2052_v15 = vmul.f32 %v7016_v28, %v2051_v41  ;;  %vm2054_vm2 = vweird.f32 %v7016_v28  ;;  %v9410_v32 = vld [vmem:[#allocation87_spill] sm:$0xff] }
 0x5e9   : > { %v2090_v6 = vmul.f32 %v9347_v31, %v2070_v34  ;;  %vm2063_vm5 = vweird.f32 %v6916_v25  ;;  %v2109_v63 = vadd.f32 %v9393_v9, %v2089_v30  ;;  %v2092_v42 = vmul.f32 %v9347_v31, %v2072_v62 }
 0x5ea   : > { %v2093_v38 = vmul.f32 %v9347_v31, %v2073_v22  ;;  %v2076_v3 = vmul.f32 %v2006_v58, %v1884_v2  ;;  %v9394_v23 = vsub.f32 %v9364_v14, %v9363_v54  ;;  %v9395_v26 = vsub.f32 %v9354_v59, %v9353_v43  ;;  %vm7169_vm6 = vmor %vm2063_vm5, %vm2064_vm4  ;;  %v9401_v14 = vld [vmem:[#allocation50_spill] sm:$0xff]  ;;  %v9415_v2 = vld [vmem:[#allocation88_spill] sm:$0xff] }
 0x5eb   : > { %vm2053_vm7 = vweird.f32 %v6926_v51  ;;  %v9398_v25 = vsub.f32 %v9360_v61, %v9359_v33  ;;  %v2066_v49 = vsel %vm7169_vm6, %v7006_v48, %v2062_v52  ;;  %v2108_v43 = vadd.f32 %v9393_v9, %v6971_v50 }
 0x5ec   : > { %2840 = vadd.xlane.f32.xlu0 %v9392_v29  ;;  %v2075_v7 = vmul.f32 %v1996_v36, %v9394_v23  ;;  %v2078_v0 = vmul.f32 %v2026_v19, %v9395_v26  ;;  %vm7180_vm10 = vmor %vm2053_vm7, %vm2054_vm2  ;;  %v2107_v59 = vadd.f32 %v9393_v9, %v2087_v39  ;;  %v2110_v33 = vadd.f32 %v9393_v9, %v2090_v6  ;;  %v9414_v39 = vld [vmem:[#allocation51_spill] sm:$0xff]  ;;  %v9418_v36 = vld [vmem:[#allocation97_spill] sm:$0xff] }
 0x5ed   : > { %v2079_v44 = vmul.f32 %v2036_v18, %v9398_v25  ;;  %v2056_v51 = vsel %vm7180_vm10, %v7016_v28, %v2052_v15  ;;  %v2111_v48 = vadd.f32 %v9393_v9, %v6979_v17  ;;  %v2112_v61 = vadd.f32 %v9393_v9, %v2092_v42  ;;  %v9420_v19 = vld [vmem:[#allocation56_spill] sm:$0xff]  ;;  %v9422_v15 = vld [vmem:[#allocation102_spill] sm:$0xff]  ;;  %v9427_v26 = vld [vmem:[#allocation23_spill] sm:$0xff] }
 0x5ee   : > { %2834 = vadd.xlane.f32.xlu1 %v6965_v13  ;;  %v1889_v34 = vsub.f32 %v9402_v55, %v6801_v8  ;;  %v2836_v50 = vsel %vm765_vm8, %v7020_v21, 0.0  ;;  %v7199_v12 = vmax.f32 %v2109_v63, 0.0  ;;  %v2113_v40 = vadd.f32 %v9393_v9, %v2093_v38  ;;  %v9421_v18 = vld [vmem:[#allocation60_spill] sm:$0xff]  ;;  %v9424_v63 = vld [vmem:[#allocation19_spill] sm:$0xff] }
 0x5ef   : > { %v2082_v28 = vmul.f32 %v2066_v49, %v1890_v10  ;;  %v2095_v45 = vmul.f32 %v9347_v31, %v2075_v7  ;;  %v2096_v17 = vmul.f32 %v9347_v31, %v2076_v3  ;;  %v2098_v4 = vmul.f32 %v9347_v31, %v2078_v0 }
 0x5f0   : > { %9403 = vst [vmem:[#allocation39_spill] sm:$0xff] %v7199_v12  ;;  %v2081_v47 = vmul.f32 %v2056_v51, %v1889_v34  ;;  %v7209_v8 = vmax.f32 %v2108_v43, 0.0  ;;  %v7211_v21 = vmax.f32 %v2107_v59, 0.0  ;;  %v2099_v20 = vmul.f32 %v9347_v31, %v2079_v44  ;;  %v9437_v34 = vld [vmem:[#allocation24_spill] sm:$0xff] }
 0x5f1   : > { %v7214_v37 = vmax.f32 %v2110_v33, 0.0  ;;  %v7216_v16 = vmax.f32 %v2111_v48, 0.0  ;;  %v7218_v53 = vmax.f32 %v2112_v61, 0.0  ;;  %v2114_v10 = vadd.f32 %v9393_v9, %v6982_v60  ;;  %v9435_v48 = vld [vmem:[#allocation73_spill] sm:$0xff]  ;;  %v9436_v61 = vld [vmem:[#allocation20_spill] sm:$0xff] }
 0x5f2   : > { %9405 = vst [vmem:[#allocation72_spill] sm:$0xff] %v7209_v8  ;;  %v7224_v41 = vmul.f32 %v9410_v32, %v5930_v24  ;;  %v7229_v22 = vsel %vm765_vm8, %v9411_v27, %v7199_v12  ;;  %v7231_v5 = vmax.f32 %v2113_v40, 0.0  ;;  %v2115_v62 = vadd.f32 %v9393_v9, %v2095_v45  ;;  %v9443_v32 = vld [vmem:[#allocation91_spill] sm:$0xff]  ;;  %v9466_v27 = vld [vmem:[#allocation52_spill] sm:$0xff] }
 0x5f3   : > { %2822 = vadd.xlane.f32.xlu2 %v9401_v14  ;;  %9406 = vst [vmem:[#allocation41_spill] sm:$0xff] %v7211_v21  ;;  %v2116_v35 = vadd.f32 %v9393_v9, %v2096_v17  ;;  %v2117_v56 = vadd.f32 %v9393_v9, %v9414_v39  ;;  %v2118_v60 = vadd.f32 %v9393_v9, %v2098_v4  ;;  %v7266_v38 = vmax.f32 %v2114_v10, 0.0  ;;  %v9440_v17 = vld [vmem:[#allocation90_spill] sm:$0xff]  ;;  %v9478_v12 = vld [vmem:[#allocation96_spill] sm:$0xff] }
 0x5f4   : > { %2849 = vadd.xlane.f32.xlu0 %v9404_v11  ;;  %9407 = vst [vmem:[#allocation67_spill] sm:$0xff] %v7214_v37  ;;  %v2119_v46 = vadd.f32 %v9393_v9, %v2099_v20  ;;  %v7241_v58 = vmul.f32 %v9415_v2, %v5930_v24  ;;  %v7246_v30 = vsel %vm765_vm8, %v9416_v57, %v7209_v8  ;;  %v7277_v13 = vmax.f32 %v2115_v62, 0.0  ;;  %v9441_v20 = vld [vmem:[#allocation83_spill] sm:$0xff] }
 0x5f5   : > { %9408 = vst [vmem:[#allocation37_spill] sm:$0xff] %v7216_v16  ;;  %v7251_v1 = vsel %vm765_vm8, %v9418_v36, %v7211_v21  ;;  %v2120_v52 = vadd.f32 %v9393_v9, %v9420_v19  ;;  %v7259_v6 = vsel %vm765_vm8, %v9422_v15, %v7214_v37  ;;  %v7264_v42 = vsel %vm765_vm8, %v9424_v63, %v7216_v16  ;;  %v9450_v2 = vld [vmem:[#allocation55_spill] sm:$0xff]  ;;  %v9467_v15 = vld [vmem:[#allocation81_spill] sm:$0xff]  ;;  %v9477_v16 = vld [vmem:[#allocation14_spill] sm:$0xff] }
 0x5f6   : > { %2837 = vadd.xlane.f32.xlu1 %v2836_v50  ;;  %9409 = vst [vmem:[#allocation36_spill] sm:$0xff] %v7218_v53  ;;  %v2101_v3 = vmul.f32 %v9347_v31, %v2081_v47  ;;  %v2434_v23 = vmul.f32 %v7224_v41, %v7224_v41  ;;  %v7275_v0 = vsel %vm765_vm8, %v9427_v26, %v7218_v53  ;;  %v7279_v44 = vmax.f32 %v2116_v35, 0.0  ;;  %v9444_v35 = vld [vmem:[#allocation35_spill] sm:$0xff] }
 0x5f7   : > { %9412 = vst [vmem:[#allocation42_spill] sm:$0xff] %v7229_v22  ;;  %v7281_v49 = vmax.f32 %v2117_v56, 0.0  ;;  %v7283_v54 = vmax.f32 %v2118_v60, 0.0  ;;  %v7285_v43 = vmax.f32 %v2119_v46, 0.0  ;;  %v2433_v59 = vmul.f32 %v7241_v58, %v7241_v58  ;;  %v9448_v56 = vld [vmem:[#allocation103_spill] sm:$0xff] }
 0x5f8   : > { %9413 = vst [vmem:[#allocation78_spill] sm:$0xff] %v7231_v5  ;;  %v7290_v33 = vmax.f32 %v2120_v52, 0.0  ;;  %v7296_v55 = vsel %vm765_vm8, %v9436_v61, %v7231_v5  ;;  %v7301_v50 = vsel %vm765_vm8, %v9437_v34, %v7266_v38  ;;  %v7304_v40 = vadd.f32 %v9393_v9, %v2101_v3  ;;  %v9452_v52 = vld [vmem:[#allocation75_spill] sm:$0xff] }
 0x5f9   : > { %9417 = vst [vmem:[#allocation76_spill] sm:$0xff] %v7246_v30  ;;  %v2374_v29 = vpop.xlane.xlu0 %2373  ;;  %v2102_v45 = vmul.f32 %v9347_v31, %v2082_v28  ;;  %v7309_v4 = vmul.f32 %v9440_v17, %v5930_v24  ;;  %v7316_v10 = vsel %vm765_vm8, %v9441_v20, %v7277_v13  ;;  %v7320_v62 = vmul.f32 %v9443_v32, %v5930_v24  ;;  %v9446_v28 = vld [vmem:[#allocation15_spill] sm:$0xff] }
 0x5fa   : > { %9419 = vst [vmem:[#allocation40_spill] sm:$0xff] %v7251_v1  ;;  %v2418_v7 = vmul.f32 %v2374_v29, %v5930_v24  ;;  %v7325_v31 = vsel %vm765_vm8, %v9444_v35, %v7279_v44  ;;  %v7330_v39 = vsel %vm765_vm8, %v9446_v28, %v7281_v49  ;;  %v7335_v60 = vsel %vm765_vm8, %v9448_v56, %v7283_v54  ;;  %v9464_v35 = vld [vmem:[#allocation11_spill] sm:$0xff] }
 0x5fb   : > { %2846 = vadd.xlane.f32.xlu2 %v9421_v18  ;;  %9423 = vst [vmem:[#allocation43_spill] sm:$0xff] %v7259_v6  ;;  %v7343_v19 = vsel %vm765_vm8, %v9450_v2, %v7285_v43  ;;  %v7348_v29 = vsel %vm765_vm8, %v9452_v52, %v7290_v33  ;;  %v9454_v18 = vld [vmem:[#allocation48_spill] sm:$0xff]  ;;  %v2437_v17 = vmul.f32 %v7309_v4, %v7309_v4  ;;  %v9469_v26 = vld [vmem:[#allocation59_spill] sm:$0xff] }
 0x5fc   : > { %9425 = vst [vmem:[#allocation61_spill] sm:$0xff] %v7264_v42  ;;  %v2450_v51 = vsub.f32 %v2418_v7, %v2434_v23  ;;  %v9455_v23 = vld [vmem:[#allocation89_spill] sm:$0xff]  ;;  %v9462_v2 = vld [vmem:[#allocation92_spill] sm:$0xff]  ;;  %v7461_v37 = vmul.f32 %v9477_v16, %v5930_v24 }
 0x5fd   : > { %9426 = vst [vmem:[#allocation80_spill] sm:$0xff] %v7266_v38  ;;  %v2371_v25 = vpop.xlane.xlu2 %2370  ;;  %v7354_v7 = vmul.f32 %v9455_v23, %v5930_v24  ;;  %v7380_v52 = vmul.f32 %v9462_v2, %v5930_v24 }
 0x5fe   : > { %9428 = vst [vmem:[#allocation82_spill] sm:$0xff] %v7275_v0  ;;  %v2417_v14 = vmul.f32 %v2371_v25, %v5930_v24  ;;  %2843 = vadd.xlane.f32.xlu1 %v9435_v48  ;;  %v7311_v47 = vadd.f32 1e-05, %v2450_v51  ;;  %v9456_v25 = vld [vmem:[#allocation94_spill] sm:$0xff]  ;;  %v7362_v48 = vadd.f32 %v9393_v9, %v2102_v45  ;;  %v9461_v9 = vld [vmem:[#allocation47_spill] sm:$0xff]  ;;  %v9465_v45 = vld [vmem:[#allocation53_spill] sm:$0xff] }
 0x5ff   : > { %9429 = vst [vmem:[#allocation38_spill] sm:$0xff] %v7277_v13  ;;  %v2435_v56 = vmul.f32 %v7354_v7, %v7354_v7  ;;  %v2438_v36 = vmul.f32 %v7380_v52, %v7380_v52 }
 0x600   : > { %9430 = vst [vmem:[#allocation44_spill] sm:$0xff] %v7279_v44  ;;  %v2449_v11 = vsub.f32 %v2417_v14, %v2433_v59  ;;  %4365 = vrsqrt.f32 %v7311_v47  ;;  %v7358_v59 = vmul.f32 %v9456_v25, %v5930_v24  ;;  %v9457_v14 = vld [vmem:[#allocation30_spill] sm:$0xff]  ;;  %v9460_v25 = vld [vmem:[#allocation49_spill] sm:$0xff]  ;;  %vm2513_vm11 = vweird.f32 %v7311_v47 }
 0x601   : > { %9431 = vst [vmem:[#allocation74_spill] sm:$0xff] %v7281_v49  ;;  %v2383_v51 = vpop.xlane.xlu0 %2382  ;;  %v9474_v49 = vld [vmem:[#allocation100_spill] sm:$0xff] }
 0x602   : > { %9432 = vst [vmem:[#allocation45_spill] sm:$0xff] %v7283_v54  ;;  %v7338_v46 = vadd.f32 1e-05, %v2449_v11  ;;  %v9459_v11 = vld [vmem:[#allocation93_spill] sm:$0xff]  ;;  %v2421_v23 = vmul.f32 %v2383_v51, %v5930_v24  ;;  %v7386_v51 = vmul.f32 %v9464_v35, %v5930_v24  ;;  %v7395_v2 = vmul.f32 %v7358_v59, %v7358_v59 }
 0x603   : > { %9433 = vst [vmem:[#allocation84_spill] sm:$0xff] %v7285_v43  ;;  %2855 = vadd.xlane.f32.xlu2 %v9457_v14  ;;  %v7368_v32 = vmul.f32 %v9459_v11, %v5930_v24  ;;  %v2436_v14 = vmul.f32 %v7320_v62, %v7320_v62  ;;  %v9463_v11 = vld [vmem:[#allocation54_spill] sm:$0xff]  ;;  %v9473_v54 = vld [vmem:[#allocation57_spill] sm:$0xff]  ;;  %v7442_v44 = vmul.f32 %v9474_v49, %v5930_v24 }
 0x604   : > { %9434 = vst [vmem:[#allocation85_spill] sm:$0xff] %v7290_v33  ;;  %4367 = vrsqrt.f32 %v7338_v46  ;;  %v2453_v34 = vsub.f32 %v2421_v23, %v2437_v17  ;;  %v9468_v17 = vld [vmem:[#allocation95_spill] sm:$0xff]  ;;  %vm2503_vm12 = vweird.f32 %v7338_v46 }
 0x605   : > { %9438 = vst [vmem:[#allocation5_spill] sm:$0xff] %v7301_v50  ;;  %v2380_v28 = vpop.xlane.xlu2 %2379  ;;  %v7406_v23 = vmul.f32 %v9468_v17, %v5930_v24  ;;  %v9471_v17 = vld [vmem:[#allocation58_spill] sm:$0xff]  ;;  %v7474_v16 = vmul.f32 %v7442_v44, %v7442_v44 }
 0x606   : > { %9439 = vst [vmem:[#allocation6_spill] sm:$0xff] %v7304_v40  ;;  %v2420_v3 = vmul.f32 %v2380_v28, %v5930_v24  ;;  %2852 = vadd.xlane.f32.xlu1 %v9467_v15  ;;  %v7400_v35 = vpop.eup %4365  ;;  %v2440_v28 = vmul.f32 %v7368_v32, %v7368_v32  ;;  %v7408_v61 = vadd.f32 1e-05, %v2453_v34  ;;  %v9470_v15 = vld [vmem:[#allocation33_spill] sm:$0xff]  ;;  %v7494_v40 = vmul.f32 %v7461_v37, %v7461_v37 }
 0x607   : > { %9442 = vst [vmem:[#allocation7_spill] sm:$0xff] %v7316_v10  ;;  %v7416_v57 = vmul.f32 %v9470_v15, %v5930_v24  ;;  %v2508_v33 = vmul.f32 %v7400_v35, %v7311_v47  ;;  %v7434_v15 = vld [vmem:[%s8918_s2 + $0x5] ss:$0 sm:$0xff]  ;;  %v7449_v5 = vmul.f32 %v7406_v23, %v7406_v23  ;;  %vm2514_vm13 = vweird.f32 %v7400_v35 }
 0x608   : > { %9445 = vst [vmem:[#allocation12_spill] sm:$0xff] %v7325_v31  ;;  %v2452_v63 = vsub.f32 %v2420_v3, %v2436_v14  ;;  %v7426_v3 = vmul.f32 %v7386_v51, %v7386_v51  ;;  %4369 = vrsqrt.f32 %v7408_v61  ;;  %2874 = vrot.lane.b32.xlu0 %v7434_v15, %s4641_s8  ;;  %v9480_v31 = vld [vmem:[#allocation63_spill] sm:$0xff]  ;;  %vm7564_vm0 = vmor %vm2513_vm11, %vm2514_vm13  ;;  %vm2543_vm1 = vweird.f32 %v7408_v61  ;;  %s4110_s8 = sshll.u32 %s4690_s19, 4 }
 0x609   : > { %9447 = vst [vmem:[#allocation71_spill] sm:$0xff] %v7330_v39  ;;  %v2377_v20 = vpop.xlane.xlu1 %2376  ;;  %v2392_v38 = vpop.xlane.xlu0 %2391  ;;  %v7457_v49 = vmul.f32 %v7416_v57, %v7416_v57  ;;  %p7747_p11 = scmp.lt.s32.totalorder %s4110_s8, 31 }
 0x60a   : > { %9449 = vst [vmem:[#allocation10_spill] sm:$0xff] %v7335_v60  ;;  %v7420_v43 = vpop.eup %4367  ;;  %v7429_v14 = vadd.f32 1e-05, %v2452_v63  ;;  %v2419_v13 = vmul.f32 %v2377_v20, %v5930_v24  ;;  %v2424_v34 = vmul.f32 %v2392_v38, %v5930_v24  ;;  %v2509_v20 = vmul.f32 %v7400_v35, %v2508_v33  ;;  %v9481_v33 = vld [vmem:[#allocation16_spill] sm:$0xff] }
 0x60b   : > { %9451 = vst [vmem:[#allocation29_spill] sm:$0xff] %v7343_v19  ;;  %v2498_v63 = vmul.f32 %v7420_v43, %v7338_v46  ;;  %v7466_v60 = vmul.f32 %v9478_v12, %v5930_v24  ;;  %vm2504_vm14 = vweird.f32 %v7420_v43  ;;  %s9633_s8 = smov (!%p7747_p11, %s4110_s8), 31 }
 0x60c   : > { %9453 = vst [vmem:[#allocation17_spill] sm:$0xff] %v7348_v29  ;;  %4371 = vrsqrt.f32 %v7429_v14  ;;  %v2451_v21 = vsub.f32 %v2419_v13, %v2435_v56  ;;  %v2456_v19 = vsub.f32 %v2424_v34, %v2440_v28  ;;  %v7478_v13 = vmul.f32 %v9481_v33, %v5930_v24  ;;  %v9486_v33 = vld [vmem:[#allocation69_spill] sm:$0xff]  ;;  %vm7577_vm2 = vmor %vm2503_vm12, %vm2504_vm14  ;;  %s4111_s19 = sshll.u32 %s9633_s8, 2  ;;  %s4592_s8 = scalar_lea.hbm %s4591_s22, 8 }
 0x60d   : > { %9458 = vst [vmem:[#allocation22_spill] sm:$0xff] %v7362_v48  ;;  %v2386_v8 = vpop.xlane.xlu2 %2385  ;;  %v2499_v53 = vmul.f32 %v7420_v43, %v2498_v63  ;;  %v2510_v10 = vmul.f32 0.5, %v2509_v20  ;;  %vm2533_vm3 = vweird.f32 %v7429_v14  ;;  %s7857_s30 = scalar_lea.vmem %s8919_s3, %s4111_s19  ;;  %p4593_p12 = scmp.ne.s32.totalorder %s4591_s22, %s4592_s8 }
 0x60e   : > { %9472 = vst [vmem:[#allocation18_spill] sm:$0xff] %v7434_v15  ;;  %v9476_v15 = vld [vmem:[#allocation64_spill] sm:$0xff]  ;;  %v2422_v38 = vmul.f32 %v2386_v8, %v5930_v24  ;;  %v7480_v56 = vadd.f32 1e-05, %v2451_v21  ;;  %v7482_v12 = vpop.eup %4369  ;;  %v9484_v8 = vld [vmem:[#allocation9_spill] sm:$0xff]  ;;  %v7513_v20 = vmul.f32 %v7478_v13, %v7478_v13  ;;  %p4598_p2 = scmp.lt.s32.totalorder %s4596_s28, %s4592_s8 }
 0x60f   : > { %9475 = vst [vmem:[#allocation28_spill] sm:$0xff] %v7442_v44  ;;  %v7488_v34 = vmul.f32 %v9484_v8, %v5930_v24  ;;  %v7490_v39 = vadd.f32 1e-05, %v2456_v19  ;;  %v2538_v48 = vmul.f32 %v7482_v12, %v7408_v61  ;;  %v7504_v8 = vmul.f32 %v7466_v60, %v7466_v60  ;;  %v9489_v44 = vld [vmem:[#allocation70_spill] sm:$0xff]  ;;  %p4594_p13 = pnand %p4593_p12, %p4707_p5 }
 0x610   : > { %9479 = vst [vmem:[#allocation26_spill] sm:$0xff] %v7466_v60  ;;  %v2454_v50 = vsub.f32 %v2422_v38, %v2438_v36  ;;  %v2500_v19 = vmul.f32 0.5, %v2499_v53  ;;  %4373 = vrsqrt.f32 %v7480_v56  ;;  %v2511_v63 = vsub.f32 1.5, %v2510_v10  ;;  %p4599_p3 = por %p4598_p2, %p4597_p1 }
 0x611   : > { %9482 = vst [vmem:[#allocation13_spill] sm:$0xff] %v7478_v13  ;;  %v2389_v38 = vpop.xlane.xlu1 %2388  ;;  %v2539_v21 = vmul.f32 %v7482_v12, %v2538_v48  ;;  %v2401_v29 = vpop.xlane.xlu0 %2400  ;;  %4375 = vrsqrt.f32 %v7490_v39  ;;  %vm2544_vm15 = vweird.f32 %v7482_v12  ;;  %vm2523_vm5 = vweird.f32 %v7480_v56  ;;  %p4595_p0 = pneg %p4594_p13 }
 0x612   : > { %9485 = vst [vmem:[#allocation27_spill] sm:$0xff] %v7488_v34  ;;  %v7500_v42 = vpop.eup %4371  ;;  %v7507_v36 = vadd.f32 1e-05, %v2454_v50  ;;  %v7522_v50 = vmul.f32 %v7488_v34, %v7488_v34  ;;  %v2501_v60 = vsub.f32 1.5, %v2500_v19  ;;  %v2423_v28 = vmul.f32 %v2389_v38, %v5930_v24  ;;  %vm7593_vm6 = vmor %vm2543_vm1, %vm2544_vm15 }
 0x613   : > { %v2528_v22 = vmul.f32 %v7500_v42, %v7429_v14  ;;  %v2540_v1 = vmul.f32 0.5, %v2539_v21  ;;  %v2427_v6 = vmul.f32 %v2401_v29, %v5930_v24  ;;  %v2512_v29 = vmul.f32 %v7400_v35, %v2511_v63  ;;  %p4600_p4 = pnand %p4599_p3, %p4595_p0 }
 0x614   : > { %4377 = vrsqrt.f32 %v7507_v36  ;;  %vm2534_vm4 = vweird.f32 %v7500_v42  ;;  %vm2573_vm10 = vweird.f32 %v7490_v39  ;;  %vm2553_vm13 = vweird.f32 %v7507_v36 }
 0x615   : > { %v2529_v48 = vmul.f32 %v7500_v42, %v2528_v22  ;;  %v2395_v30 = vpop.xlane.xlu2 %2394  ;;  %v2541_v0 = vsub.f32 1.5, %v2540_v1  ;;  %v2455_v22 = vsub.f32 %v2423_v28, %v7395_v2  ;;  %v2459_v21 = vsub.f32 %v2427_v6, %v7449_v5  ;;  %vm7607_vm7 = vmor %vm2533_vm3, %vm2534_vm4 }
 0x616   : > { %v2425_v13 = vmul.f32 %v2395_v30, %v5930_v24  ;;  %v7534_v10 = vpop.eup %4373 }
 0x617   : > { %v2530_v53 = vmul.f32 0.5, %v2529_v48  ;;  %v2518_v38 = vmul.f32 %v7534_v10, %v7480_v56  ;;  %v7544_v1 = vpop.eup %4375  ;;  %v2502_v48 = vmul.f32 %v7420_v43, %v2501_v60  ;;  %v7548_v34 = vadd.f32 1e-05, %v2455_v22 }
 0x618   : > { %v2457_v19 = vsub.f32 %v2425_v13, %v7457_v49  ;;  %v7550_v2 = vadd.f32 1e-05, %v2459_v21  ;;  %v2542_v49 = vmul.f32 %v7482_v12, %v2541_v0  ;;  %v2568_v63 = vmul.f32 %v7544_v1, %v7490_v39 }
 0x619   : > { %v2531_v30 = vsub.f32 1.5, %v2530_v53  ;;  %v2398_v5 = vpop.xlane.xlu1 %2397  ;;  %v2519_v13 = vmul.f32 %v7534_v10, %v2518_v38  ;;  %4379 = vrsqrt.f32 %v7548_v34  ;;  %v2410_v21 = vpop.xlane.xlu0 %2409  ;;  %v2516_v38 = vsel %vm7564_vm0, %v7400_v35, %v2512_v29 }
 0x61a   : > { %v7552_v6 = vpop.eup %4377  ;;  %v7558_v28 = vadd.f32 1e-05, %v2457_v19  ;;  %v2569_v61 = vmul.f32 %v7544_v1, %v2568_v63  ;;  %v2506_v46 = vsel %vm7577_vm2, %v7420_v43, %v2502_v48  ;;  %4381 = vrsqrt.f32 %v7550_v2 }
 0x61b   : > { %v2548_v0 = vmul.f32 %v7552_v6, %v7507_v36  ;;  %v2532_v47 = vmul.f32 %v7500_v42, %v2531_v30  ;;  %v2520_v22 = vmul.f32 0.5, %v2519_v13  ;;  %v2546_v63 = vsel %vm7593_vm6, %v7482_v12, %v2542_v49 }
 0x61c   : > { %v2570_v35 = vmul.f32 0.5, %v2569_v61  ;;  %4383 = vrsqrt.f32 %v7558_v28  ;;  %v2426_v48 = vmul.f32 %v2398_v5, %v5930_v24  ;;  %v9498_v12 = vsub.f32 %v9460_v25, %v7224_v41 }
 0x61d   : > { %v2404_v19 = vpop.xlane.xlu2 %2403  ;;  %v2549_v13 = vmul.f32 %v7552_v6, %v2548_v0  ;;  %v2521_v60 = vsub.f32 1.5, %v2520_v22  ;;  %v2430_v0 = vmul.f32 %v2410_v21, %v5930_v24  ;;  %v9499_v53 = vsub.f32 %v9454_v18, %v7241_v58 }
 0x61e   : > { %v7617_v49 = vmul.f32 %v2516_v38, %v9498_v12  ;;  %v2536_v22 = vsel %vm7607_vm7, %v7500_v42, %v2532_v47  ;;  %v2428_v61 = vmul.f32 %v2404_v19, %v5930_v24  ;;  %v9500_v5 = vsub.f32 %v9463_v11, %v7309_v4 }
 0x61f   : > { %v2550_v29 = vmul.f32 0.5, %v2549_v13  ;;  %v7622_v14 = vmul.f32 %v2506_v46, %v9499_v53  ;;  %vm2524_vm11 = vweird.f32 %v7534_v10  ;;  %v2571_v41 = vsub.f32 1.5, %v2570_v35  ;;  %v7635_v58 = vpop.eup %4379 }
 0x620   : > { %v7631_v21 = vmul.f32 %v2546_v63, %v9500_v5  ;;  %v2458_v25 = vsub.f32 %v2426_v48, %v7426_v3  ;;  %v2522_v18 = vmul.f32 %v7534_v10, %v2521_v60  ;;  %vm2574_vm12 = vweird.f32 %v7544_v1  ;;  %v7641_v4 = vpop.eup %4381  ;;  %vm7664_vm0 = vmor %vm2523_vm5, %vm2524_vm11 }
 0x621   : > { %v2407_v38 = vpop.xlane.xlu1 %2406  ;;  %v2551_v42 = vsub.f32 1.5, %v2550_v29  ;;  %vm2554_vm14 = vweird.f32 %v7552_v6  ;;  %v9501_v11 = vsub.f32 %v9461_v9, %v7320_v62  ;;  %v2558_v3 = vmul.f32 %v7635_v58, %v7548_v34  ;;  %vm7688_vm2 = vmor %vm2573_vm10, %vm2574_vm12 }
 0x622   : > { %vm2563_vm15 = vweird.f32 %v7548_v34  ;;  %v2462_v19 = vsub.f32 %v2430_v0, %v7494_v40  ;;  %v7652_v46 = vpop.eup %4383  ;;  %v2598_v30 = vmul.f32 %v7641_v4, %v7550_v2  ;;  %v7656_v13 = vadd.f32 1e-05, %v2458_v25  ;;  %vm7709_vm6 = vmor %vm2553_vm13, %vm2554_vm14 }
 0x623   : > { %v7646_v47 = vmul.f32 %v2536_v22, %v9501_v11  ;;  %v2460_v63 = vsub.f32 %v2428_v61, %v7504_v8  ;;  %v2429_v62 = vmul.f32 %v2407_v38, %v5930_v24  ;;  %v2572_v40 = vmul.f32 %v7544_v1, %v2571_v41 }
 0x624   : > { %v2559_v60 = vmul.f32 %v7635_v58, %v2558_v3  ;;  %vm2603_vm1 = vweird.f32 %v7550_v2  ;;  %v2578_v35 = vmul.f32 %v7652_v46, %v7558_v28  ;;  %v2526_v43 = vsel %vm7664_vm0, %v7534_v10, %v2522_v18 }
 0x625   : > { %v2413_v8 = vpop.xlane.xlu2 %2412  ;;  %v2552_v56 = vmul.f32 %v7552_v6, %v2551_v42  ;;  %v2599_v29 = vmul.f32 %v7641_v4, %v2598_v30  ;;  %vm2583_vm3 = vweird.f32 %v7558_v28  ;;  %4385 = vrsqrt.f32 %v7656_v13 }
 0x626   : > { %v2560_v48 = vmul.f32 0.5, %v2559_v60  ;;  %vm2564_vm4 = vweird.f32 %v7635_v58  ;;  %v2579_v0 = vmul.f32 %v7652_v46, %v2578_v35  ;;  %v7682_v12 = vadd.f32 1e-05, %v2462_v19 }
 0x627   : > { %v2600_v53 = vmul.f32 0.5, %v2599_v29  ;;  %v7692_v22 = vadd.f32 1e-05, %v2460_v63  ;;  %v2461_v61 = vsub.f32 %v2429_v62, %v7474_v16  ;;  %v2431_v5 = vmul.f32 %v2413_v8, %v5930_v24  ;;  %vm2565_vm7 = vmor %vm2563_vm15, %vm2564_vm4 }
 0x628   : > { %v2576_v41 = vsel %vm7688_vm2, %v7544_v1, %v2572_v40  ;;  %v2561_v25 = vsub.f32 1.5, %v2560_v48  ;;  %v2580_v38 = vmul.f32 0.5, %v2579_v0  ;;  %4387 = vrsqrt.f32 %v7682_v12 }
 0x629   : > { %v2416_v39 = vpop.xlane.xlu1 %2415  ;;  %v2601_v18 = vsub.f32 1.5, %v2600_v53  ;;  %vm2604_vm5 = vweird.f32 %v7641_v4  ;;  %4389 = vrsqrt.f32 %v7692_v22  ;;  %v7702_v42 = vadd.f32 1e-05, %v2461_v61 }
 0x62a   : > { %v2562_v1 = vmul.f32 %v7635_v58, %v2561_v25  ;;  %v2581_v11 = vsub.f32 1.5, %v2580_v38  ;;  %v2463_v3 = vsub.f32 %v2431_v5, %v7522_v50  ;;  %v2432_v19 = vmul.f32 %v2416_v39, %v5930_v24  ;;  %vm7738_vm11 = vmor %vm2603_vm1, %vm2604_vm5 }
 0x62b   : > { %v7716_v30 = vpop.eup %4385  ;;  %v2556_v63 = vsel %vm7709_vm6, %v7552_v6, %v2552_v56  ;;  %v2602_v36 = vmul.f32 %v7641_v4, %v2601_v18  ;;  %vm2584_vm10 = vweird.f32 %v7652_v46  ;;  %4391 = vrsqrt.f32 %v7702_v42 }
 0x62c   : > { %v9508_v24 = vsub.f32 %v9465_v45, %v7354_v7  ;;  %v2566_v62 = vsel %vm2565_vm7, %v7635_v58, %v2562_v1  ;;  %v2582_v6 = vmul.f32 %v7652_v46, %v2581_v11  ;;  %v2588_v9 = vmul.f32 %v7716_v30, %v7656_v13  ;;  %vm7776_vm12 = vmor %vm2583_vm3, %vm2584_vm10 }
 0x62d   : > { %v9512_v7 = vsub.f32 %v9466_v27, %v7358_v59  ;;  %v2606_v2 = vsel %vm7738_vm11, %v7641_v4, %v2602_v36  ;;  %v7757_v58 = vadd.f32 1e-05, %v2463_v3  ;;  %v2464_v40 = vsub.f32 %v2432_v19, %v7513_v20 }
 0x62e   : > { %v7731_v50 = vmul.f32 %v2526_v43, %v9508_v24  ;;  %v7760_v60 = vpop.eup %4387  ;;  %v9513_v35 = vsub.f32 %v9469_v26, %v7368_v32  ;;  %v9514_v43 = vsub.f32 %v9471_v17, %v7380_v52  ;;  %v2589_v20 = vmul.f32 %v7716_v30, %v2588_v9  ;;  %v7782_v26 = vpop.permute.xlu0 %2673 }
 0x62f   : > { %v2663_v45 = vmul.f32 %v2566_v62, %v9512_v7  ;;  %vm2593_vm13 = vweird.f32 %v7656_v13  ;;  %v7784_v32 = vpop.eup %4389  ;;  %v2586_v52 = vsel %vm7776_vm12, %v7652_v46, %v2582_v6  ;;  %v2628_v17 = vmul.f32 %v7760_v60, %v7682_v12  ;;  %v7802_v46 = vpop.permute.xlu2 %2692 }
 0x630   : > { %v7765_v8 = vmul.f32 %v2576_v41, %v9513_v35  ;;  %v7770_v27 = vmul.f32 %v2556_v63, %v9514_v43  ;;  %vm2633_vm14 = vweird.f32 %v7682_v12  ;;  %4393 = vrsqrt.f32 %v7757_v58 }
 0x631   : > { %vm2775_vm15 = vcmask 781312   ;;  %v9517_v28 = vsub.f32 %v9476_v15, %v7406_v23  ;;  %v2590_v56 = vmul.f32 0.5, %v2589_v20  ;;  %vm2594_vm0 = vweird.f32 %v7716_v30  ;;  %v7810_v48 = vpop.eup %4391  ;;  %v9525_v20 = vld [vmem:[#allocation26_spill] sm:$0xff] }
 0x632   : > { %v2608_v29 = vmul.f32 %v7784_v32, %v7692_v22  ;;  %vm2613_vm1 = vweird.f32 %v7692_v22  ;;  %v2629_v23 = vmul.f32 %v7760_v60, %v2628_v17  ;;  %v7813_v15 = vadd.f32 1e-05, %v2464_v40  ;;  %vm7838_vm5 = vmor %vm2593_vm13, %vm2594_vm0 }
 0x633   : > { %v7796_v4 = vmul.f32 %v2606_v2, %v9517_v28  ;;  %v2682_v0 = vmul.f32 %v7782_v26, %v2663_v45  ;;  %v2677_v10 = vmul.f32 %v7782_v26, %v7617_v49  ;;  %v9518_v53 = vsub.f32 %v9480_v31, %v7416_v57 }
 0x634   : > { %v2591_v5 = vsub.f32 1.5, %v2590_v56  ;;  %v2609_v41 = vmul.f32 %v7784_v32, %v2608_v29  ;;  %v2618_v25 = vmul.f32 %v7810_v48, %v7702_v42  ;;  %v2630_v38 = vmul.f32 0.5, %v2629_v23 }
 0x635   : > { %v7821_v61 = vmul.f32 %v2586_v52, %v9518_v53  ;;  %vm2634_vm3 = vweird.f32 %v7760_v60  ;;  %vm2623_vm4 = vweird.f32 %v7702_v42  ;;  %4395 = vrsqrt.f32 %v7813_v15 }
 0x636   : > { %v2701_v49 = vadd.f32 %v7802_v46, %v2682_v0  ;;  %v2592_v39 = vmul.f32 %v7716_v30, %v2591_v5  ;;  %v2610_v57 = vmul.f32 0.5, %v2609_v41  ;;  %vm2614_vm2 = vweird.f32 %v7784_v32  ;;  %v4394_v18 = vpop.eup %4393  ;;  %vm2635_vm10 = vmor %vm2633_vm14, %vm2634_vm3  ;;  %v9530_v5 = vld [vmem:[#allocation40_spill] sm:$0xff] }
 0x637   : > { %v2619_v31 = vmul.f32 %v7810_v48, %v2618_v25  ;;  %v2631_v1 = vsub.f32 1.5, %v2630_v38  ;;  %v2696_v3 = vadd.f32 %v7802_v46, %v2677_v10  ;;  %v2676_v19 = vmul.f32 %v7782_v26, %v7622_v14  ;;  %vm2615_vm11 = vmor %vm2613_vm1, %vm2614_vm2 }
 0x638   : > { %v7842_v11 = vmax.f32 %v2701_v49, 0.0  ;;  %v2596_v63 = vsel %vm7838_vm5, %v7716_v30, %v2592_v39  ;;  %v2611_v36 = vsub.f32 1.5, %v2610_v57  ;;  %v2638_v13 = vmul.f32 %v4394_v18, %v7757_v58 }
 0x639   : > { %v2620_v24 = vmul.f32 0.5, %v2619_v31  ;;  %vm2643_vm6 = vweird.f32 %v7757_v58  ;;  %v2632_v62 = vmul.f32 %v7760_v60, %v2631_v1  ;;  %vm2624_vm7 = vweird.f32 %v7810_v48  ;;  %v9534_v58 = vld [vmem:[#allocation27_spill] sm:$0xff] }
 0x63a   : > { %9521 = vst [vmem:[#allocation79_spill] sm:$0xff] %v7842_v11  ;;  %v2749_v14 = vsel %vm782_vm9, %v7296_v55, %v7842_v11  ;;  %v2679_v30 = vmul.f32 %v7782_v26, %v7646_v47  ;;  %v2612_v34 = vmul.f32 %v7784_v32, %v2611_v36  ;;  %v2639_v9 = vmul.f32 %v4394_v18, %v2638_v13  ;;  %vm7906_vm14 = vmor %vm2623_vm4, %vm2624_vm7 }
 0x63b   : > { %v2621_v6 = vsub.f32 1.5, %v2620_v24  ;;  %v2765_v7 = vpack.c.bf16 %v2749_v14, %v2749_v14  ;;  %v7869_v45 = vpop.eup %4395  ;;  %v9522_v2 = vsub.f32 %v9473_v54, %v7386_v51  ;;  %v2636_v47 = vsel %vm2635_vm10, %v7760_v60, %v2632_v62  ;;  %v9524_v60 = vld [vmem:[#allocation68_spill] sm:$0xff]  ;;  %v9537_v62 = vld [vmem:[#allocation43_spill] sm:$0xff] }
 0x63c   : > { %v7881_v12 = vmax.f32 %v2696_v3, 0.0  ;;  %v2695_v40 = vadd.f32 %v7802_v46, %v2676_v19  ;;  %v9523_v35 = vsub.f32 %v9486_v33, %v7461_v37  ;;  %v2616_v59 = vsel %vm2615_vm11, %v7784_v32, %v2612_v34  ;;  %v9527_v37 = vld [vmem:[#allocation76_spill] sm:$0xff]  ;;  %v9531_v3 = vld [vmem:[#allocation62_spill] sm:$0xff] }
 0x63d   : > { %v7874_v55 = vmul.f32 %v2596_v63, %v9522_v2  ;;  %v2622_v54 = vmul.f32 %v7810_v48, %v2621_v6  ;;  %v2640_v51 = vmul.f32 0.5, %v2639_v9  ;;  %2782 = vst.msk [vmem:[%s7857_s30 + $0x18] sm:$0xf] %vm2775_vm15, %v2765_v7  ;;  %v9526_v52 = vsub.f32 %v9524_v60, %v9525_v20  ;;  %v9539_v6 = vld [vmem:[#allocation17_spill] sm:$0xff] }
 0x63e   : > { %v2670_v43 = vmul.f32 %v2636_v47, %v9523_v35  ;;  %vm2644_vm12 = vweird.f32 %v4394_v18  ;;  %v2648_v17 = vmul.f32 %v7869_v45, %v7813_v15  ;;  %vm2653_vm13 = vweird.f32 %v7813_v15  ;;  %v9543_v20 = vld [vmem:[#allocation65_spill] sm:$0xff] }
 0x63f   : > { %v7894_v22 = vmul.f32 %v2616_v59, %v9526_v52  ;;  %v2744_v33 = vsel %vm782_vm9, %v9527_v37, %v7881_v12  ;;  %v2641_v28 = vsub.f32 1.5, %v2640_v51  ;;  %vm2654_vm0 = vweird.f32 %v7869_v45  ;;  %vm2645_vm1 = vmor %vm2643_vm6, %vm2644_vm12  ;;  %v9544_v52 = vld [vmem:[#allocation13_spill] sm:$0xff] }
 0x640   : > { %v2760_v56 = vpack.c.bf16 %v2744_v33, %v2744_v33  ;;  %v7911_v29 = vmax.f32 %v2695_v40, 0.0  ;;  %v2626_v23 = vsel %vm7906_vm14, %v7810_v48, %v2622_v54  ;;  %v2649_v0 = vmul.f32 %v7869_v45, %v2648_v17  ;;  %vm2655_vm3 = vmor %vm2653_vm13, %vm2654_vm0  ;;  %v9540_v40 = vld [vmem:[#allocation42_spill] sm:$0xff]  ;;  %v9546_v33 = vld [vmem:[#allocation61_spill] sm:$0xff] }
 0x641   : > { %v2689_v10 = vmul.f32 %v7782_v26, %v2670_v43  ;;  %v2698_v42 = vadd.f32 %v7802_v46, %v2679_v30  ;;  %v2642_v53 = vmul.f32 %v4394_v18, %v2641_v28  ;;  %v2678_v25 = vmul.f32 %v7782_v26, %v7731_v50  ;;  %v9541_v43 = vld [vmem:[#allocation82_spill] sm:$0xff] }
 0x642   : > { %2777 = vst.msk [vmem:[%s7857_s30 + $0x4] sm:$0xf] %vm2775_vm15, %v2760_v56  ;;  %v2743_v41 = vsel %vm782_vm9, %v9530_v5, %v7911_v29  ;;  %v2681_v48 = vmul.f32 %v7782_v26, %v7770_v27  ;;  %v2650_v38 = vmul.f32 0.5, %v2649_v0  ;;  %v2680_v50 = vmul.f32 %v7782_v26, %v7631_v21  ;;  %v9532_v27 = vld [vmem:[#allocation28_spill] sm:$0xff]  ;;  %v9548_v5 = vld [vmem:[#allocation22_spill] sm:$0xff] }
 0x643   : > { %v2759_v49 = vpack.c.bf16 %v2743_v41, %v2743_v41  ;;  %v2708_v39 = vadd.f32 %v7802_v46, %v2689_v10  ;;  %v7932_v57 = vmax.f32 %v2698_v42, 0.0  ;;  %v2646_v31 = vsel %vm2645_vm1, %v4394_v18, %v2642_v53 }
 0x644   : > { %v2697_v16 = vadd.f32 %v7802_v46, %v2678_v25  ;;  %v2700_v1 = vadd.f32 %v7802_v46, %v2681_v48  ;;  %v9533_v19 = vsub.f32 %v9531_v3, %v9532_v27  ;;  %v9535_v36 = vsub.f32 %v9489_v44, %v9534_v58  ;;  %v9555_v27 = vld [vmem:[#allocation6_spill] sm:$0xff] }
 0x645   : > { %v2651_v13 = vsub.f32 1.5, %v2650_v38  ;;  %2776 = vst.msk [vmem:[%s7857_s30] sm:$0xf] %vm2775_vm15, %v2759_v49  ;;  %v7946_v18 = vmax.f32 %v2708_v39, 0.0  ;;  %v2746_v14 = vsel %vm782_vm9, %v9537_v62, %v7932_v57  ;;  %v2699_v34 = vadd.f32 %v7802_v46, %v2680_v50 }
 0x646   : > { %v2669_v63 = vmul.f32 %v2626_v23, %v9533_v19  ;;  %v2671_v24 = vmul.f32 %v2646_v31, %v9535_v36  ;;  %v7951_v30 = vmax.f32 %v2697_v16, 0.0  ;;  %v7953_v21 = vmax.f32 %v2700_v1, 0.0  ;;  %v9558_v36 = vld [vmem:[#allocation71_spill] sm:$0xff] }
 0x647   : > { %9536 = vst [vmem:[#allocation32_spill] sm:$0xff] %v7946_v18  ;;  %v2652_v44 = vmul.f32 %v7869_v45, %v2651_v13  ;;  %v2756_v9 = vsel %vm782_vm9, %v9539_v6, %v7946_v18  ;;  %v2762_v7 = vpack.c.bf16 %v2746_v14, %v2746_v14  ;;  %v2684_v2 = vmul.f32 %v7782_v26, %v7821_v61 }
 0x648   : > { %9538 = vst [vmem:[#allocation101_spill] sm:$0xff] %v7953_v21  ;;  %v2772_v47 = vpack.c.bf16 %v2756_v9, %v2756_v9  ;;  %v2745_v35 = vsel %vm782_vm9, %v9540_v40, %v7951_v30  ;;  %v2748_v59 = vsel %vm782_vm9, %v9541_v43, %v7953_v21  ;;  %v7972_v54 = vmax.f32 %v2699_v34, 0.0 }
 0x649   : > { %v2656_v61 = vsel %vm2655_vm3, %v7869_v45, %v2652_v44  ;;  %2779 = vst.msk [vmem:[%s7857_s30 + $0xc] sm:$0xf] %vm2775_vm15, %v2762_v7  ;;  %v2761_v51 = vpack.c.bf16 %v2745_v35, %v2745_v35  ;;  %v2764_v15 = vpack.c.bf16 %v2748_v59, %v2748_v59  ;;  %v2703_v60 = vadd.f32 %v7802_v46, %v2684_v2  ;;  %v9561_v44 = vld [vmem:[#allocation29_spill] sm:$0xff]  ;;  %v9562_v2 = vld [vmem:[#allocation10_spill] sm:$0xff] }
 0x64a   : > { %9542 = vst [vmem:[#allocation46_spill] sm:$0xff] %v7972_v54  ;;  %v9545_v17 = vsub.f32 %v9543_v20, %v9544_v52  ;;  %v2747_v32 = vsel %vm782_vm9, %v9546_v33, %v7972_v54  ;;  %v2683_v45 = vmul.f32 %v7782_v26, %v7765_v8  ;;  %v2686_v28 = vmul.f32 %v7782_v26, %v7796_v4  ;;  %v9564_v35 = vld [vmem:[#allocation25_spill] sm:$0xff]  ;;  %v9566_v20 = vld [vmem:[#allocation66_spill] sm:$0xff] }
 0x64b   : > { %2789 = vst.msk [vmem:[%s7857_s30 + $0x34] sm:$0xf] %vm2775_vm15, %v2772_v47  ;;  %v2763_v56 = vpack.c.bf16 %v2747_v32, %v2747_v32  ;;  %v7992_v23 = vmax.f32 %v2703_v60, 0.0  ;;  %v2685_v0 = vmul.f32 %v7782_v26, %v7874_v55  ;;  %v2688_v10 = vmul.f32 %v7782_v26, %v2669_v63  ;;  %v9550_v55 = vld [vmem:[#allocation7_spill] sm:$0xff]  ;;  %v9557_v63 = vld [vmem:[#allocation5_spill] sm:$0xff] }
 0x64c   : > { %v2672_v37 = vmul.f32 %v2656_v61, %v9545_v17  ;;  %2778 = vst.msk [vmem:[%s7857_s30 + $0x8] sm:$0xf] %vm2775_vm15, %v2761_v51  ;;  %v2702_v42 = vadd.f32 %v7802_v46, %v2683_v45  ;;  %v2705_v53 = vadd.f32 %v7802_v46, %v2686_v28  ;;  %v2687_v8 = vmul.f32 %v7782_v26, %v7894_v22  ;;  %v9567_v28 = vld [vmem:[#allocation39_spill] sm:$0xff] }
 0x64d   : > { %9547 = vst [vmem:[#allocation8_spill] sm:$0xff] %v7992_v23  ;;  %v8005_v41 = vmax.f32 %v9548_v5, 0.0  ;;  %v2751_v25 = vsel %vm782_vm9, %v9550_v55, %v7992_v23  ;;  %v2704_v48 = vadd.f32 %v7802_v46, %v2685_v0  ;;  %v2707_v38 = vadd.f32 %v7802_v46, %v2688_v10  ;;  %v9568_v0 = vld [vmem:[#allocation72_spill] sm:$0xff]  ;;  %v9571_v5 = vld [vmem:[#allocation37_spill] sm:$0xff] }
 0x64e   : > { %2781 = vst.msk [vmem:[%s7857_s30 + $0x14] sm:$0xf] %vm2775_vm15, %v2764_v15  ;;  %v2691_v4 = vmul.f32 %v7782_v26, %v2672_v37  ;;  %v2767_v49 = vpack.c.bf16 %v2751_v25, %v2751_v25  ;;  %v8014_v39 = vmax.f32 %v2702_v42, 0.0  ;;  %v8016_v22 = vmax.f32 %v2705_v53, 0.0  ;;  %v9569_v42 = vld [vmem:[#allocation41_spill] sm:$0xff]  ;;  %v9572_v25 = vld [vmem:[#allocation36_spill] sm:$0xff] }
 0x64f   : > { %9549 = vst [vmem:[#allocation34_spill] sm:$0xff] %v8005_v41  ;;  %v2706_v31 = vadd.f32 %v7802_v46, %v2687_v8  ;;  %v8019_v16 = vmax.f32 %v2704_v48, 0.0  ;;  %v8021_v1 = vmax.f32 %v2707_v38, 0.0  ;;  %v2690_v3 = vmul.f32 %v7782_v26, %v2671_v24  ;;  %v9560_v26 = vld [vmem:[#allocation12_spill] sm:$0xff]  ;;  %v9570_v8 = vld [vmem:[#allocation67_spill] sm:$0xff]  ;;  %v9573_v38 = vld [vmem:[#allocation78_spill] sm:$0xff] }
 0x650   : > { %2780 = vst.msk [vmem:[%s7857_s30 + $0x10] sm:$0xf] %vm2775_vm15, %v2763_v56  ;;  %v2710_v50 = vadd.f32 %v7802_v46, %v2691_v4  ;;  %v8026_v19 = vmax.f32 %v9555_v27, 0.0  ;;  %v2750_v58 = vsel %vm782_vm9, %v9557_v63, %v8014_v39  ;;  %v2753_v13 = vsel %vm782_vm9, %v9558_v36, %v8016_v22  ;;  %v8099_v63 = vpop.xlane.xlu1 %2810 }
 0x651   : > { %9551 = vst [vmem:[#allocation77_spill] sm:$0xff] %v8014_v39  ;;  %v8036_v62 = vmax.f32 %v2706_v31, 0.0  ;;  %v2766_v14 = vpack.c.bf16 %v2750_v58, %v2750_v58  ;;  %v2769_v34 = vpack.c.bf16 %v2753_v13, %v2753_v13  ;;  %v2752_v24 = vsel %vm782_vm9, %v9560_v26, %v8019_v16  ;;  %v9574_v31 = vld [vmem:[#allocation80_spill] sm:$0xff]  ;;  %v9577_v13 = vld [vmem:[#allocation74_spill] sm:$0xff] }
 0x652   : > { %9552 = vst [vmem:[#allocation86_spill] sm:$0xff] %v8016_v22  ;;  %v2755_v6 = vsel %vm782_vm9, %v9561_v44, %v8021_v1  ;;  %v2768_v9 = vpack.c.bf16 %v2752_v24, %v2752_v24  ;;  %v8047_v40 = vmax.f32 %v2710_v50, 0.0  ;;  %v2742_v43 = vsel %vm765_vm8, %v9564_v35, %v8005_v41  ;;  %v9576_v58 = vld [vmem:[#allocation44_spill] sm:$0xff] }
 0x653   : > { %9553 = vst [vmem:[#allocation50_spill] sm:$0xff] %v8019_v16  ;;  %v2771_v7 = vpack.c.bf16 %v2755_v6, %v2755_v6  ;;  %v2754_v47 = vsel %vm782_vm9, %v9562_v2, %v8036_v62  ;;  %v2709_v61 = vadd.f32 %v7802_v46, %v2690_v3  ;;  %v2741_v52 = vsel %vm765_vm8, %v9566_v20, %v8026_v19  ;;  %v9575_v3 = vld [vmem:[#allocation38_spill] sm:$0xff]  ;;  %v9579_v44 = vld [vmem:[#allocation84_spill] sm:$0xff] }
 0x654   : > { %9554 = vst [vmem:[#allocation21_spill] sm:$0xff] %v8021_v1  ;;  %v2770_v59 = vpack.c.bf16 %v2754_v47, %v2754_v47  ;;  %v2758_v51 = vsel %vm782_vm9, %v2742_v43, %v8047_v40  ;;  %vm3981_vm4 = vcmask 1043459   ;;  %vm3983_vm2 = vcmask 1044484  }
 0x655   : > { %9556 = vst [vmem:[#allocation31_spill] sm:$0xff] %v8026_v19  ;;  %v2774_v15 = vpack.c.bf16 %v2758_v51, %v2758_v51  ;;  %v8061_v60 = vmax.f32 %v2709_v61, 0.0  ;;  %vm3985_vm5 = vcmask 1045509   ;;  %vm3987_vm6 = vcmask 1046534  }
 0x656   : > { %2784 = vst.msk [vmem:[%s7857_s30 + $0x20] sm:$0xf] %vm2775_vm15, %v2767_v49  ;;  %vm3989_vm7 = vcmask 1047559  }
 0x657   : > { %9559 = vst [vmem:[#allocation87_spill] sm:$0xff] %v8036_v62  ;;  %v2757_v46 = vsel %vm782_vm9, %v2741_v52, %v8061_v60  ;;  %v8076_v37 = vpop.xlane.xlu0 %2816  ;;  %vm3977_vm9 = vcmask 1041409  }
 0x658   : > { %9563 = vst [vmem:[#allocation51_spill] sm:$0xff] %v8047_v40  ;;  %v2773_v17 = vpack.c.bf16 %v2757_v46, %v2757_v46  ;;  %v8108_v24 = vpop.xlane.xlu1 %2813 }
 0x659   : > { %2783 = vst.msk [vmem:[%s7857_s30 + $0x1c] sm:$0xf] %vm2775_vm15, %v2766_v14 }
 0x65a   : > { %2786 = vst.msk [vmem:[%s7857_s30 + $0x28] sm:$0xf] %vm2775_vm15, %v2769_v34  ;;  %v9578_v34 = vld [vmem:[#allocation45_spill] sm:$0xff] }
 0x65b   : > { %2785 = vst.msk [vmem:[%s7857_s30 + $0x24] sm:$0xf] %vm2775_vm15, %v2768_v9  ;;  %v9580_v9 = vld [vmem:[#allocation85_spill] sm:$0xff] }
 0x65c   : > { %9565 = vst [vmem:[#allocation88_spill] sm:$0xff] %v8061_v60 }
 0x65d   : > { %2788 = vst.msk [vmem:[%s7857_s30 + $0x30] sm:$0xf] %vm2775_vm15, %v2771_v7 }
 0x65e   : > { %2787 = vst.msk [vmem:[%s7857_s30 + $0x2c] sm:$0xf] %vm2775_vm15, %v2770_v59 }
 0x65f   : > { %2791 = vst.msk [vmem:[%s7857_s30 + $0x3c] sm:$0xf] %vm2775_vm15, %v2774_v15  ;;  %v8078_v33 = vpop.xlane.xlu0 %2840 }
 0x660   : > { %2790 = vst.msk [vmem:[%s7857_s30 + $0x38] sm:$0xf] %vm2775_vm15, %v2773_v17  ;;  %v8116_v47 = vpop.xlane.xlu1 %2819  ;;  %vm3979_vm15 = vcmask 1042434  }
 0x666   : > { %v8124_v51 = vpop.xlane.xlu2 %2822 }
 0x667   : > { %v8080_v32 = vpop.xlane.xlu0 %2849 }
 0x668   : > { %v8120_v59 = vpop.xlane.xlu1 %2825 }
 0x66e   : > { %v8128_v52 = vpop.xlane.xlu2 %2846 }
 0x670   : > { %v8122_v61 = vpop.xlane.xlu1 %2828 }
 0x676   : > { %v8132_v17 = vpop.xlane.xlu2 %2855 }
 0x678   : > { %v8126_v15 = vpop.xlane.xlu1 %2831 }
 0x67a   : > { %v2875_v45 = vpop.permute.xlu0 %2874 }
 0x67b   : > { %v2879_v56 = vmul.f32 %v2875_v45, %v9567_v28  ;;  %v2878_v10 = vmul.f32 %v2875_v45, %v9568_v0  ;;  %v2877_v53 = vmul.f32 %v2875_v45, %v9569_v42  ;;  %v2880_v4 = vmul.f32 %v2875_v45, %v9570_v8 }
 0x67c   : > { %v2881_v55 = vmul.f32 %v2875_v45, %v9571_v5  ;;  %v2882_v48 = vmul.f32 %v2875_v45, %v9572_v25  ;;  %v2883_v49 = vmul.f32 %v2875_v45, %v9573_v38  ;;  %v2884_v50 = vmul.f32 %v2875_v45, %v9574_v31 }
 0x67d   : > { %2913 = vrot.lane.b32.xlu0 %v2879_v56, %s4642_s9  ;;  %2911 = vrot.lane.b32.xlu2 %v2878_v10, %s4642_s9  ;;  %v2885_v27 = vmul.f32 %v2875_v45, %v9575_v3  ;;  %v2886_v36 = vmul.f32 %v2875_v45, %v9576_v58  ;;  %v2887_v14 = vmul.f32 %v2875_v45, %v9577_v13 }
 0x67e   : > { %2909 = vrot.lane.b32.xlu1 %v2877_v53, %s4642_s9  ;;  %v2888_v26 = vmul.f32 %v2875_v45, %v9578_v34  ;;  %v2889_v6 = vmul.f32 %v2875_v45, %v9579_v44  ;;  %v2890_v7 = vmul.f32 %v2875_v45, %v9580_v9  ;;  %v2891_v2 = vmul.f32 %v2875_v45, %v8026_v19 }
 0x67f   : > { %v2892_v43 = vmul.f32 %v2875_v45, %v8005_v41 }
 0x680   : > { %v8130_v46 = vpop.xlane.xlu1 %2834 }
 0x685   : > { %2915 = vrot.lane.b32.xlu0 %v2880_v4, %s4642_s9  ;;  %2917 = vrot.lane.b32.xlu2 %v2881_v55, %s4642_s9 }
 0x686   : > { %2919 = vrot.lane.b32.xlu1 %v2882_v48, %s4642_s9 }
 0x688   : > { %v8134_v56 = vpop.xlane.xlu1 %2837 }
 0x68d   : > { %2921 = vrot.lane.b32.xlu0 %v2883_v49, %s4642_s9  ;;  %2923 = vrot.lane.b32.xlu2 %v2884_v50, %s4642_s9 }
 0x68e   : > { %2925 = vrot.lane.b32.xlu1 %v2885_v27, %s4642_s9 }
 0x690   : > { %v8137_v53 = vpop.xlane.xlu1 %2843 }
 0x695   : > { %2927 = vrot.lane.b32.xlu0 %v2886_v36, %s4642_s9  ;;  %2929 = vrot.lane.b32.xlu2 %v2887_v14, %s4642_s9 }
 0x696   : > { %2931 = vrot.lane.b32.xlu1 %v2888_v26, %s4642_s9 }
 0x698   : > { %v8140_v48 = vpop.xlane.xlu1 %2852 }
 0x69d   : > { %2933 = vrot.lane.b32.xlu0 %v2889_v6, %s4642_s9  ;;  %2935 = vrot.lane.b32.xlu2 %v2890_v7, %s4642_s9 }
 0x69e   : > { %2937 = vrot.lane.b32.xlu1 %v2891_v2, %s4642_s9  ;;  %v9581_v2 = vld [vmem:[#allocation18_spill] sm:$0xff] }
 0x6a5   : > { %2939 = vrot.lane.b32.xlu0 %v2892_v43, %s4642_s9 }
 0x6d7   : > { %v2912_v10 = vpop.permute.xlu2 %2911 }
 0x6d8   : > { %v2960_v45 = vsel %vm765_vm8, %v2912_v10, 0.0 }
 0x6d9   : > { %2961 = vadd.xlane.f32.xlu1 %v2960_v45 }
 0x6df   : > { %v2918_v4 = vpop.permute.xlu2 %2917 }
 0x6e0   : > { %v2969_v55 = vsel %vm765_vm8, %v2918_v4, 0.0 }
 0x6e1   : > { %2970 = vadd.xlane.f32.xlu1 %v2969_v55 }
 0x6e7   : > { %v2924_v43 = vpop.permute.xlu2 %2923 }
 0x6e8   : > { %v2978_v4 = vsel %vm765_vm8, %v2924_v43, 0.0 }
 0x6ef   : > { %v2914_v49 = vpop.permute.xlu0 %2913 }
 0x6f0   : > { %v2963_v50 = vsel %vm765_vm8, %v2914_v49, 0.0  ;;  %v2910_v27 = vpop.permute.xlu1 %2909 }
 0x6f1   : > { %v2957_v36 = vsel %vm765_vm8, %v2910_v27, 0.0  ;;  %2964 = vadd.xlane.f32.xlu0 %v2963_v50 }
 0x6f2   : > { %2958 = vadd.xlane.f32.xlu2 %v2957_v36 }
 0x6f7   : > { %v2916_v14 = vpop.permute.xlu0 %2915 }
 0x6f8   : > { %v2966_v26 = vsel %vm765_vm8, %v2916_v14, 0.0  ;;  %v2920_v6 = vpop.permute.xlu1 %2919  ;;  %v2930_v14 = vpop.permute.xlu2 %2929 }
 0x6f9   : > { %v2972_v7 = vsel %vm765_vm8, %v2920_v6, 0.0 }
 0x6fa   : > { %2967 = vadd.xlane.f32.xlu2 %v2966_v26  ;;  %2973 = vadd.xlane.f32.xlu0 %v2972_v7  ;;  %v2987_v26 = vsel %vm765_vm8, %v2930_v14, 0.0 }
 0x6fb   : > { %3021 = vrot.lane.b32.xlu1 %v9581_v2, %s4640_s7 }
 0x6ff   : > { %v2922_v10 = vpop.permute.xlu0 %2921 }
 0x700   : > { %v2975_v45 = vsel %vm765_vm8, %v2922_v10, 0.0  ;;  %v2926_v55 = vpop.permute.xlu1 %2925 }
 0x701   : > { %v2981_v27 = vsel %vm765_vm8, %v2926_v55, 0.0 }
 0x702   : > { %2976 = vadd.xlane.f32.xlu2 %v2975_v45  ;;  %2979 = vadd.xlane.f32.xlu0 %v2978_v4  ;;  %v2936_v45 = vpop.permute.xlu2 %2935 }
 0x703   : > { %v2996_v4 = vsel %vm765_vm8, %v2936_v45, 0.0 }
 0x707   : > { %v2928_v49 = vpop.permute.xlu0 %2927 }
 0x708   : > { %v2984_v50 = vsel %vm765_vm8, %v2928_v49, 0.0  ;;  %v2932_v36 = vpop.permute.xlu1 %2931 }
 0x709   : > { %v2990_v6 = vsel %vm765_vm8, %v2932_v36, 0.0 }
 0x70a   : > { %2985 = vadd.xlane.f32.xlu0 %v2984_v50  ;;  %2982 = vadd.xlane.f32.xlu2 %v2981_v27 }
 0x70f   : > { %v2934_v7 = vpop.permute.xlu0 %2933 }
 0x710   : > { %v2938_v2 = vpop.permute.xlu1 %2937  ;;  %v2993_v43 = vsel %vm765_vm8, %v2934_v7, 0.0 }
 0x711   : > { %v2999_v10 = vsel %vm765_vm8, %v2938_v2, 0.0 }
 0x712   : > { %2988 = vadd.xlane.f32.xlu2 %v2987_v26  ;;  %2991 = vadd.xlane.f32.xlu0 %v2990_v6 }
 0x71a   : > { %2994 = vadd.xlane.f32.xlu2 %v2993_v43  ;;  %3000 = vadd.xlane.f32.xlu0 %v2999_v10 }
 0x725   : > { %2997 = vadd.xlane.f32.xlu1 %v2996_v4 }
 0x74c   : > { %v8157_v55 = vpop.xlane.xlu1 %2961 }
 0x754   : > { %v8159_v49 = vpop.xlane.xlu1 %2970 }
 0x76d   : > { %v3022_v50 = vpop.permute.xlu1 %3021 }
 0x76e   : > { %v3030_v27 = vmul.f32 %v3022_v50, %v7842_v11  ;;  %v3025_v36 = vmul.f32 %v3022_v50, %v7881_v12  ;;  %v3024_v14 = vmul.f32 %v3022_v50, %v7911_v29  ;;  %v3037_v26 = vmul.f32 %v3022_v50, %v7946_v18 }
 0x76f   : > { %v3027_v6 = vmul.f32 %v3022_v50, %v7932_v57  ;;  %v3026_v7 = vmul.f32 %v3022_v50, %v7951_v30  ;;  %v3029_v2 = vmul.f32 %v3022_v50, %v7953_v21  ;;  %v3028_v43 = vmul.f32 %v3022_v50, %v7972_v54 }
 0x770   : > { %3068 = vrot.lane.b32.xlu1 %v3030_v27, %s4640_s7  ;;  %3058 = vrot.lane.b32.xlu0 %v3025_v36, %s4640_s7  ;;  %v3032_v10 = vmul.f32 %v3022_v50, %v7992_v23  ;;  %v3031_v45 = vmul.f32 %v3022_v50, %v8014_v39  ;;  %v3034_v4 = vmul.f32 %v3022_v50, %v8016_v22  ;;  %v8184_v36 = vpop.xlane.xlu2 %2958 }
 0x771   : > { %3056 = vrot.lane.b32.xlu2 %v3024_v14, %s4640_s7  ;;  %v3033_v27 = vmul.f32 %v3022_v50, %v8019_v16  ;;  %v3036_v14 = vmul.f32 %v3022_v50, %v8021_v1 }
 0x778   : > { %3082 = vrot.lane.b32.xlu1 %v3037_v26, %s4640_s7  ;;  %3062 = vrot.lane.b32.xlu0 %v3027_v6, %s4640_s7  ;;  %v3035_v26 = vmul.f32 %v3022_v50, %v8036_v62  ;;  %v8191_v6 = vpop.xlane.xlu2 %2967 }
 0x779   : > { %3060 = vrot.lane.b32.xlu2 %v3026_v7, %s4640_s7  ;;  %v3039_v7 = vmul.f32 %v3022_v50, %v8047_v40 }
 0x780   : > { %3066 = vrot.lane.b32.xlu0 %v3029_v2, %s4640_s7  ;;  %v3038_v2 = vmul.f32 %v3022_v50, %v8061_v60 }
 0x781   : > { %3064 = vrot.lane.b32.xlu2 %v3028_v43, %s4640_s7  ;;  %v2940_v43 = vpop.permute.xlu0 %2939 }
 0x788   : > { %3072 = vrot.lane.b32.xlu0 %v3032_v10, %s4640_s7  ;;  %v8197_v10 = vpop.xlane.xlu2 %2976 }
 0x789   : > { %3070 = vrot.lane.b32.xlu2 %v3031_v45, %s4640_s7  ;;  %v8199_v45 = vpop.xlane.xlu0 %2964 }
 0x790   : > { %3076 = vrot.lane.b32.xlu0 %v3034_v4, %s4640_s7  ;;  %v8201_v4 = vpop.xlane.xlu2 %2982 }
 0x791   : > { %3074 = vrot.lane.b32.xlu2 %v3033_v27, %s4640_s7  ;;  %v8203_v27 = vpop.xlane.xlu0 %2973 }
 0x798   : > { %3080 = vrot.lane.b32.xlu0 %v3036_v14, %s4640_s7  ;;  %v8205_v14 = vpop.xlane.xlu2 %2988  ;;  %v8220_v22 = vpop.xlane.xlu1 %2997 }
 0x799   : > { %3078 = vrot.lane.b32.xlu2 %v3035_v26, %s4640_s7  ;;  %v8207_v26 = vpop.xlane.xlu0 %2979 }
 0x7a0   : > { %3086 = vrot.lane.b32.xlu0 %v3039_v7, %s4640_s7  ;;  %v8209_v35 = vpop.xlane.xlu2 %2994 }
 0x7a1   : > { %3084 = vrot.lane.b32.xlu2 %v3038_v2, %s4640_s7  ;;  %v8211_v50 = vpop.xlane.xlu0 %2985 }
 0x7a9   : > { %v8214_v2 = vpop.xlane.xlu0 %2991 }
 0x7b1   : > { %v8217_v1 = vpop.xlane.xlu0 %3000 }
 0x7cb   : > { %v3057_v20 = vpop.permute.xlu2 %3056 }
 0x7cc   : > { %v3104_v7 = vsel %vm765_vm8, %v3057_v20, 0.0 }
 0x7cd   : > { %3105 = vadd.xlane.f32.xlu1 %v3104_v7 }
 0x7d3   : > { %v3061_v40 = vpop.permute.xlu2 %3060 }
 0x7d4   : > { %v3110_v60 = vsel %vm765_vm8, %v3061_v40, 0.0 }
 0x7d5   : > { %3111 = vadd.xlane.f32.xlu0 %v3110_v60 }
 0x7db   : > { %v3065_v18 = vpop.permute.xlu2 %3064 }
 0x7dc   : > { %v3116_v23 = vsel %vm765_vm8, %v3065_v18, 0.0  ;;  %v3002_v18 = vsel %vm765_vm8, %v2940_v43, 0.0 }
 0x7e2   : > { %v3059_v62 = vpop.permute.xlu0 %3058  ;;  %v3069_v16 = vpop.permute.xlu1 %3068 }
 0x7e3   : > { %v3107_v41 = vsel %vm765_vm8, %v3059_v62, 0.0  ;;  %v3071_v20 = vpop.permute.xlu2 %3070  ;;  %v3122_v9 = vsel %vm765_vm8, %v3069_v16, 0.0 }
 0x7e4   : > { %3108 = vadd.xlane.f32.xlu2 %v3107_v41  ;;  %v3125_v60 = vsel %vm765_vm8, %v3071_v20, 0.0 }
 0x7ea   : > { %v3063_v19 = vpop.permute.xlu0 %3062 }
 0x7eb   : > { %v3113_v7 = vsel %vm765_vm8, %v3063_v19, 0.0  ;;  %v3075_v41 = vpop.permute.xlu2 %3074 }
 0x7ec   : > { %3114 = vadd.xlane.f32.xlu1 %v3113_v7  ;;  %3117 = vadd.xlane.f32.xlu2 %v3116_v23  ;;  %v3131_v19 = vsel %vm765_vm8, %v3075_v41, 0.0 }
 0x7f2   : > { %v3067_v40 = vpop.permute.xlu0 %3066 }
 0x7f3   : > { %v3119_v39 = vsel %vm765_vm8, %v3067_v40, 0.0  ;;  %v3079_v23 = vpop.permute.xlu2 %3078 }
 0x7f4   : > { %3120 = vadd.xlane.f32.xlu0 %v3119_v39  ;;  %3126 = vadd.xlane.f32.xlu2 %v3125_v60  ;;  %v3137_v16 = vsel %vm765_vm8, %v3079_v23, 0.0  ;;  %v3083_v39 = vpop.permute.xlu1 %3082 }
 0x7f5   : > { %3123 = vadd.xlane.f32.xlu1 %v3122_v9  ;;  %v3143_v43 = vsel %vm765_vm8, %v3083_v39, 0.0  ;;  %v3007_v39 = vmul.f32 0.17677669, %v8199_v45 }
 0x7fa   : > { %v3073_v62 = vpop.permute.xlu0 %3072 }
 0x7fb   : > { %v3128_v44 = vsel %vm765_vm8, %v3073_v62, 0.0  ;;  %v3085_v9 = vpop.permute.xlu2 %3084 }
 0x7fc   : > { %3129 = vadd.xlane.f32.xlu0 %v3128_v44  ;;  %3003 = vadd.xlane.f32.xlu2 %v3002_v18  ;;  %v3146_v41 = vsel %vm765_vm8, %v3085_v9, 0.0  ;;  %v3005_v18 = vmul.f32 0.17677669, %v8184_v36 }
 0x7fd   : > { %3132 = vadd.xlane.f32.xlu1 %v3131_v19  ;;  %v2857_v19 = vmul.f32 0.17677669, %v8099_v63 }
 0x802   : > { %v3077_v20 = vpop.permute.xlu0 %3076 }
 0x803   : > { %v3134_v7 = vsel %vm765_vm8, %v3077_v20, 0.0  ;;  %v3168_v20 = vmax.f32 %v2857_v19, %v3005_v18 }
 0x804   : > { %3135 = vadd.xlane.f32.xlu0 %v3134_v7 }
 0x805   : > { %3138 = vadd.xlane.f32.xlu1 %v3137_v16 }
 0x80a   : > { %v3081_v40 = vpop.permute.xlu0 %3080 }
 0x80b   : > { %v3140_v60 = vsel %vm765_vm8, %v3081_v40, 0.0 }
 0x80c   : > { %3141 = vadd.xlane.f32.xlu2 %v3140_v60  ;;  %3144 = vadd.xlane.f32.xlu0 %v3143_v43  ;;  %v2859_v43 = vmul.f32 0.17677669, %v8076_v37 }
 0x80d   : > { %3147 = vadd.xlane.f32.xlu1 %v3146_v41 }
 0x812   : > { %v3087_v44 = vpop.permute.xlu0 %3086 }
 0x813   : > { %v3149_v62 = vsel %vm765_vm8, %v3087_v44, 0.0 }
 0x814   : > { %3150 = vadd.xlane.f32.xlu2 %v3149_v62  ;;  %v3170_v62 = vmax.f32 %v2859_v43, %v3007_v39 }
 0x840   : > { %v3106_v23 = vpop.xlane.xlu1 %3105 }
 0x841   : > { %v3152_v7 = vmul.f32 0.17677669, %v3106_v23 }
 0x843   : > { %v3184_v16 = vmax.f32 %v3168_v20, %v3152_v7 }
 0x845   : > { %v3200_v40 = vsub.f32 %v2857_v19, %v3184_v16  ;;  %v3248_v13 = vsub.f32 %v3005_v18, %v3184_v16  ;;  %v3296_v9 = vsub.f32 %v3152_v7, %v3184_v16 }
 0x847   : > { %v3216_v60 = vmul.f32 1.442695, %v3200_v40  ;;  %v3264_v41 = vmul.f32 1.442695, %v3248_v13  ;;  %v3312_v11 = vmul.f32 1.442695, %v3296_v9 }
 0x848   : > { %v3112_v44 = vpop.xlane.xlu0 %3111 }
 0x849   : > { %4397 = vpow2.f32 %v3216_v60  ;;  %v3154_v36 = vmul.f32 0.17677669, %v3112_v44 }
 0x84a   : > { %4399 = vpow2.f32 %v3264_v41 }
 0x84b   : > { %v3186_v63 = vmax.f32 %v3170_v62, %v3154_v36  ;;  %4401 = vpow2.f32 %v3312_v11 }
 0x84d   : > { %v3202_v34 = vsub.f32 %v2859_v43, %v3186_v63  ;;  %v3250_v23 = vsub.f32 %v3007_v39, %v3186_v63  ;;  %v3298_v20 = vsub.f32 %v3154_v36, %v3186_v63  ;;  %v3006_v39 = vmul.f32 0.17677669, %v8157_v55 }
 0x84f   : > { %v8240_v58 = vpop.eup %4397  ;;  %v3220_v45 = vmul.f32 1.442695, %v3202_v34  ;;  %v3268_v18 = vmul.f32 1.442695, %v3250_v23  ;;  %v3316_v7 = vmul.f32 1.442695, %v3298_v20 }
 0x850   : > { %9582 = vst [vmem:[#allocation56_spill] sm:$0xff] %v8240_v58  ;;  %v4400_v19 = vpop.eup %4399  ;;  %v2858_v34 = vmul.f32 0.17677669, %v8108_v24  ;;  %v8263_v24 = vmul.f32 0.17677669, %v8159_v49 }
 0x851   : > { %4403 = vpow2.f32 %v3220_v45  ;;  %v3408_v37 = vmul.f32 %v4400_v19, %v9569_v42  ;;  %v3344_v13 = vadd.f32 %v4400_v19, %v8240_v58  ;;  %v8244_v16 = vpop.eup %4401  ;;  %v3008_v45 = vmul.f32 0.17677669, %v8191_v6 }
 0x852   : > { %4405 = vpow2.f32 %v3268_v18  ;;  %v3169_v42 = vmax.f32 %v2858_v34, %v3006_v39  ;;  %v8277_v6 = vmul.f32 0.17677669, %v8122_v61 }
 0x853   : > { %3440 = vrot.lane.b32.xlu0 %v3408_v37, %s4642_s9  ;;  %v8248_v11 = vadd.f32 %v8244_v16, %v3344_v13  ;;  %4407 = vpow2.f32 %v3316_v7  ;;  %v8268_v7 = vmul.f32 0.17677669, %v8116_v47  ;;  %v8281_v47 = vmul.f32 0.17677669, %v8126_v15 }
 0x854   : > { %v8299_v15 = vmul.f32 0.17677669, %v8080_v32  ;;  %v8319_v32 = vmul.f32 0.17677669, %v8140_v48 }
 0x855   : > { %9583 = vst [vmem:[#allocation60_spill] sm:$0xff] %v8248_v11 }
 0x857   : > { %v8252_v40 = vpop.eup %4403  ;;  %v3109_v9 = vpop.xlane.xlu2 %3108 }
 0x858   : > { %9584 = vst [vmem:[#allocation73_spill] sm:$0xff] %v8252_v40  ;;  %v4406_v43 = vpop.eup %4405  ;;  %v3153_v60 = vmul.f32 0.17677669, %v3109_v9 }
 0x859   : > { %v3410_v41 = vmul.f32 %v4406_v43, %v9567_v28  ;;  %v3346_v44 = vadd.f32 %v4406_v43, %v8252_v40  ;;  %v8256_v62 = vpop.eup %4407  ;;  %v2861_v28 = vmul.f32 0.17677669, %v8124_v51  ;;  %v3171_v51 = vmax.f32 %v8268_v7, %v3008_v45 }
 0x85a   : > { %v3185_v36 = vmax.f32 %v3169_v42, %v3153_v60  ;;  %v8284_v42 = vmul.f32 0.17677669, %v8078_v33  ;;  %v8302_v33 = vmul.f32 0.17677669, %v8211_v50  ;;  %v8336_v40 = vmul.f32 0.17677669, %v8214_v2 }
 0x85b   : > { %3444 = vrot.lane.b32.xlu2 %v3410_v41, %s4642_s9  ;;  %v8260_v55 = vadd.f32 %v8256_v62, %v3346_v44  ;;  %v3172_v43 = vmax.f32 %v2861_v28, %v8263_v24  ;;  %v8289_v44 = vmul.f32 0.17677669, %v8197_v10  ;;  %v8308_v10 = vmul.f32 0.17677669, %v8128_v52 }
 0x85c   : > { %v3201_v63 = vsub.f32 %v2858_v34, %v3185_v36  ;;  %v3249_v23 = vsub.f32 %v3006_v39, %v3185_v36  ;;  %v3297_v20 = vsub.f32 %v3153_v60, %v3185_v36  ;;  %v2862_v39 = vmul.f32 0.17677669, %v8120_v59 }
 0x85d   : > { %9585 = vst [vmem:[#allocation90_spill] sm:$0xff] %v8260_v55  ;;  %v3010_v60 = vmul.f32 0.17677669, %v8203_v27  ;;  %v8292_v59 = vmul.f32 0.17677669, %v8207_v26 }
 0x85e   : > { %v3218_v18 = vmul.f32 1.442695, %v3201_v63  ;;  %v3266_v19 = vmul.f32 1.442695, %v3249_v23  ;;  %v3314_v37 = vmul.f32 1.442695, %v3297_v20 }
 0x85f   : > { %v3118_v13 = vpop.xlane.xlu2 %3117  ;;  %v3115_v9 = vpop.xlane.xlu1 %3114  ;;  %v8296_v36 = vmul.f32 0.17677669, %v8130_v46  ;;  %v8305_v27 = vmul.f32 0.17677669, %v8134_v56  ;;  %v8311_v26 = vmul.f32 0.17677669, %v8201_v4  ;;  %v3173_v23 = vmax.f32 %v2862_v39, %v3010_v60 }
 0x860   : > { %4409 = vpow2.f32 %v3218_v18  ;;  %v8271_v49 = vmul.f32 0.17677669, %v3118_v13  ;;  %v8273_v34 = vmul.f32 0.17677669, %v3115_v9  ;;  %v8316_v46 = vmul.f32 0.17677669, %v8137_v53 }
 0x861   : > { %4411 = vpow2.f32 %v3266_v19  ;;  %v3174_v56 = vmax.f32 %v8277_v6, %v8289_v44  ;;  %v3175_v52 = vmax.f32 %v8281_v47, %v8292_v59  ;;  %v8326_v4 = vmul.f32 0.17677669, %v8205_v14 }
 0x862   : > { %v3188_v41 = vmax.f32 %v3172_v43, %v8271_v49  ;;  %4413 = vpow2.f32 %v3314_v37  ;;  %v3187_v61 = vmax.f32 %v3171_v51, %v8273_v34  ;;  %v3176_v51 = vmax.f32 %v8296_v36, %v8311_v26 }
 0x863   : > { %v3178_v58 = vmax.f32 %v8284_v42, %v8326_v4 }
 0x864   : > { %v3204_v50 = vsub.f32 %v2861_v28, %v3188_v41  ;;  %v3251_v18 = vsub.f32 %v3008_v45, %v3187_v61  ;;  %v3300_v11 = vsub.f32 %v8271_v49, %v3188_v41 }
 0x866   : > { %v8313_v63 = vpop.eup %4409  ;;  %v3224_v53 = vmul.f32 1.442695, %v3204_v50  ;;  %v3299_v50 = vsub.f32 %v8273_v34, %v3187_v61 }
 0x867   : > { %9586 = vst [vmem:[#allocation91_spill] sm:$0xff] %v8313_v63  ;;  %v4412_v20 = vpop.eup %4411  ;;  %v3121_v19 = vpop.xlane.xlu0 %3120 }
 0x868   : > { %v3127_v37 = vpop.xlane.xlu2 %3126  ;;  %v3345_v48 = vadd.f32 %v4412_v20, %v8313_v63  ;;  %v3157_v13 = vmul.f32 0.17677669, %v3121_v19  ;;  %v3124_v9 = vpop.xlane.xlu1 %3123  ;;  %v3409_v45 = vmul.f32 %v4412_v20, %v9568_v0  ;;  %v3252_v19 = vsub.f32 %v8263_v24, %v3188_v41 }
 0x869   : > { %v3159_v28 = vmul.f32 0.17677669, %v3127_v37  ;;  %v8331_v43 = vpop.eup %4413  ;;  %v8338_v14 = vmul.f32 0.17677669, %v3124_v9  ;;  %v3270_v63 = vmul.f32 1.442695, %v3251_v18  ;;  %4415 = vpow2.f32 %v3224_v53 }
 0x86a   : > { %v8342_v55 = vadd.f32 %v8331_v43, %v3345_v48  ;;  %v3189_v37 = vmax.f32 %v3173_v23, %v3157_v13  ;;  %3442 = vrot.lane.b32.xlu1 %v3409_v45, %s4642_s9  ;;  %v8351_v20 = vmul.f32 0.17677669, %v8209_v35  ;;  %v8354_v24 = vmul.f32 0.17677669, %v8217_v1 }
 0x86b   : > { %v3191_v21 = vmax.f32 %v3175_v52, %v3159_v28  ;;  %v3190_v0 = vmax.f32 %v3174_v56, %v8338_v14  ;;  %v3203_v23 = vsub.f32 %v8268_v7, %v3187_v61  ;;  %v3272_v49 = vmul.f32 1.442695, %v3252_v19 }
 0x86c   : > { %v3205_v2 = vsub.f32 %v2862_v39, %v3189_v37  ;;  %v3253_v9 = vsub.f32 %v3010_v60, %v3189_v37  ;;  %v3301_v54 = vsub.f32 %v3157_v13, %v3189_v37  ;;  %v8359_v39 = vmul.f32 0.17677669, %v8220_v22 }
 0x86d   : > { %v3320_v60 = vmul.f32 1.442695, %v3300_v11  ;;  %4417 = vpow2.f32 %v3270_v63  ;;  %v3207_v35 = vsub.f32 %v8281_v47, %v3191_v21  ;;  %v3254_v1 = vsub.f32 %v8289_v44, %v3190_v0 }
 0x86e   : > { %v3226_v41 = vmul.f32 1.442695, %v3205_v2  ;;  %v3274_v52 = vmul.f32 1.442695, %v3253_v9  ;;  %v3322_v56 = vmul.f32 1.442695, %v3301_v54  ;;  %v3255_v53 = vsub.f32 %v8292_v59, %v3191_v21 }
 0x86f   : > { %v3130_v18 = vpop.xlane.xlu0 %3129  ;;  %v3222_v34 = vmul.f32 1.442695, %v3203_v23  ;;  %v3318_v61 = vmul.f32 1.442695, %v3299_v50  ;;  %v3303_v22 = vsub.f32 %v3159_v28, %v3191_v21  ;;  %v3206_v54 = vsub.f32 %v8277_v6, %v3190_v0  ;;  %v8371_v13 = vpop.eup %4415 }
 0x870   : > { %4419 = vpow2.f32 %v3226_v41  ;;  %v8363_v48 = vmul.f32 0.17677669, %v3130_v18  ;;  %v3133_v7 = vpop.xlane.xlu1 %3132  ;;  %v3276_v47 = vmul.f32 1.442695, %v3254_v1  ;;  %v3302_v44 = vsub.f32 %v8338_v14, %v3190_v0 }
 0x871   : > { %4421 = vpow2.f32 %v3274_v52  ;;  %v8367_v63 = vmul.f32 0.17677669, %v3133_v7  ;;  %v3179_v45 = vmax.f32 %v8316_v46, %v8336_v40  ;;  %v3180_v59 = vmax.f32 %v8308_v10, %v8351_v20  ;;  %v3004_v52 = vpop.xlane.xlu2 %3003 }
 0x872   : > { %4423 = vpow2.f32 %v3272_v49  ;;  %v3192_v11 = vmax.f32 %v3176_v51, %v8363_v48  ;;  %v3230_v21 = vmul.f32 1.442695, %v3207_v35  ;;  %v3182_v51 = vmax.f32 %v8319_v32, %v8354_v24 }
 0x873   : > { %4425 = vpow2.f32 %v3322_v56  ;;  %v8377_v28 = vpop.eup %4417  ;;  %v3181_v6 = vmax.f32 %v8299_v15, %v8359_v39  ;;  %v3278_v14 = vmul.f32 1.442695, %v3255_v53  ;;  %v3326_v37 = vmul.f32 1.442695, %v3303_v22 }
 0x874   : > { %4427 = vpow2.f32 %v3320_v60  ;;  %v3208_v2 = vsub.f32 %v8296_v36, %v3192_v11  ;;  %v9587_v9 = vmax.f32 %v8305_v27, %v8302_v33  ;;  %v3228_v50 = vmul.f32 1.442695, %v3206_v54 }
 0x875   : > { %4429 = vpow2.f32 %v3222_v34  ;;  %v3324_v49 = vmul.f32 1.442695, %v3302_v44  ;;  %v3256_v41 = vsub.f32 %v8311_v26, %v3192_v11  ;;  %v3411_v36 = vmul.f32 %v8377_v28, %v9570_v8 }
 0x876   : > { %v8383_v19 = vpop.eup %4419  ;;  %4431 = vpow2.f32 %v3318_v61  ;;  %v8390_v0 = vmax.f32 %v9587_v9, %v8367_v63  ;;  %v3304_v34 = vsub.f32 %v8363_v48, %v3192_v11  ;;  %v3232_v54 = vmul.f32 1.442695, %v3208_v2 }
 0x877   : > { %v4422_v23 = vpop.eup %4421  ;;  %4433 = vpow2.f32 %v3276_v47  ;;  %v3136_v60 = vpop.xlane.xlu0 %3135  ;;  %3446 = vrot.lane.b32.xlu0 %v3411_v36, %s4642_s9  ;;  %v3280_v44 = vmul.f32 1.442695, %v3256_v41 }
 0x878   : > { %v8393_v56 = vpop.eup %4423  ;;  %v3349_v18 = vadd.f32 %v4422_v23, %v8383_v19  ;;  %4435 = vpow2.f32 %v3230_v21  ;;  %v8398_v35 = vmul.f32 0.17677669, %v3136_v60  ;;  %v3139_v1 = vpop.xlane.xlu1 %3138  ;;  %v3413_v26 = vmul.f32 %v4422_v23, %v9572_v25 }
 0x879   : > { %v8400_v7 = vpop.eup %4425  ;;  %4437 = vpow2.f32 %v3278_v14  ;;  %v3163_v61 = vmul.f32 0.17677669, %v3139_v1  ;;  %v3209_v8 = vsub.f32 %v8305_v27, %v8390_v0  ;;  %v3257_v48 = vsub.f32 %v8302_v33, %v8390_v0 }
 0x87a   : > { %v8404_v53 = vpop.eup %4427  ;;  %v8407_v22 = vadd.f32 %v8400_v7, %v3349_v18  ;;  %4439 = vpow2.f32 %v3326_v37  ;;  %v3194_v25 = vmax.f32 %v3178_v58, %v8398_v35  ;;  %3450 = vrot.lane.b32.xlu1 %v3413_v26, %s4642_s9  ;;  %v8423_v27 = vmul.f32 0.17677669, %v3004_v52 }
 0x87b   : > { %v8412_v47 = vpop.eup %4429  ;;  %v3195_v11 = vmax.f32 %v3179_v45, %v3163_v61  ;;  %4441 = vpow2.f32 %v3228_v50  ;;  %v3412_v14 = vmul.f32 %v8393_v56, %v9571_v5  ;;  %v3504_v37 = vmul.f32 %v8244_v16, %v7911_v29 }
 0x87c   : > { %v8421_v21 = vpop.eup %4431  ;;  %4443 = vpow2.f32 %v3324_v49  ;;  %v3328_v2 = vmul.f32 1.442695, %v3304_v34  ;;  %v3234_v23 = vmul.f32 1.442695, %v3209_v8  ;;  %v3305_v50 = vsub.f32 %v8367_v63, %v8390_v0 }
 0x87d   : > { %v8429_v33 = vpop.eup %4433  ;;  %v3211_v58 = vsub.f32 %v8316_v46, %v3195_v11  ;;  %v3259_v45 = vsub.f32 %v8336_v40, %v3195_v11  ;;  %4445 = vpow2.f32 %v3232_v54  ;;  %v3307_v41 = vsub.f32 %v3163_v61, %v3195_v11 }
 0x87e   : > { %v8433_v9 = vpop.eup %4435  ;;  %4447 = vpow2.f32 %v3280_v44  ;;  %v3282_v29 = vmul.f32 1.442695, %v3257_v48  ;;  %v3210_v16 = vsub.f32 %v8284_v42, %v3194_v25  ;;  %v3414_v18 = vmul.f32 %v8429_v33, %v9573_v38 }
 0x87f   : > { %v8437_v5 = vpop.eup %4437  ;;  %v3238_v49 = vmul.f32 1.442695, %v3211_v58  ;;  %v3142_v52 = vpop.xlane.xlu2 %3141  ;;  %v3286_v40 = vmul.f32 1.442695, %v3259_v45  ;;  %4449 = vpow2.f32 %v3328_v2  ;;  %v3258_v0 = vsub.f32 %v8326_v4, %v3194_v25  ;;  %3448 = vrot.lane.b32.xlu0 %v3412_v14, %s4642_s9 }
 0x880   : > { %v3145_v60 = vpop.xlane.xlu0 %3144  ;;  %v8440_v46 = vpop.eup %4439  ;;  %v8444_v36 = vmul.f32 0.17677669, %v3142_v52  ;;  %v3306_v34 = vsub.f32 %v8398_v35, %v3194_v25  ;;  %4451 = vpow2.f32 %v3234_v23  ;;  %v3334_v26 = vmul.f32 1.442695, %v3307_v41  ;;  %3452 = vrot.lane.b32.xlu2 %v3414_v18, %s4642_s9 }
 0x881   : > { %v8446_v1 = vmul.f32 0.17677669, %v3145_v60  ;;  %v3148_v63 = vpop.xlane.xlu1 %3147  ;;  %v8452_v61 = vpop.eup %4441  ;;  %v2872_v54 = vmul.f32 0.17677669, %v8132_v17  ;;  %v3330_v8 = vmul.f32 1.442695, %v3305_v50  ;;  %4453 = vpow2.f32 %v3238_v49 }
 0x882   : > { %v8450_v42 = vmul.f32 0.17677669, %v3148_v63  ;;  %v8460_v38 = vmax.f32 %v3180_v59, %v8444_v36  ;;  %v8468_v35 = vpop.eup %4443  ;;  %3536 = vrot.lane.b32.xlu1 %v3504_v37, %s4640_s7  ;;  %v3236_v48 = vmul.f32 1.442695, %v3210_v16  ;;  %4455 = vpow2.f32 %v3286_v40 }
 0x883   : > { %v8466_v4 = vmax.f32 %v3181_v6, %v8446_v1  ;;  %v8476_v59 = vpop.eup %4445  ;;  %4457 = vpow2.f32 %v3282_v29  ;;  %v3284_v11 = vmul.f32 1.442695, %v3258_v0  ;;  %v3183_v37 = vmax.f32 %v2872_v54, %v8423_v27 }
 0x884   : > { %v3198_v44 = vmax.f32 %v3182_v51, %v8450_v42  ;;  %v3212_v6 = vsub.f32 %v8308_v10, %v8460_v38  ;;  %v3260_v25 = vsub.f32 %v8351_v20, %v8460_v38  ;;  %v8482_v17 = vpop.eup %4447  ;;  %v3505_v51 = vmul.f32 %v8331_v43, %v7881_v12 }
 0x885   : > { %v3213_v14 = vsub.f32 %v8299_v15, %v8466_v4  ;;  %v3332_v2 = vmul.f32 1.442695, %v3306_v34  ;;  %4459 = vpow2.f32 %v3334_v26  ;;  %v8490_v10 = vpop.eup %4449  ;;  %v3261_v45 = vsub.f32 %v8359_v39, %v8466_v4 }
 0x886   : > { %v3214_v58 = vsub.f32 %v8319_v32, %v3198_v44  ;;  %4461 = vpow2.f32 %v3330_v8  ;;  %v3240_v20 = vmul.f32 1.442695, %v3212_v6  ;;  %v3415_v23 = vmul.f32 %v8437_v5, %v9574_v31  ;;  %v8496_v50 = vpop.eup %4451 }
 0x887   : > { %v3151_v15 = vpop.xlane.xlu2 %3150  ;;  %4463 = vpow2.f32 %v3236_v48  ;;  %v3288_v12 = vmul.f32 1.442695, %v3260_v25  ;;  %v3262_v43 = vsub.f32 %v8354_v24, %v3198_v44  ;;  %v8499_v29 = vpop.eup %4453  ;;  %v3242_v32 = vmul.f32 1.442695, %v3213_v14 }
 0x888   : > { %v3167_v41 = vmul.f32 0.17677669, %v3151_v15  ;;  %4465 = vpow2.f32 %v3284_v11  ;;  %v3310_v16 = vsub.f32 %v8450_v42, %v3198_v44  ;;  %v3507_v39 = vmul.f32 %v8421_v21, %v7932_v57  ;;  %v8504_v49 = vpop.eup %4455  ;;  %3454 = vrot.lane.b32.xlu0 %v3415_v23, %s4642_s9  ;;  %3538 = vrot.lane.b32.xlu2 %v3505_v51, %s4640_s7 }
 0x889   : > { %4467 = vpow2.f32 %v3332_v2  ;;  %v3244_v31 = vmul.f32 1.442695, %v3214_v58  ;;  %v4458_v24 = vpop.eup %4457  ;;  %v3355_v60 = vadd.f32 %v8504_v49, %v8499_v29  ;;  %v3308_v40 = vsub.f32 %v8444_v36, %v8460_v38 }
 0x88a   : > { %v3199_v52 = vmax.f32 %v3183_v37, %v3167_v41  ;;  %4469 = vpow2.f32 %v3240_v20  ;;  %v3290_v18 = vmul.f32 1.442695, %v3261_v45  ;;  %3542 = vrot.lane.b32.xlu1 %v3507_v39, %s4640_s7  ;;  %v3292_v63 = vmul.f32 1.442695, %v3262_v43  ;;  %v9588_v37 = vld [vmem:[#allocation46_spill] sm:$0xff] }
 0x88b   : > { %v8513_v57 = vpop.eup %4459  ;;  %4471 = vpow2.f32 %v3288_v12  ;;  %v3309_v8 = vsub.f32 %v8446_v1, %v8466_v4  ;;  %v3340_v36 = vmul.f32 1.442695, %v3310_v16  ;;  %v3336_v11 = vmul.f32 1.442695, %v3308_v40  ;;  %v9589_v16 = vld [vmem:[#allocation101_spill] sm:$0xff] }
 0x88c   : > { %v3215_v0 = vsub.f32 %v2872_v54, %v3199_v52  ;;  %v3263_v34 = vsub.f32 %v8423_v27, %v3199_v52  ;;  %v8516_v42 = vpop.eup %4461  ;;  %v8519_v26 = vadd.f32 %v8513_v57, %v3355_v60  ;;  %4473 = vpow2.f32 %v3242_v32 }
 0x88d   : > { %v8523_v38 = vpop.eup %4463  ;;  %4475 = vpow2.f32 %v3244_v31  ;;  %v3311_v54 = vsub.f32 %v3167_v41, %v3199_v52  ;;  %v3506_v27 = vmul.f32 %v8256_v62, %v7951_v30  ;;  %v3416_v14 = vmul.f32 %v8482_v17, %v9575_v3 }
 0x88e   : > { %v3246_v44 = vmul.f32 1.442695, %v3215_v0  ;;  %v4466_v48 = vpop.eup %4465  ;;  %4477 = vpow2.f32 %v3290_v18  ;;  %v3294_v6 = vmul.f32 1.442695, %v3263_v34  ;;  %v3350_v1 = vadd.f32 %v8452_v61, %v8429_v33 }
 0x88f   : > { %v8527_v25 = vpop.eup %4467  ;;  %4479 = vpow2.f32 %v3292_v63  ;;  %v3338_v51 = vmul.f32 1.442695, %v3309_v8  ;;  %v3508_v2 = vmul.f32 %v8404_v53, %v9588_v37  ;;  %v3347_v30 = vadd.f32 %v8412_v47, %v8377_v28 }
 0x890   : > { %v8533_v4 = vpop.eup %4469  ;;  %4481 = vpow2.f32 %v3340_v36  ;;  %3540 = vrot.lane.b32.xlu0 %v3506_v27, %s4640_s7  ;;  %3456 = vrot.lane.b32.xlu2 %v3416_v14, %s4642_s9  ;;  %v8542_v3 = vadd.f32 %v8468_v35, %v3350_v1  ;;  %v3348_v33 = vadd.f32 %v8393_v56, %v8371_v13  ;;  %v3342_v20 = vmul.f32 1.442695, %v3311_v54  ;;  %v9592_v14 = vld [vmem:[#allocation79_spill] sm:$0xff] }
 0x891   : > { %v4472_v62 = vpop.eup %4471  ;;  %4483 = vpow2.f32 %v3246_v44  ;;  %v8550_v28 = vadd.f32 %v8421_v21, %v3347_v30  ;;  %v3351_v56 = vadd.f32 %v8437_v5, %v8433_v9  ;;  %v3352_v43 = vadd.f32 %v8482_v17, %v8476_v59  ;;  %v9590_v5 = vld [vmem:[#allocation44_spill] sm:$0xff] }
 0x892   : > { %v8546_v58 = vpop.eup %4473  ;;  %4485 = vpow2.f32 %v3294_v6  ;;  %3544 = vrot.lane.b32.xlu1 %v3508_v2, %s4640_s7  ;;  %v8555_v23 = vadd.f32 %v8404_v53, %v3348_v33  ;;  %v3353_v41 = vadd.f32 %v4458_v24, %v8496_v50  ;;  %v3354_v21 = vadd.f32 %v4466_v48, %v8523_v38  ;;  %v9594_v2 = vld [vmem:[#allocation84_spill] sm:$0xff]  ;;  %v9595_v33 = vld [vmem:[#allocation85_spill] sm:$0xff] }
 0x893   : > { %v8552_v45 = vpop.eup %4475  ;;  %4487 = vpow2.f32 %v3336_v11  ;;  %v3509_v39 = vmul.f32 %v8400_v7, %v9589_v16  ;;  %v8566_v53 = vadd.f32 %v8440_v46, %v3351_v56  ;;  %v3417_v60 = vmul.f32 %v4458_v24, %v9590_v5  ;;  %v9591_v7 = vld [vmem:[#allocation45_spill] sm:$0xff] }
 0x894   : > { %v4478_v15 = vpop.eup %4477  ;;  %4489 = vpow2.f32 %v3338_v51  ;;  %v8573_v17 = vadd.f32 %v8490_v10, %v3352_v43  ;;  %v8576_v40 = vadd.f32 %v8516_v42, %v3353_v41  ;;  %v8579_v18 = vadd.f32 %v8527_v25, %v3354_v21  ;;  %v9593_v51 = vld [vmem:[#allocation74_spill] sm:$0xff]  ;;  %v9596_v56 = vld [vmem:[#allocation77_spill] sm:$0xff] }
 0x895   : > { %v4480_v12 = vpop.eup %4479  ;;  %4491 = vpow2.f32 %v3342_v20  ;;  %v3419_v0 = vmul.f32 %v8504_v49, %v9591_v7  ;;  %v3356_v8 = vadd.f32 %v4472_v62, %v8533_v4  ;;  %v3357_v36 = vadd.f32 %v4478_v15, %v8546_v58  ;;  %v9597_v41 = vld [vmem:[#allocation50_spill] sm:$0xff] }
 0x896   : > { %v4482_v32 = vpop.eup %4481  ;;  %v3358_v31 = vadd.f32 %v4480_v12, %v8552_v45  ;;  %v3510_v1 = vmul.f32 %v8468_v35, %v9592_v14  ;;  %v3418_v37 = vmul.f32 %v4466_v48, %v9593_v51  ;;  %v3420_v30 = vmul.f32 %v4472_v62, %v9594_v2  ;;  %v9598_v35 = vld [vmem:[#allocation8_spill] sm:$0xff]  ;;  %v9599_v62 = vld [vmem:[#allocation31_spill] sm:$0xff] }
 0x897   : > { %v8569_v52 = vpop.eup %4483  ;;  %v3421_v20 = vmul.f32 %v4478_v15, %v9595_v33  ;;  %v3511_v43 = vmul.f32 %v8440_v46, %v9596_v56  ;;  %v3513_v21 = vmul.f32 %v8516_v42, %v9597_v41  ;;  %v3512_v48 = vmul.f32 %v8490_v10, %v9598_v35  ;;  %v9601_v46 = vld [vmem:[#allocation34_spill] sm:$0xff]  ;;  %v9604_v10 = vld [vmem:[#allocation21_spill] sm:$0xff]  ;;  %v9608_v14 = vld [vmem:[#allocation91_spill] sm:$0xff] }
 0x898   : > { %v4486_v63 = vpop.eup %4485  ;;  %v8583_v34 = vadd.f32 %v4482_v32, %v3358_v31  ;;  %3546 = vrot.lane.b32.xlu2 %v3509_v39, %s4640_s7  ;;  %3458 = vrot.lane.b32.xlu0 %v3417_v60, %s4642_s9  ;;  %v3422_v16 = vmul.f32 %v4480_v12, %v9599_v62  ;;  %v9600_v39 = vld [vmem:[#allocation86_spill] sm:$0xff]  ;;  %v9602_v31 = vld [vmem:[#allocation87_spill] sm:$0xff]  ;;  %v9603_v60 = vld [vmem:[#allocation32_spill] sm:$0xff]  ;;  %4493 = vrcp.f32 %v8342_v55 }
 0x899   : > { %v4488_v24 = vpop.eup %4487  ;;  %v3359_v49 = vadd.f32 %v4486_v63, %v8569_v52  ;;  %v3514_v15 = vmul.f32 %v8527_v25, %v9600_v39  ;;  %v3423_v42 = vmul.f32 %v4486_v63, %v9601_v46  ;;  %v3515_v5 = vmul.f32 %v8513_v57, %v9602_v31  ;;  %v9605_v12 = vld [vmem:[#allocation88_spill] sm:$0xff]  ;;  %v9606_v63 = vld [vmem:[#allocation51_spill] sm:$0xff]  ;;  %v9611_v62 = vld [vmem:[#allocation97_spill] sm:$0xff] }
 0x89a   : > { %v4490_v44 = vpop.eup %4489  ;;  %3462 = vrot.lane.b32.xlu1 %v3419_v0, %s4642_s9  ;;  %v8590_v6 = vadd.f32 %v4488_v24, %v3356_v8  ;;  %v3516_v25 = vmul.f32 %v4488_v24, %v9604_v10  ;;  %v3518_v0 = vmul.f32 %v4482_v32, %v9605_v12  ;;  %v8639_v2 = vld [vmem:[%s8918_s2 + $0x6] ss:$0 sm:$0xff]  ;;  %4495 = vrcp.f32 %v8407_v22  ;;  %v9613_v22 = vld [vmem:[#allocation20_spill] sm:$0xff] }
 0x89b   : > { %v8592_v54 = vadd.f32 %v4490_v44, %v3357_v36  ;;  %v4492_v27 = vpop.eup %4491  ;;  %v3517_v7 = vmul.f32 %v4490_v44, %v9603_v60  ;;  %v9609_v41 = vld [vmem:[#allocation23_spill] sm:$0xff]  ;;  %v3398_v12 = vmul.f32 %v8452_v61, %v9613_v22 }
 0x89c   : > { %v8595_v11 = vadd.f32 %v4492_v27, %v3359_v49  ;;  %v3519_v8 = vmul.f32 %v4492_v27, %v9606_v63  ;;  %v9607_v49 = vld [vmem:[#allocation99_spill] sm:$0xff] }
 0x89e   : > { %v4494_v27 = vpop.eup %4493 }
 0x8a0   : > { %3548 = vrot.lane.b32.xlu2 %v3510_v1, %s4640_s7  ;;  %3460 = vrot.lane.b32.xlu0 %v3418_v37, %s4642_s9  ;;  %v3393_v1 = vmul.f32 %v9608_v14, %v9607_v49  ;;  %v4496_v60 = vpop.eup %4495 }
 0x8a2   : > { %3464 = vrot.lane.b32.xlu1 %v3420_v30, %s4642_s9 }
 0x8a8   : > { %3466 = vrot.lane.b32.xlu2 %v3421_v20, %s4642_s9  ;;  %3550 = vrot.lane.b32.xlu0 %v3511_v43, %s4640_s7 }
 0x8aa   : > { %3554 = vrot.lane.b32.xlu1 %v3513_v21, %s4640_s7  ;;  %v3397_v21 = vmul.f32 %v8383_v19, %v9609_v41 }
 0x8b0   : > { %3552 = vrot.lane.b32.xlu0 %v3512_v48, %s4640_s7  ;;  %3468 = vrot.lane.b32.xlu2 %v3422_v16, %s4642_s9  ;;  %v9610_v48 = vld [vmem:[#allocation60_spill] sm:$0xff] }
 0x8b1   : > { %4497 = vrcp.f32 %v9610_v48  ;;  %v9612_v16 = vld [vmem:[#allocation56_spill] sm:$0xff] }
 0x8b2   : > { %3556 = vrot.lane.b32.xlu1 %v3514_v15, %s4640_s7  ;;  %v3392_v39 = vmul.f32 %v9612_v16, %v9611_v62  ;;  %4499 = vrcp.f32 %v8542_v3 }
 0x8b3   : > { %4501 = vrcp.f32 %v8550_v28  ;;  %v9615_v28 = vld [vmem:[#allocation90_spill] sm:$0xff] }
 0x8b4   : > { %4503 = vrcp.f32 %v9615_v28 }
 0x8b5   : > { %v3445_v57 = vpop.permute.xlu2 %3444  ;;  %4505 = vrcp.f32 %v8555_v23 }
 0x8b6   : > { %4507 = vrcp.f32 %v8519_v26 }
 0x8b7   : > { %v4498_v10 = vpop.eup %4497  ;;  %4509 = vrcp.f32 %v8566_v53 }
 0x8b8   : > { %3470 = vrot.lane.b32.xlu0 %v3423_v42, %s4642_s9  ;;  %3558 = vrot.lane.b32.xlu2 %v3515_v5, %s4640_s7  ;;  %4511 = vrcp.f32 %v8583_v34 }
 0x8b9   : > { %4513 = vrcp.f32 %v8576_v40 }
 0x8ba   : > { %3562 = vrot.lane.b32.xlu1 %v3517_v7, %s4640_s7  ;;  %4515 = vrcp.f32 %v8573_v17 }
 0x8bb   : > { %4517 = vrcp.f32 %v8579_v18 }
 0x8bc   : > { %4519 = vrcp.f32 %v8592_v54 }
 0x8bd   : > { %4521 = vrcp.f32 %v8590_v6 }
 0x8be   : > { %4523 = vrcp.f32 %v8595_v11 }
 0x8c0   : > { %3560 = vrot.lane.b32.xlu0 %v3516_v25, %s4640_s7  ;;  %3564 = vrot.lane.b32.xlu2 %v3518_v0, %s4640_s7  ;;  %v9614_v0 = vld [vmem:[#allocation102_spill] sm:$0xff] }
 0x8c1   : > { %v3395_v63 = vmul.f32 %v8412_v47, %v9614_v0 }
 0x8c5   : > { %v3441_v24 = vpop.permute.xlu0 %3440 }
 0x8c6   : > { %v3488_v15 = vadd.f32 %v3441_v24, %v3392_v39 }
 0x8c8   : > { %3566 = vrot.lane.b32.xlu0 %v3519_v8, %s4640_s7  ;;  %s199_s7 = sand.u32 1, %s4630_s16  }
 0x8c9   : > { %s8879_s6 = sshll.u32 %s199_s7, 3  ;;  %s3999_s27 = scalar_lea.sflag [#allocation3], %s199_s7 }
 0x8ca   : > { %s201_s13 = scalar_lea.vmem [#allocation2], %s8879_s6 }
 0x8cb   : > { %s4015_s14 = sshll.u32 %s201_s13, 4  ;;  %s4016_s14 = int_to_ptr.vmem [resolvable:$true] %s4015_s14 }
 0x8da   : > { %v3453_v36 = vpop.permute.xlu2 %3452 }
 0x8dc   : > { %v3443_v44 = vpop.permute.xlu1 %3442 }
 0x8dd   : > { %v3489_v51 = vadd.f32 %v3443_v44, %v3393_v1  ;;  %v3494_v44 = vadd.f32 %v3453_v36, %v3398_v12 }
 0x8e2   : > { %v3539_v37 = vpop.permute.xlu2 %3538 }
 0x8e3   : > { %v3585_v32 = vadd.f32 %v3539_v37, %v3489_v51  ;;  %v4500_v37 = vpop.eup %4499 }
 0x8e4   : > { %v4502_v61 = vpop.eup %4501 }
 0x8e5   : > { %v8641_v30 = vmul.f32 %v4494_v27, %v3585_v32 }
 0x8e7   : > { %v3618_v33 = vmul.f32 %v8639_v2, %v8641_v30 }
 0x8e9   : > { %v3636_v20 = vsel %vm765_vm8, %v3618_v33, 0.0  ;;  %v3447_v56 = vpop.permute.xlu0 %3446  ;;  %v9616_v33 = vld [vmem:[#allocation98_spill] sm:$0xff] }
 0x8ea   : > { %v8646_v43 = vpop.permute.xlu2 %3456  ;;  %3637 = vadd.xlane.f32.xlu2 %v3636_v20  ;;  %v3491_v49 = vadd.f32 %v3447_v56, %v3395_v63  ;;  %v9617_v20 = vld [vmem:[#allocation73_spill] sm:$0xff]  ;;  %v9618_v56 = vld [vmem:[#allocation19_spill] sm:$0xff] }
 0x8eb   : > { %v3394_v36 = vmul.f32 %v9617_v20, %v9616_v33  ;;  %v9620_v33 = vld [vmem:[#allocation24_spill] sm:$0xff]  ;;  %v9621_v20 = vld [vmem:[#allocation66_spill] sm:$0xff] }
 0x8ec   : > { %v3451_v55 = vpop.permute.xlu1 %3450  ;;  %v3406_v26 = vmul.f32 %v8552_v45, %v9621_v20 }
 0x8ed   : > { %v3493_v35 = vadd.f32 %v3451_v55, %v3397_v21  ;;  %v3396_v55 = vmul.f32 %v8371_v13, %v9618_v56  ;;  %v3490_v21 = vadd.f32 %v3445_v57, %v3394_v36  ;;  %v9622_v36 = vld [vmem:[#allocation35_spill] sm:$0xff] }
 0x8ee   : > { %v3401_v56 = vmul.f32 %v8496_v50, %v9622_v36  ;;  %v9623_v50 = vld [vmem:[#allocation83_spill] sm:$0xff] }
 0x8f1   : > { %v3449_v46 = vpop.permute.xlu0 %3448 }
 0x8f2   : > { %v3547_v42 = vpop.permute.xlu2 %3546 }
 0x8f3   : > { %v3589_v31 = vadd.f32 %v3547_v42, %v3493_v35  ;;  %v3492_v35 = vadd.f32 %v3449_v46, %v3396_v55  ;;  %v4504_v42 = vpop.eup %4503 }
 0x8f4   : > { %v3537_v5 = vpop.permute.xlu1 %3536 }
 0x8f5   : > { %v3584_v7 = vadd.f32 %v3537_v5, %v3488_v15  ;;  %v8654_v25 = vmul.f32 %v4496_v60, %v3589_v31  ;;  %v4506_v5 = vpop.eup %4505 }
 0x8f7   : > { %v8657_v19 = vmul.f32 %v4498_v10, %v3584_v7  ;;  %v3622_v13 = vmul.f32 %v8639_v2, %v8654_v25 }
 0x8f9   : > { %v3617_v8 = vmul.f32 %v8639_v2, %v8657_v19  ;;  %v3648_v12 = vsel %vm765_vm8, %v3622_v13, 0.0  ;;  %v9624_v13 = vld [vmem:[#allocation15_spill] sm:$0xff] }
 0x8fa   : > { %v3455_v14 = vpop.permute.xlu0 %3454  ;;  %v3549_v1 = vpop.permute.xlu2 %3548 }
 0x8fb   : > { %v3633_v51 = vsel %vm765_vm8, %v3617_v8, 0.0  ;;  %v3590_v3 = vadd.f32 %v3549_v1, %v3494_v44  ;;  %v9619_v44 = vld [vmem:[#allocation103_spill] sm:$0xff] }
 0x8fc   : > { %3634 = vadd.xlane.f32.xlu1 %v3633_v51  ;;  %v3543_v24 = vpop.permute.xlu1 %3542 }
 0x8fd   : > { %v3587_v32 = vadd.f32 %v3543_v24, %v3491_v49  ;;  %v8667_v27 = vmul.f32 %v4500_v37, %v3590_v3  ;;  %v3403_v49 = vmul.f32 %v8499_v29, %v9619_v44  ;;  %v3399_v29 = vmul.f32 %v8433_v9, %v9620_v33 }
 0x8ff   : > { %v8670_v47 = vmul.f32 %v4502_v61, %v3587_v32  ;;  %v3623_v8 = vmul.f32 %v8639_v2, %v8667_v27  ;;  %v4508_v61 = vpop.eup %4507  ;;  %v3495_v55 = vadd.f32 %v3455_v14, %v3399_v29  ;;  %v3400_v14 = vmul.f32 %v8476_v59, %v9623_v50 }
 0x901   : > { %v3620_v41 = vmul.f32 %v8639_v2, %v8670_v47  ;;  %v3651_v51 = vsel %vm765_vm8, %v3623_v8, 0.0 }
 0x902   : > { %v3541_v48 = vpop.permute.xlu0 %3540  ;;  %v8679_v62 = vpop.permute.xlu2 %3466 }
 0x903   : > { %v3642_v16 = vsel %vm765_vm8, %v3620_v41, 0.0  ;;  %v3586_v39 = vadd.f32 %v3541_v48, %v3490_v21 }
 0x904   : > { %3643 = vadd.xlane.f32.xlu2 %v3642_v16  ;;  %v3545_v15 = vpop.permute.xlu1 %3544  ;;  %v4510_v16 = vpop.eup %4509 }
 0x905   : > { %v3588_v31 = vadd.f32 %v3545_v15, %v3492_v35  ;;  %v8682_v23 = vmul.f32 %v4504_v42, %v3586_v39  ;;  %v4512_v15 = vpop.eup %4511 }
 0x906   : > { %v4514_v9 = vpop.eup %4513 }
 0x907   : > { %v8684_v60 = vmul.f32 %v4506_v5, %v3588_v31  ;;  %v3619_v57 = vmul.f32 %v8639_v2, %v8682_v23 }
 0x909   : > { %v3621_v46 = vmul.f32 %v8639_v2, %v8684_v60  ;;  %v3639_v7 = vsel %vm765_vm8, %v3619_v57, 0.0  ;;  %v3402_v57 = vmul.f32 %v8523_v38, %v9624_v13 }
 0x90a   : > { %3640 = vadd.xlane.f32.xlu0 %v3639_v7  ;;  %v3459_v10 = vpop.permute.xlu0 %3458  ;;  %v3469_v22 = vpop.permute.xlu2 %3468  ;;  %v3496_v7 = vadd.f32 %v8646_v43, %v3400_v14 }
 0x90b   : > { %v3645_v0 = vsel %vm765_vm8, %v3621_v46, 0.0  ;;  %v3502_v41 = vadd.f32 %v3469_v22, %v3406_v26  ;;  %v3497_v21 = vadd.f32 %v3459_v10, %v3401_v56  ;;  %v9626_v26 = vld [vmem:[#allocation55_spill] sm:$0xff] }
 0x90c   : > { %3649 = vadd.xlane.f32.xlu2 %v3648_v12  ;;  %3646 = vadd.xlane.f32.xlu1 %v3645_v0  ;;  %v3463_v63 = vpop.permute.xlu1 %3462  ;;  %v3404_v36 = vmul.f32 %v8533_v4, %v9626_v26  ;;  %v9627_v4 = vld [vmem:[#allocation25_spill] sm:$0xff] }
 0x90d   : > { %v3499_v1 = vadd.f32 %v3463_v63, %v3403_v49  ;;  %v4516_v63 = vpop.eup %4515  ;;  %v9625_v49 = vld [vmem:[#allocation75_spill] sm:$0xff] }
 0x90e   : > { %v4518_v8 = vpop.eup %4517 }
 0x90f   : > { %v4520_v20 = vpop.eup %4519 }
 0x912   : > { %3652 = vadd.xlane.f32.xlu0 %v3651_v51  ;;  %v3461_v3 = vpop.permute.xlu0 %3460  ;;  %v3559_v24 = vpop.permute.xlu2 %3558 }
 0x913   : > { %v3595_v37 = vadd.f32 %v3559_v24, %v3499_v1  ;;  %v3498_v10 = vadd.f32 %v3461_v3, %v3402_v57  ;;  %v3405_v1 = vmul.f32 %v8546_v58, %v9625_v49 }
 0x914   : > { %v3465_v32 = vpop.permute.xlu1 %3464 }
 0x915   : > { %v8701_v28 = vmul.f32 %v4508_v61, %v3595_v37  ;;  %v3501_v24 = vadd.f32 %v8679_v62, %v3405_v1  ;;  %v3500_v56 = vadd.f32 %v3465_v32, %v3404_v36 }
 0x917   : > { %v3628_v54 = vmul.f32 %v8639_v2, %v8701_v28 }
 0x91a   : > { %v3551_v35 = vpop.permute.xlu0 %3550  ;;  %v3565_v48 = vpop.permute.xlu2 %3564 }
 0x91b   : > { %v3591_v53 = vadd.f32 %v3551_v35, %v3495_v55  ;;  %v3598_v39 = vadd.f32 %v3565_v48, %v3502_v41  ;;  %v3666_v55 = vsel %vm765_vm8, %v3628_v54, 0.0  ;;  %v4522_v48 = vpop.eup %4521 }
 0x91c   : > { %v3555_v34 = vpop.permute.xlu1 %3554  ;;  %v4524_v50 = vpop.eup %4523 }
 0x91d   : > { %v3593_v42 = vadd.f32 %v3555_v34, %v3497_v21  ;;  %v8712_v31 = vmul.f32 %v4510_v16, %v3591_v53  ;;  %v8714_v45 = vmul.f32 %v4512_v15, %v3598_v39  ;;  %v3407_v53 = vmul.f32 %v8569_v52, %v9627_v4 }
 0x91f   : > { %v8717_v40 = vmul.f32 %v4514_v9, %v3593_v42  ;;  %v3624_v5 = vmul.f32 %v8639_v2, %v8712_v31  ;;  %v3631_v6 = vmul.f32 %v8639_v2, %v8714_v45 }
 0x921   : > { %v3626_v46 = vmul.f32 %v8639_v2, %v8717_v40  ;;  %v3654_v17 = vsel %vm765_vm8, %v3624_v5, 0.0  ;;  %v3675_v34 = vsel %vm765_vm8, %v3631_v6, 0.0 }
 0x922   : > { %v3553_v22 = vpop.permute.xlu0 %3552  ;;  %3655 = vadd.xlane.f32.xlu1 %v3654_v17 }
 0x923   : > { %v3660_v59 = vsel %vm765_vm8, %v3626_v46, 0.0  ;;  %v3592_v12 = vadd.f32 %v3553_v22, %v3496_v7 }
 0x924   : > { %3661 = vadd.xlane.f32.xlu0 %v3660_v59  ;;  %v3557_v0 = vpop.permute.xlu1 %3556 }
 0x925   : > { %v3594_v18 = vadd.f32 %v3557_v0, %v3498_v10  ;;  %v8731_v44 = vmul.f32 %v4516_v63, %v3592_v12 }
 0x927   : > { %v8733_v38 = vmul.f32 %v4518_v8, %v3594_v18  ;;  %v3625_v43 = vmul.f32 %v8639_v2, %v8731_v44 }
 0x929   : > { %v3627_v51 = vmul.f32 %v8639_v2, %v8733_v38  ;;  %v3657_v3 = vsel %vm765_vm8, %v3625_v43, 0.0 }
 0x92a   : > { %v3471_v37 = vpop.permute.xlu0 %3470  ;;  %3658 = vadd.xlane.f32.xlu2 %v3657_v3 }
 0x92b   : > { %v3663_v61 = vsel %vm765_vm8, %v3627_v51, 0.0  ;;  %v3503_v39 = vadd.f32 %v3471_v37, %v3407_v53 }
 0x92c   : > { %3664 = vadd.xlane.f32.xlu1 %v3663_v61  ;;  %v3563_v33 = vpop.permute.xlu1 %3562 }
 0x92d   : > { %v3597_v29 = vadd.f32 %v3563_v33, %v3501_v24 }
 0x92f   : > { %v8748_v58 = vmul.f32 %v4520_v20, %v3597_v29 }
 0x931   : > { %v3630_v62 = vmul.f32 %v8639_v2, %v8748_v58 }
 0x932   : > { %v3561_v41 = vpop.permute.xlu0 %3560  ;;  %3667 = vadd.xlane.f32.xlu2 %v3666_v55 }
 0x933   : > { %v3672_v21 = vsel %vm765_vm8, %v3630_v62, 0.0  ;;  %v3596_v35 = vadd.f32 %v3561_v41, %v3500_v56 }
 0x934   : > { %3673 = vadd.xlane.f32.xlu1 %v3672_v21 }
 0x935   : > { %v8756_v16 = vmul.f32 %v4522_v48, %v3596_v35 }
 0x937   : > { %v3629_v32 = vmul.f32 %v8639_v2, %v8756_v16 }
 0x939   : > { %v3669_v15 = vsel %vm765_vm8, %v3629_v32, 0.0 }
 0x93a   : > { %v3567_v42 = vpop.permute.xlu0 %3566  ;;  %3676 = vadd.xlane.f32.xlu2 %v3675_v34  ;;  %3670 = vadd.xlane.f32.xlu0 %v3669_v15 }
 0x93b   : > { %v3599_v9 = vadd.f32 %v3567_v42, %v3503_v39 }
 0x93d   : > { %v8767_v14 = vmul.f32 %v4524_v50, %v3599_v9 }
 0x93f   : > { %v3632_v11 = vmul.f32 %v8639_v2, %v8767_v14 }
 0x941   : > { %v3678_v52 = vsel %vm765_vm8, %v3632_v11, 0.0 }
 0x942   : > { %3679 = vadd.xlane.f32.xlu0 %v3678_v52 }
 0x95d   : > { %v3638_v13 = vpop.xlane.xlu2 %3637 }
 0x95e   : > { %v3682_v46 = vmul.f32 0.17677669, %v3638_v13 }
 0x96f   : > { %v3635_v5 = vpop.xlane.xlu1 %3634 }
 0x970   : > { %v3681_v57 = vmul.f32 0.17677669, %v3635_v5 }
 0x972   : > { %v3697_v7 = vmax.f32 %v3681_v57, %v3682_v46 }
 0x974   : > { %v3698_v10 = vrot.slane %v3697_v7, 4 }
 0x976   : > { %v3699_v12 = vmax.f32 %v3697_v7, %v3698_v10 }
 0x977   : > { %v3644_v17 = vpop.xlane.xlu2 %3643 }
 0x978   : > { %v3684_v22 = vmul.f32 0.17677669, %v3644_v17  ;;  %v3700_v49 = vrot.slane %v3699_v12, 2 }
 0x97a   : > { %v3701_v24 = vmax.f32 %v3699_v12, %v3700_v49 }
 0x97c   : > { %v3702_v20 = vrot.slane %v3701_v24, 1 }
 0x97d   : > { %v3641_v59 = vpop.xlane.xlu0 %3640 }
 0x97e   : > { %v3683_v0 = vmul.f32 0.17677669, %v3641_v59  ;;  %v3703_v62 = vmax.f32 %v3701_v24, %v3702_v20 }
 0x97f   : > { %v3650_v18 = vpop.xlane.xlu2 %3649  ;;  %v3647_v8 = vpop.xlane.xlu1 %3646 }
 0x980   : > { %v3704_v63 = vmax.f32 %v3683_v0, %v3684_v22  ;;  %v3686_v43 = vmul.f32 0.17677669, %v3650_v18  ;;  %v3685_v1 = vmul.f32 0.17677669, %v3647_v8  ;;  %v3753_v41 = vsub.f32 %v3681_v57, %v3703_v62 }
 0x981   : > { %v3754_v35 = vsub.f32 %v3682_v46, %v3703_v62 }
 0x982   : > { %v3705_v2 = vrot.slane %v3704_v63, 4  ;;  %v3711_v3 = vmax.f32 %v3685_v1, %v3686_v43  ;;  %v3769_v32 = vmul.f32 1.442695, %v3753_v41 }
 0x983   : > { %v3771_v15 = vmul.f32 1.442695, %v3754_v35 }
 0x984   : > { %v3706_v51 = vmax.f32 %v3704_v63, %v3705_v2  ;;  %v3712_v61 = vrot.slane %v3711_v3, 4  ;;  %4525 = vpow2.f32 %v3769_v32 }
 0x985   : > { %v3653_v21 = vpop.xlane.xlu0 %3652  ;;  %4527 = vpow2.f32 %v3771_v15 }
 0x986   : > { %v3707_v37 = vrot.slane %v3706_v51, 2  ;;  %v3713_v29 = vmax.f32 %v3711_v3, %v3712_v61  ;;  %v3687_v39 = vmul.f32 0.17677669, %v3653_v21 }
 0x988   : > { %v3708_v33 = vmax.f32 %v3706_v51, %v3707_v37  ;;  %v3714_v54 = vrot.slane %v3713_v29, 2 }
 0x98a   : > { %v3709_v26 = vrot.slane %v3708_v33, 1  ;;  %v3715_v36 = vmax.f32 %v3713_v29, %v3714_v54  ;;  %v8772_v12 = vpop.eup %4525 }
 0x98b   : > { %v8774_v63 = vpop.eup %4527 }
 0x98c   : > { %v3716_v56 = vrot.slane %v3715_v36, 1  ;;  %v3710_v55 = vmax.f32 %v3708_v33, %v3709_v26  ;;  %v3801_v51 = vadd.f32 %v8774_v63, %v8772_v12 }
 0x98e   : > { %v3717_v48 = vmax.f32 %v3715_v36, %v3716_v56  ;;  %v3755_v6 = vsub.f32 %v3683_v0, %v3710_v55  ;;  %v3756_v4 = vsub.f32 %v3684_v22, %v3710_v55  ;;  %v3802_v56 = vrot.slane %v3801_v51, 4 }
 0x990   : > { %v3757_v42 = vsub.f32 %v3685_v1, %v3717_v48  ;;  %v3773_v9 = vmul.f32 1.442695, %v3755_v6  ;;  %v3758_v50 = vsub.f32 %v3686_v43, %v3717_v48  ;;  %v3775_v52 = vmul.f32 1.442695, %v3756_v4 }
 0x991   : > { %v3803_v15 = vadd.f32 %v3802_v56, %v3801_v51 }
 0x992   : > { %v3777_v57 = vmul.f32 1.442695, %v3757_v42  ;;  %4529 = vpow2.f32 %v3773_v9  ;;  %v3779_v46 = vmul.f32 1.442695, %v3758_v50 }
 0x993   : > { %4531 = vpow2.f32 %v3775_v52 }
 0x994   : > { %4533 = vpow2.f32 %v3777_v57  ;;  %v3804_v57 = vrot.slane %v3803_v15, 2 }
 0x995   : > { %v3656_v53 = vpop.xlane.xlu1 %3655  ;;  %4535 = vpow2.f32 %v3779_v46 }
 0x996   : > { %v3688_v34 = vmul.f32 0.17677669, %v3656_v53 }
 0x997   : > { %v3662_v13 = vpop.xlane.xlu0 %3661 }
 0x998   : > { %v3718_v11 = vmax.f32 %v3687_v39, %v3688_v34  ;;  %v3690_v10 = vmul.f32 0.17677669, %v3662_v13  ;;  %v8776_v43 = vpop.eup %4529 }
 0x999   : > { %v8778_v49 = vpop.eup %4531 }
 0x99a   : > { %v3719_v5 = vrot.slane %v3718_v11, 4  ;;  %v8784_v24 = vpop.eup %4533  ;;  %v3808_v20 = vadd.f32 %v8778_v49, %v8776_v43 }
 0x99b   : > { %v8786_v29 = vpop.eup %4535 }
 0x99c   : > { %v3720_v7 = vmax.f32 %v3718_v11, %v3719_v5  ;;  %v3815_v41 = vadd.f32 %v8786_v29, %v8784_v24  ;;  %v3809_v4 = vrot.slane %v3808_v20, 4 }
 0x99d   : > { %v3659_v17 = vpop.xlane.xlu2 %3658 }
 0x99e   : > { %v3721_v22 = vrot.slane %v3720_v7, 2  ;;  %v3689_v59 = vmul.f32 0.17677669, %v3659_v17  ;;  %v3810_v11 = vadd.f32 %v3809_v4, %v3808_v20 }
 0x99f   : > { %v3665_v0 = vpop.xlane.xlu1 %3664 }
 0x9a0   : > { %v3722_v18 = vmax.f32 %v3720_v7, %v3721_v22  ;;  %v3725_v8 = vmax.f32 %v3689_v59, %v3690_v10  ;;  %v8782_v3 = vmul.f32 0.17677669, %v3665_v0 }
 0x9a2   : > { %v3723_v2 = vrot.slane %v3722_v18, 1  ;;  %v3726_v1 = vrot.slane %v3725_v8, 4 }
 0x9a4   : > { %v3724_v37 = vmax.f32 %v3722_v18, %v3723_v2  ;;  %v3727_v61 = vmax.f32 %v3725_v8, %v3726_v1  ;;  %v3811_v8 = vrot.slane %v3810_v11, 2 }
 0x9a5   : > { %v3668_v33 = vpop.xlane.xlu2 %3667 }
 0x9a6   : > { %v3692_v54 = vmul.f32 0.17677669, %v3668_v33  ;;  %v3759_v26 = vsub.f32 %v3687_v39, %v3724_v37  ;;  %v3760_v36 = vsub.f32 %v3688_v34, %v3724_v37  ;;  %v3728_v62 = vrot.slane %v3727_v61, 2 }
 0x9a7   : > { %v3674_v6 = vpop.xlane.xlu1 %3673  ;;  %v3816_v39 = vrot.slane %v3815_v41, 4 }
 0x9a8   : > { %v3732_v55 = vmax.f32 %v8782_v3, %v3692_v54  ;;  %v3781_v21 = vmul.f32 1.442695, %v3759_v26  ;;  %v3783_v35 = vmul.f32 1.442695, %v3760_v36  ;;  %v3729_v48 = vmax.f32 %v3727_v61, %v3728_v62 }
 0x9a9   : > { %v8793_v9 = vmul.f32 0.17677669, %v3674_v6  ;;  %v3817_v0 = vadd.f32 %v3816_v39, %v3815_v41  ;;  %v3805_v61 = vadd.f32 %v3804_v57, %v3803_v15  ;;  %v3812_v62 = vadd.f32 %v3811_v8, %v3810_v11 }
 0x9aa   : > { %v3733_v53 = vrot.slane %v3732_v55, 4  ;;  %4537 = vpow2.f32 %v3781_v21  ;;  %v3730_v32 = vrot.slane %v3729_v48, 1 }
 0x9ab   : > { %4539 = vpow2.f32 %v3783_v35  ;;  %v3818_v20 = vrot.slane %v3817_v0, 2  ;;  %v3806_v6 = vrot.slane %v3805_v61, 1 }
 0x9ac   : > { %v3734_v42 = vmax.f32 %v3732_v55, %v3733_v53  ;;  %v3731_v34 = vmax.f32 %v3729_v48, %v3730_v32 }
 0x9ad   : > { %v3671_v50 = vpop.xlane.xlu0 %3670  ;;  %v3819_v32 = vadd.f32 %v3818_v20, %v3817_v0 }
 0x9ae   : > { %v3735_v52 = vrot.slane %v3734_v42, 2  ;;  %v3693_v5 = vmul.f32 0.17677669, %v3671_v50  ;;  %v3761_v13 = vsub.f32 %v3689_v59, %v3731_v34  ;;  %v3762_v46 = vsub.f32 %v3690_v10, %v3731_v34  ;;  %v3677_v10 = vpop.xlane.xlu2 %3676 }
 0x9af   : > { %v3695_v21 = vmul.f32 0.17677669, %v3677_v10  ;;  %v3813_v50 = vrot.slane %v3812_v62, 1 }
 0x9b0   : > { %v3736_v7 = vmax.f32 %v3734_v42, %v3735_v52  ;;  %v3739_v17 = vmax.f32 %v3693_v5, %v8793_v9  ;;  %v8796_v22 = vpop.eup %4537  ;;  %v3785_v18 = vmul.f32 1.442695, %v3761_v13  ;;  %v3787_v2 = vmul.f32 1.442695, %v3762_v46 }
 0x9b1   : > { %v8798_v37 = vpop.eup %4539  ;;  %v3807_v13 = vadd.f32 %v3806_v6, %v3805_v61 }
 0x9b2   : > { %v3737_v1 = vrot.slane %v3736_v7, 1  ;;  %v3740_v51 = vrot.slane %v3739_v17, 4  ;;  %v3822_v33 = vadd.f32 %v8798_v37, %v8796_v22  ;;  %4541 = vpow2.f32 %v3785_v18 }
 0x9b3   : > { %4543 = vpow2.f32 %v3787_v2  ;;  %v3814_v18 = vadd.f32 %v3813_v50, %v3812_v62 }
 0x9b4   : > { %v3738_v59 = vmax.f32 %v3736_v7, %v3737_v1  ;;  %v3741_v26 = vmax.f32 %v3739_v17, %v3740_v51  ;;  %v3823_v56 = vrot.slane %v3822_v33, 4  ;;  %v3820_v7 = vrot.slane %v3819_v32, 1 }
 0x9b5   : > { %v3680_v36 = vpop.xlane.xlu0 %3679 }
 0x9b6   : > { %v3763_v55 = vsub.f32 %v8782_v3, %v3738_v59  ;;  %v3764_v41 = vsub.f32 %v3692_v54, %v3738_v59  ;;  %v3742_v35 = vrot.slane %v3741_v26, 2  ;;  %v3696_v48 = vmul.f32 0.17677669, %v3680_v36 }
 0x9b7   : > { %v3824_v4 = vadd.f32 %v3823_v56, %v3822_v33  ;;  %v3821_v61 = vadd.f32 %v3820_v7, %v3819_v32 }
 0x9b8   : > { %v3789_v53 = vmul.f32 1.442695, %v3763_v55  ;;  %v3791_v15 = vmul.f32 1.442695, %v3764_v41  ;;  %v3743_v42 = vmax.f32 %v3741_v26, %v3742_v35  ;;  %v3746_v39 = vmax.f32 %v3695_v21, %v3696_v48  ;;  %v8803_v34 = vpop.eup %4541 }
 0x9b9   : > { %v3825_v52 = vrot.slane %v3824_v4, 2  ;;  %v8805_v11 = vpop.eup %4543 }
 0x9ba   : > { %4545 = vpow2.f32 %v3789_v53  ;;  %v3744_v3 = vrot.slane %v3743_v42, 1  ;;  %v3747_v54 = vrot.slane %v3746_v39, 4  ;;  %v3829_v46 = vadd.f32 %v8805_v11, %v8803_v34 }
 0x9bb   : > { %4547 = vpow2.f32 %v3791_v15  ;;  %v3826_v57 = vadd.f32 %v3825_v52, %v3824_v4 }
 0x9bc   : > { %v3745_v17 = vmax.f32 %v3743_v42, %v3744_v3  ;;  %v3748_v0 = vmax.f32 %v3746_v39, %v3747_v54  ;;  %v3830_v8 = vrot.slane %v3829_v46, 4  ;;  %4549 = vrcp.f32 %v3807_v13 }
 0x9bd   : > { %v3827_v2 = vrot.slane %v3826_v57, 1  ;;  %4551 = vrcp.f32 %v3814_v18 }
 0x9be   : > { %v3765_v1 = vsub.f32 %v3693_v5, %v3745_v17  ;;  %v3766_v51 = vsub.f32 %v8793_v9, %v3745_v17  ;;  %v3749_v33 = vrot.slane %v3748_v0, 2  ;;  %v3831_v10 = vadd.f32 %v3830_v8, %v3829_v46 }
 0x9bf   : > { %v3828_v41 = vadd.f32 %v3827_v2, %v3826_v57 }
 0x9c0   : > { %v8810_v59 = vpop.eup %4545  ;;  %v3793_v26 = vmul.f32 1.442695, %v3765_v1  ;;  %v3795_v36 = vmul.f32 1.442695, %v3766_v51  ;;  %v3750_v56 = vmax.f32 %v3748_v0, %v3749_v33  ;;  %v3832_v55 = vrot.slane %v3831_v10, 2 }
 0x9c1   : > { %v8812_v20 = vpop.eup %4547 }
 0x9c2   : > { %v3836_v62 = vadd.f32 %v8812_v20, %v8810_v59  ;;  %4553 = vpow2.f32 %v3793_v26  ;;  %v3751_v5 = vrot.slane %v3750_v56, 1  ;;  %v3833_v9 = vadd.f32 %v3832_v55, %v3831_v10  ;;  %v4550_v4 = vpop.eup %4549 }
 0x9c3   : > { %4555 = vpow2.f32 %v3795_v36  ;;  %v4552_v39 = vpop.eup %4551  ;;  %v3865_v8 = vmul.f32 %v4550_v4, %v8772_v12  ;;  %v3866_v1 = vmul.f32 %v4550_v4, %v8774_v63 }
 0x9c4   : > { %v3837_v35 = vrot.slane %v3836_v62, 4  ;;  %4557 = vrcp.f32 %v3821_v61  ;;  %v3752_v6 = vmax.f32 %v3750_v56, %v3751_v5  ;;  %v3834_v53 = vrot.slane %v3833_v9, 1 }
 0x9c5   : > { %4559 = vrcp.f32 %v3828_v41  ;;  %v3867_v17 = vmul.f32 %v4552_v39, %v8776_v43  ;;  %v3868_v0 = vmul.f32 %v4552_v39, %v8778_v49  ;;  %v3881_v63 = vmul.f32 %v3865_v8, %v8657_v19 }
 0x9c6   : > { %v3838_v15 = vadd.f32 %v3837_v35, %v3836_v62  ;;  %v3767_v32 = vsub.f32 %v3695_v21, %v3752_v6  ;;  %v3768_v42 = vsub.f32 %v3696_v48, %v3752_v6  ;;  %v3835_v50 = vadd.f32 %v3834_v53, %v3833_v9 }
 0x9c7   : > { %v3883_v43 = vmul.f32 %v3867_v17, %v8682_v23  ;;  %v3884_v49 = vmul.f32 %v3868_v0, %v8670_v47  ;;  %v3882_v47 = vmul.f32 %v3866_v1, %v8641_v30 }
 0x9c8   : > { %v3839_v52 = vrot.slane %v3838_v15, 2  ;;  %v8816_v3 = vpop.eup %4553  ;;  %v3797_v54 = vmul.f32 1.442695, %v3767_v32  ;;  %v3799_v13 = vmul.f32 1.442695, %v3768_v42  ;;  %4561 = vrcp.f32 %v3835_v50 }
 0x9c9   : > { %v8818_v57 = vpop.eup %4555  ;;  %v3907_v41 = vsel %vm765_vm8, %v3884_v49, 0.0  ;;  %v3898_v4 = vsel %vm765_vm8, %v3882_v47, 0.0 }
 0x9ca   : > { %v3840_v46 = vadd.f32 %v3839_v52, %v3838_v15  ;;  %v4558_v7 = vpop.eup %4557  ;;  %v3843_v21 = vadd.f32 %v8818_v57, %v8816_v3  ;;  %4563 = vpow2.f32 %v3797_v54 }
 0x9cb   : > { %4565 = vpow2.f32 %v3799_v13  ;;  %v4560_v18 = vpop.eup %4559  ;;  %v3869_v51 = vmul.f32 %v4558_v7, %v8784_v24  ;;  %v3870_v33 = vmul.f32 %v4558_v7, %v8786_v29 }
 0x9cc   : > { %v3841_v48 = vrot.slane %v3840_v46, 1  ;;  %v3844_v2 = vrot.slane %v3843_v21, 4  ;;  %v3871_v36 = vmul.f32 %v4560_v18, %v8796_v22  ;;  %v3872_v56 = vmul.f32 %v4560_v18, %v8798_v37 }
 0x9cd   : > { %v3885_v23 = vmul.f32 %v3869_v51, %v8684_v60  ;;  %v3886_v22 = vmul.f32 %v3870_v33, %v8654_v25  ;;  %v3906_v37 = vsel %vm765_vm8, %v3883_v43, 0.0  ;;  %v3897_v60 = vsel %vm765_vm8, %v3881_v63, 0.0 }
 0x9ce   : > { %v3842_v10 = vadd.f32 %v3841_v48, %v3840_v46  ;;  %v3845_v61 = vadd.f32 %v3844_v2, %v3843_v21  ;;  %v4562_v26 = vpop.eup %4561  ;;  %v3908_v53 = vadd.f32 %v3907_v41, %v3906_v37  ;;  %v3899_v7 = vadd.f32 %v3898_v4, %v3897_v60 }
 0x9cf   : > { %v3873_v24 = vmul.f32 %v4562_v26, %v8803_v34  ;;  %v3874_v29 = vmul.f32 %v4562_v26, %v8805_v11  ;;  %v3887_v34 = vmul.f32 %v3871_v36, %v8667_v27  ;;  %v3888_v11 = vmul.f32 %v3872_v56, %v8712_v31 }
 0x9d0   : > { %4567 = vrcp.f32 %v3842_v10  ;;  %v8832_v12 = vpop.eup %4563  ;;  %v3846_v55 = vrot.slane %v3845_v61, 2  ;;  %v3915_v15 = vsel %vm765_vm8, %v3885_v23, 0.0  ;;  %v3916_v32 = vsel %vm765_vm8, %v3886_v22, 0.0 }
 0x9d1   : > { %v8837_v62 = vpop.eup %4565  ;;  %v3889_v9 = vmul.f32 %v3873_v24, %v8731_v44  ;;  %v3890_v30 = vmul.f32 %v3874_v29, %v8717_v40  ;;  %v3924_v40 = vsel %vm765_vm8, %v3887_v34, 0.0  ;;  %v3925_v39 = vsel %vm765_vm8, %v3888_v11, 0.0 }
 0x9d2   : > { %v3847_v5 = vadd.f32 %v3846_v55, %v3845_v61  ;;  %v3850_v19 = vadd.f32 %v8837_v62, %v8832_v12  ;;  %v3926_v17 = vadd.f32 %v3925_v39, %v3924_v40  ;;  %v3909_v18 = vrot.slane %v3908_v53, 4 }
 0x9d3   : > { %v3933_v50 = vsel %vm765_vm8, %v3889_v9, 0.0  ;;  %v3934_v52 = vsel %vm765_vm8, %v3890_v30, 0.0  ;;  %v3900_v33 = vrot.slane %v3899_v7, 4 }
 0x9d4   : > { %v3848_v35 = vrot.slane %v3847_v5, 1  ;;  %v3851_v25 = vrot.slane %v3850_v19, 4  ;;  %v3935_v48 = vadd.f32 %v3934_v52, %v3933_v50  ;;  %v3910_v61 = vadd.f32 %v3909_v18, %v3908_v53 }
 0x9d5   : > { %v3901_v24 = vadd.f32 %v3900_v33, %v3899_v7 }
 0x9d6   : > { %v4568_v6 = vpop.eup %4567  ;;  %v3849_v42 = vadd.f32 %v3848_v35, %v3847_v5  ;;  %v3852_v44 = vadd.f32 %v3851_v25, %v3850_v19  ;;  %v3911_v22 = vrot.slane %v3910_v61, 2 }
 0x9d7   : > { %v3875_v27 = vmul.f32 %v4568_v6, %v8810_v59  ;;  %v3876_v31 = vmul.f32 %v4568_v6, %v8812_v20  ;;  %v3917_v59 = vadd.f32 %v3916_v32, %v3915_v15  ;;  %v3902_v5 = vrot.slane %v3901_v24, 2 }
 0x9d8   : > { %4569 = vrcp.f32 %v3849_v42  ;;  %v3853_v46 = vrot.slane %v3852_v44, 2  ;;  %v3912_v9 = vadd.f32 %v3911_v22, %v3910_v61 }
 0x9d9   : > { %v3891_v54 = vmul.f32 %v3875_v27, %v8733_v38  ;;  %v3892_v13 = vmul.f32 %v3876_v31, %v8701_v28  ;;  %v3918_v1 = vrot.slane %v3917_v59, 4  ;;  %v3927_v38 = vrot.slane %v3926_v17, 4 }
 0x9da   : > { %v3854_v21 = vadd.f32 %v3853_v46, %v3852_v44  ;;  %v3936_v28 = vrot.slane %v3935_v48, 4  ;;  %v3903_v4 = vadd.f32 %v3902_v5, %v3901_v24  ;;  %v3913_v31 = vrot.slane %v3912_v9, 1 }
 0x9db   : > { %v3942_v20 = vsel %vm765_vm8, %v3891_v54, 0.0  ;;  %v3943_v0 = vsel %vm765_vm8, %v3892_v13, 0.0  ;;  %v3919_v36 = vadd.f32 %v3918_v1, %v3917_v59  ;;  %v3928_v29 = vadd.f32 %v3927_v38, %v3926_v17 }
 0x9dc   : > { %v3944_v8 = vadd.f32 %v3943_v0, %v3942_v20  ;;  %v3855_v2 = vrot.slane %v3854_v21, 1  ;;  %v3937_v55 = vadd.f32 %v3936_v28, %v3935_v48  ;;  %v3904_v39 = vrot.slane %v3903_v4, 1 }
 0x9dd   : > { %v3920_v41 = vrot.slane %v3919_v36, 2  ;;  %v3929_v19 = vrot.slane %v3928_v29, 2  ;;  %v3914_v52 = vadd.f32 %v3913_v31, %v3912_v9 }
 0x9de   : > { %v4570_v51 = vpop.eup %4569  ;;  %v3856_v10 = vadd.f32 %v3855_v2, %v3854_v21  ;;  %v3945_v26 = vrot.slane %v3944_v8, 4  ;;  %v3938_v11 = vrot.slane %v3937_v55, 2  ;;  %v3905_v59 = vadd.f32 %v3904_v39, %v3903_v4 }
 0x9df   : > { %v3877_v43 = vmul.f32 %v4570_v51, %v8816_v3  ;;  %v3878_v49 = vmul.f32 %v4570_v51, %v8818_v57  ;;  %v3921_v35 = vadd.f32 %v3920_v41, %v3919_v36  ;;  %v3930_v53 = vadd.f32 %v3929_v19, %v3928_v29 }
 0x9e0   : > { %4571 = vrcp.f32 %v3856_v10  ;;  %v3946_v37 = vadd.f32 %v3945_v26, %v3944_v8  ;;  %v3978_v18 = vsel %vm3977_vm9, %v3914_v52, %v3905_v59 }
 0x9e1   : > { %v3893_v56 = vmul.f32 %v3877_v43, %v8756_v16  ;;  %v3894_v63 = vmul.f32 %v3878_v49, %v8748_v58  ;;  %v3922_v44 = vrot.slane %v3921_v35, 1  ;;  %v3931_v50 = vrot.slane %v3930_v53, 1 }
 0x9e2   : > { %v3947_v30 = vrot.slane %v3946_v37, 2 }
 0x9e3   : > { %v3951_v47 = vsel %vm765_vm8, %v3893_v56, 0.0  ;;  %v3952_v23 = vsel %vm765_vm8, %v3894_v63, 0.0  ;;  %v3923_v46 = vadd.f32 %v3922_v44, %v3921_v35  ;;  %v3932_v17 = vadd.f32 %v3931_v50, %v3930_v53 }
 0x9e4   : > { %v3953_v3 = vadd.f32 %v3952_v23, %v3951_v47  ;;  %v3948_v42 = vadd.f32 %v3947_v30, %v3946_v37 }
 0x9e5   : > { %v3980_v2 = vsel %vm3979_vm15, %v3923_v46, %v3978_v18 }
 0x9e6   : > { %v4572_v57 = vpop.eup %4571  ;;  %v3954_v34 = vrot.slane %v3953_v3, 4  ;;  %v3949_v54 = vrot.slane %v3948_v42, 1  ;;  %v3982_v51 = vsel %vm3981_vm4, %v3932_v17, %v3980_v2 }
 0x9e7   : > { %v3879_v16 = vmul.f32 %v4572_v57, %v8832_v12  ;;  %v3880_v58 = vmul.f32 %v4572_v57, %v8837_v62  ;;  %v3939_v12 = vadd.f32 %v3938_v11, %v3937_v55 }
 0x9e8   : > { %v3955_v60 = vadd.f32 %v3954_v34, %v3953_v3  ;;  %v3950_v21 = vadd.f32 %v3949_v54, %v3948_v42 }
 0x9e9   : > { %v3895_v25 = vmul.f32 %v3879_v16, %v8714_v45  ;;  %v3896_v6 = vmul.f32 %v3880_v58, %v8767_v14  ;;  %v3940_v14 = vrot.slane %v3939_v12, 1 }
 0x9ea   : > { %v3956_v15 = vrot.slane %v3955_v60, 2 }
 0x9eb   : > { %v3960_v32 = vsel %vm765_vm8, %v3895_v25, 0.0  ;;  %v3961_v27 = vsel %vm765_vm8, %v3896_v6, 0.0  ;;  %v3941_v0 = vadd.f32 %v3940_v14, %v3939_v12 }
 0x9ec   : > { %v3962_v62 = vadd.f32 %v3961_v27, %v3960_v32  ;;  %v3957_v40 = vadd.f32 %v3956_v15, %v3955_v60 }
 0x9ed   : > { %v3984_v33 = vsel %vm3983_vm2, %v3941_v0, %v3982_v51 }
 0x9ee   : > { %v3963_v45 = vrot.slane %v3962_v62, 4  ;;  %v3958_v7 = vrot.slane %v3957_v40, 1  ;;  %v3986_v10 = vsel %vm3985_vm5, %v3950_v21, %v3984_v33 }
 0x9f0   : > { %v3964_v13 = vadd.f32 %v3963_v45, %v3962_v62  ;;  %v3959_v8 = vadd.f32 %v3958_v7, %v3957_v40 }
 0x9f2   : > { %v3965_v20 = vrot.slane %v3964_v13, 2  ;;  %v3988_v28 = vsel %vm3987_vm6, %v3959_v8, %v3986_v10 }
 0x9f4   : > { %v3966_v48 = vadd.f32 %v3965_v20, %v3964_v13 }
 0x9f6   : > { %v3967_v1 = vrot.slane %v3966_v48, 1 }
 0x9f8   : > { %v3968_v38 = vadd.f32 %v3967_v1, %v3966_v48 }
 0x9fa   : > { %v3990_v43 = vsel %vm3989_vm7, %v3968_v38, %v3988_v28 }
 0x9fb   : > { %3992 = vst.msk [vmem:[%s201_s13] sm:$0xff] %vm765_vm8, %v3990_v43 }
 0x9fc   : > { %4603 = shalt.err (!%p4600_p4)
}
 0x9fd   : > { %4249 = dma.vmem_to_hbm [thread:$0]  (%p4707_p5), %s4016_s14, 128, %s4018_s20, %s3999_s27  }
 0x9fe PF: > { %p4255_p7 = scmp.ge.s32.totalorder %s4638_s18, 2  ;;  %s4037_s9 = sand.u32 1, %s4626_s15  }
 0x9ff   : > { %s4038_s5 = scalar_lea.sflag [#allocation3], %s4037_s9 }
 0xa00   : > { %p4252_p8 = pnand %p4255_p7, %p4711_p6 }
 0xa02   : > { %p4253_p9 = pneg %p4252_p8 }
 0xa04   : > { %4621 = dma.done.wait (%p4253_p9), %s4038_s5, 128  }
 0xa05   : > { %4623 = vsyncadd (%p4253_p9), %s4038_s5, 4294967168  ;;  %p15_p10 = scmp.ge.s32.totalorder %s4694_s21, 4   ;;  %s9628_s15 = smov %s4630_s16 }
 0xa06   : > { %s9629_s16 = smov %s4634_s17  ;;  %s9630_s17 = smov %s4705_s24 }
 0xa07   : > { %s9631_s18 = smov %s4694_s21  ;;  %17 = sbr.rel (!%p15_p10) target bundleno = 3 (0x3), region = 79 }
 0xa0c   :  { %4044 = vsyncpa [#allocation3], 1 }
 0xa0d   :  { %4046 = vsyncpa [#allocation3 + $0x1], 1 }

</bundles_post_ra>
